<compile_context>
chip_gen: v7x
topology: tpu7x:2x2x1
jax: 0.10.0
libtpu: 0.0.40
codegen_flags: <defaults>
</compile_context>

<pallas_src>
import jax
import jax.numpy as jnp
from jax.experimental import pallas as pl
from jax.experimental.pallas import tpu as pltpu

# ---- model hyper-parameters (small, consistent with LFADS_MultiSession_Net) ----
N_CELLS = 16   # neurons of session 0 (rows of W_in / W_out)
FACTOR  = 8    # factor_size == LFADS input_size in the multi-session net
G_ENC   = 32   # g_encoder_size
C_ENC   = 32   # c_encoder_size
G_LAT   = 32   # g_latent_size
U_LAT   = 4    # u_latent_size
CTRL    = 32   # controller_size
GEN     = 32   # generator_size (== g_latent_size -> fc_genstate is Identity)
CLIP    = 5.0
T_STEPS = 8
BATCH   = 2
B_PAD   = 8    # batch rows padded to a sublane multiple

assert G_LAT == GEN, "fc_genstate must be Identity for this kernel"

F32 = jnp.float32
BF16 = jnp.bfloat16
H2 = G_ENC + C_ENC            # fused (g-enc + c-enc) hidden width per direction (64)
HE = 2 * H2                   # fused bidirectional encoder hidden width (128)
OUT_W = 128                   # packed output slab width (lane-dense)
OUT_PAD = OUT_W - (N_CELLS + FACTOR + U_LAT)


def lfads_kernel(
    # data inputs (flattened time-major, batch padded to B_PAD)
    x_ref, eps_g0_ref, eps_u_ref,
    # fused bidirectional encoder (read-in folded in)
    w_enc_x_ref, b_enc_x_ref, whh_enc_ref, bhh_enc_ref, init_enc_ref, ctrl_init_ref,
    # fc_g0_theta
    wg0_ref, bg0_ref,
    # controller LFADS_GenGRUCell (input path fused, cenc part only) + fc_u_theta
    wxc_cenc_ref, whru_c_ref, bhru_c_ref, wrhc_c_ref, brhc_c_ref, wu_ref, bu_ref,
    # generator LFADS_GenGRUCell (input path fused)
    wx_gen_ref, whru_g_ref, bhru_g_ref, wrhc_g_ref, brhc_g_ref,
    # fc_factors fused with fac->controller projection, and read-out
    wfac_comb_ref, w_out_ref, b_out_ref,
    # single packed output slab [T*B_PAD, 128]: rates | factors | gen_inputs | 0
    out_ref,
):
    T, B = T_STEPS, B_PAD

    def mm(a, w):  # bf16 MXU inputs, f32 accumulate
        return jnp.dot(a.astype(BF16), w, preferred_element_type=F32)

    # ------------- fused encoder input projection (read-in folded) -- ONE matmul
    # x_ref row block i = [x(i) | x(T-1-i)]; result gate layout per gate k:
    # [fwd(i) gate k (64) | bwd(T-1-i) gate k (64)].
    gi_all = mm(x_ref[...], w_enc_x_ref[...]) + b_enc_x_ref[...]        # [T*B, 384]

    whh_e = whh_enc_ref[...]
    bhh_e = bhh_enc_ref[...]
    h = jnp.broadcast_to(init_enc_ref[...], (B, HE)).astype(F32)        # [B, 128]

    cfwd = [None] * T
    cbwd = [None] * T
    # fully-unrolled fused (fwd+bwd, g-enc+c-enc) torch.nn.GRU recurrence
    for i in range(T):
        gi = gi_all[i * B:(i + 1) * B, :]
        gh = mm(h, whh_e) + bhh_e                                       # [B, 384]
        r = jax.nn.sigmoid(gi[:, :HE] + gh[:, :HE])
        z = jax.nn.sigmoid(gi[:, HE:2 * HE] + gh[:, HE:2 * HE])
        n = jnp.tanh(gi[:, 2 * HE:] + r * gh[:, 2 * HE:])
        h = (1.0 - z) * n + z * h
        # clipped c-encoder outputs, kept in registers (no VMEM scratch)
        cfwd[i] = jnp.clip(h[:, G_ENC:H2], -CLIP, CLIP)                 # fwd @ time i
        cbwd[T - 1 - i] = jnp.clip(h[:, H2 + G_ENC:], -CLIP, CLIP)      # bwd @ time T-1-i

    # ------------- g0 posterior and generator initial state ---------------------
    h_g = jnp.clip(jnp.concatenate([h[:, :G_ENC], h[:, H2:H2 + G_ENC]], axis=1),
                   -CLIP, CLIP)                                         # [B, 64]
    g0 = mm(h_g, wg0_ref[...]) + bg0_ref[...]
    # sample_gaussian with externally supplied eps; fc_genstate == Identity
    gen = jnp.exp(0.5 * g0[:, G_LAT:]) * eps_g0_ref[...] + g0[:, :G_LAT]  # [B, GEN]

    # ------------- controller input projection of c-enc outputs (all T at once) -
    cenc_all = jnp.concatenate(
        [jnp.concatenate([cfwd[t], cbwd[t]], axis=1) for t in range(T)], axis=0)
    gic_all = mm(cenc_all, wxc_cenc_ref[...])                           # [T*B, 96]

    whru_c, bhru_c = whru_c_ref[...], bhru_c_ref[...]
    wrhc_c, brhc_c = wrhc_c_ref[...], brhc_c_ref[...]
    wu, bu = wu_ref[...], bu_ref[...]
    wx_gen = wx_gen_ref[...]
    whru_g, bhru_g = whru_g_ref[...], bhru_g_ref[...]
    wrhc_g, brhc_g = wrhc_g_ref[...], brhc_g_ref[...]
    wfac_comb = wfac_comb_ref[...]
    eps_u = eps_u_ref[...]                                              # [T*B, U_LAT]

    # TODO(synk): LFADS_GenGRUCell (models/rnn.py) not provided; implemented the
    # standard LFADS GenGRU equations: gates from x & h (input path bias-free),
    # candidate uses r*h, update u*h + (1-u)*c. Input-path matmuls are fused:
    # gi = x @ [Wxru | Wxc].
    def gengru_step(gi, hst, whru, bhru, wrhc, brhc, H):
        ru = jax.nn.sigmoid(gi[:, :2 * H] + mm(hst, whru) + bhru)
        r, u = ru[:, :H], ru[:, H:]
        c = jnp.tanh(gi[:, 2 * H:] + mm(r * hst, wrhc) + brhc)
        return u * hst + (1.0 - u) * c

    # one matmul yields both fac (cols 0:FACTOR) and its controller-input
    # contribution (cols FACTOR:), removing a dependent matmul from the chain.
    fc = mm(gen, wfac_comb)                                             # [B, 8+96]
    ctrl = jnp.broadcast_to(ctrl_init_ref[...], (B, CTRL)).astype(F32)

    facs = [None] * T
    gins = [None] * T
    # ------------- fully-unrolled decoder loop -----------------------------------
    for t in range(T):
        rows = slice(t * B, (t + 1) * B)
        gi_c = gic_all[rows, :] + fc[:, FACTOR:]                        # controller input
        ctrl = jnp.clip(gengru_step(gi_c, ctrl, whru_c, bhru_c, wrhc_c, brhc_c, CTRL),
                        -CLIP, CLIP)
        up = mm(ctrl, wu) + bu                                          # fc_u_theta
        gin = jnp.exp(0.5 * up[:, U_LAT:]) * eps_u[rows, :] + up[:, :U_LAT]
        gi_g = mm(gin, wx_gen)
        gen = jnp.clip(gengru_step(gi_g, gen, whru_g, bhru_g, wrhc_g, brhc_g, GEN),
                       -CLIP, CLIP)
        fc = mm(gen, wfac_comb)
        facs[t] = fc[:, :FACTOR]
        gins[t] = gin

    # ------------- read-out + single dense, lane-aligned store -------------------
    facs_all = jnp.concatenate(facs, axis=0)                            # [T*B, 8]
    gins_all = jnp.concatenate(gins, axis=0)                            # [T*B, 4]
    rates_all = jnp.exp(mm(facs_all, w_out_ref[...]) + b_out_ref[...])  # [T*B, 16]
    pad = jnp.zeros((T * B, OUT_PAD), F32)
    out_ref[...] = jnp.concatenate([rates_all, facs_all, gins_all, pad], axis=1)


def make_params(key):
    """Deterministic synthetic init mirroring initialize_weights():
    weights ~ N(0, fan_in^-0.5), biases small, init-state params = zeros,
    fc_factors rows L2-normalized (do_normalize_factors=True)."""
    keys = iter(jax.random.split(key, 64))

    def w(shape, fan_in):
        return jax.random.normal(next(keys), shape, F32) * (fan_in ** -0.5)

    def b(shape):
        return jax.random.normal(next(keys), shape, F32) * 0.01

    p = {}
    # session 0 read-in / read-out (W_in, W_out are [N_CELLS, FACTOR])
    p['w_in'] = w((N_CELLS, FACTOR), N_CELLS)          # fc_input_0: x @ W_in + b_in
    p['b_in'] = b((1, FACTOR))
    # zero-initialized learned initial states
    p['ge_init'] = jnp.zeros((2, G_ENC), F32)
    p['ce_init'] = jnp.zeros((2, C_ENC), F32)
    p['ctrl_init'] = jnp.zeros((1, CTRL), F32)
    # bidirectional GRU encoders (weights stored pre-transposed: [in, 3H])
    for tag, H in (('gf', G_ENC), ('gb', G_ENC), ('cf', C_ENC), ('cb', C_ENC)):
        p[f'wih_{tag}'] = w((FACTOR, 3 * H), FACTOR)
        p[f'whh_{tag}'] = w((H, 3 * H), H)
        p[f'bih_{tag}'] = b((1, 3 * H))
        p[f'bhh_{tag}'] = b((1, 3 * H))
    # fc_g0_theta
    p['wg0'] = w((2 * G_ENC, 2 * G_LAT), 2 * G_ENC)
    p['bg0'] = b((1, 2 * G_LAT))
    # controller GenGRU + fc_u_theta
    cin = 2 * C_ENC + FACTOR
    p['wxru_c'] = w((cin, 2 * CTRL), cin)
    p['whru_c'] = w((CTRL, 2 * CTRL), CTRL)
    p['bhru_c'] = b((1, 2 * CTRL))
    p['wxc_c'] = w((cin, CTRL), cin)
    p['wrhc_c'] = w((CTRL, CTRL), CTRL)
    p['brhc_c'] = b((1, CTRL))
    p['wu'] = w((CTRL, 2 * U_LAT), CTRL)
    p['bu'] = b((1, 2 * U_LAT))
    # generator GenGRU + fc_factors
    p['wxru_g'] = w((U_LAT, 2 * GEN), U_LAT)
    p['whru_g'] = w((GEN, 2 * GEN), GEN)
    p['bhru_g'] = b((1, 2 * GEN))
    p['wxc_g'] = w((U_LAT, GEN), U_LAT)
    p['wrhc_g'] = w((GEN, GEN), GEN)
    p['brhc_g'] = b((1, GEN))
    wfac = w((FACTOR, GEN), GEN)                        # torch layout [F, GEN]
    wfac = wfac / jnp.linalg.norm(wfac, axis=1, keepdims=True)  # normalize_factors (dim=1)
    p['wfac'] = wfac.T                                  # kernel does gen @ wfac -> [B, F]
    # fc_logrates_0.
    # TODO(synk): the source assigns weight.data = W_out.permute(1,0), which is
    # shape-inconsistent with nn.Linear(F, N); we implement the intended readout
    # logrates = factors @ W_out^T + b_out with W_out of shape [N_CELLS, FACTOR].
    w_out = w((N_CELLS, FACTOR), FACTOR)
    p['w_out'] = w_out.T                                # [F, N]
    p['b_out'] = b((1, N_CELLS))
    return p


def prep_fused_params(p):
    """Fuse / fold weights ONCE (outside the per-call path):
      - g-enc + c-enc fused per direction, then fwd + bwd fused per gate
        (block-diagonal hidden weights, read-in folded into the input weights),
      - GenGRU input paths fused, fac->controller projection folded into Wfac,
      - weight matrices cast to bf16 for the MXU (biases / inits stay f32)."""
    f = {}

    def fuse_gate_cols(a, bm, Ha, Hb):
        # a: [*, 3Ha], bm: [*, 3Hb] -> [*, 3(Ha+Hb)] with per-gate interleave [gA|gB]
        return jnp.concatenate([a[:, 0:Ha], bm[:, 0:Hb],
                                a[:, Ha:2 * Ha], bm[:, Hb:2 * Hb],
                                a[:, 2 * Ha:3 * Ha], bm[:, 2 * Hb:3 * Hb]], axis=1)

    def fuse_blockdiag_hh(a, bm, Ha, Hb):
        # a: [Ha, 3Ha], bm: [Hb, 3Hb] -> [Ha+Hb, 3(Ha+Hb)] block-diagonal per gate
        z_ab = jnp.zeros((Ha, Hb), F32)
        z_ba = jnp.zeros((Hb, Ha), F32)
        cols = []
        for k in range(3):
            top = jnp.concatenate([a[:, k * Ha:(k + 1) * Ha], z_ab], axis=1)
            bot = jnp.concatenate([z_ba, bm[:, k * Hb:(k + 1) * Hb]], axis=1)
            cols.append(jnp.concatenate([top, bot], axis=0))
        return jnp.concatenate(cols, axis=1)

    # --- per-direction fuse (g-enc + c-enc), read-in folded ----------------------
    per_dir = {}
    for d, g, c in (('fwd', 'gf', 'cf'), ('bwd', 'gb', 'cb')):
        wih = fuse_gate_cols(p[f'wih_{g}'], p[f'wih_{c}'], G_ENC, C_ENC)   # [F, 3*H2]
        bih = fuse_gate_cols(p[f'bih_{g}'], p[f'bih_{c}'], G_ENC, C_ENC)
        whh = fuse_blockdiag_hh(p[f'whh_{g}'], p[f'whh_{c}'], G_ENC, C_ENC)
        bhh = fuse_gate_cols(p[f'bhh_{g}'], p[f'bhh_{c}'], G_ENC, C_ENC)
        wx = p['w_in'] @ wih                    # fold fc_input_0 weight
        bx = p['b_in'] @ wih + bih              # fold fc_input_0 bias
        per_dir[d] = (wx, bx, whh, bhh)

    # --- fuse fwd + bwd per gate (x_comb = [x(t) | x(T-1-t)]) --------------------
    wxf, bxf, whhf, bhhf = per_dir['fwd']
    wxb, bxb, whhb, bhhb = per_dir['bwd']
    zc = jnp.zeros((N_CELLS, H2), F32)
    zh = jnp.zeros((H2, H2), F32)
    wex_cols, bex_cols, whh_cols, bhh_cols = [], [], [], []
    for k in range(3):
        cf = slice(k * H2, (k + 1) * H2)
        wex_cols.append(jnp.concatenate(
            [jnp.concatenate([wxf[:, cf], zc], axis=1),
             jnp.concatenate([zc, wxb[:, cf]], axis=1)], axis=0))        # [32, 128]
        bex_cols.append(jnp.concatenate([bxf[:, cf], bxb[:, cf]], axis=1))
        whh_cols.append(jnp.concatenate(
            [jnp.concatenate([whhf[:, cf], zh], axis=1),
             jnp.concatenate([zh, whhb[:, cf]], axis=1)], axis=0))       # [128, 128]
        bhh_cols.append(jnp.concatenate([bhhf[:, cf], bhhb[:, cf]], axis=1))
    f['w_enc_x'] = jnp.concatenate(wex_cols, axis=1)        # [32, 384]
    f['b_enc_x'] = jnp.concatenate(bex_cols, axis=1)        # [1, 384]
    f['whh_enc'] = jnp.concatenate(whh_cols, axis=1)        # [128, 384]
    f['bhh_enc'] = jnp.concatenate(bhh_cols, axis=1)        # [1, 384]
    f['init_enc'] = jnp.concatenate([p['ge_init'][0:1], p['ce_init'][0:1],
                                     p['ge_init'][1:2], p['ce_init'][1:2]], axis=1)
    f['ctrl_init'] = p['ctrl_init']
    f['wg0'], f['bg0'] = p['wg0'], p['bg0']

    # --- controller / generator fusions ------------------------------------------
    cw = 2 * C_ENC
    wx_ctrl_cenc = jnp.concatenate([p['wxru_c'][:cw], p['wxc_c'][:cw]], axis=1)  # [64, 96]
    wx_ctrl_fac = jnp.concatenate([p['wxru_c'][cw:], p['wxc_c'][cw:]], axis=1)   # [8, 96]
    f['wxc_cenc'] = wx_ctrl_cenc
    f['whru_c'], f['bhru_c'] = p['whru_c'], p['bhru_c']
    f['wrhc_c'], f['brhc_c'] = p['wrhc_c'], p['brhc_c']
    f['wu'], f['bu'] = p['wu'], p['bu']
    f['wx_gen'] = jnp.concatenate([p['wxru_g'], p['wxc_g']], axis=1)             # [4, 96]
    f['whru_g'], f['bhru_g'] = p['whru_g'], p['bhru_g']
    f['wrhc_g'], f['brhc_g'] = p['wrhc_g'], p['brhc_g']
    # fold fac -> controller-input projection into the fc_factors matmul
    f['wfac_comb'] = jnp.concatenate([p['wfac'], p['wfac'] @ wx_ctrl_fac], axis=1)  # [32, 104]
    f['w_out'], f['b_out'] = p['w_out'], p['b_out']

    # --- cast weight matrices to bf16 for the MXU (biases / inits stay f32) ------
    for k in ('w_enc_x', 'whh_enc', 'wg0', 'wxc_cenc', 'whru_c', 'wrhc_c', 'wu',
              'wx_gen', 'whru_g', 'wrhc_g', 'wfac_comb', 'w_out'):
        f[k] = f[k].astype(BF16)
    return f


FUSED_ORDER = [
    'w_enc_x', 'b_enc_x', 'whh_enc', 'bhh_enc', 'init_enc', 'ctrl_init',
    'wg0', 'bg0',
    'wxc_cenc', 'whru_c', 'bhru_c', 'wrhc_c', 'brhc_c', 'wu', 'bu',
    'wx_gen', 'whru_g', 'bhru_g', 'wrhc_g', 'brhc_g',
    'wfac_comb', 'w_out', 'b_out',
]


def gp_to_normal(gp_mean, gp_logvar, gp_logtau, process):
    """Plain-JAX replica of LFADS_Net._gp_to_normal (attribute-only outputs)."""
    T_, B_, U_ = process.shape
    alpha = jnp.exp(-1.0 / jnp.exp(gp_logtau))
    mean0 = jnp.broadcast_to(gp_mean, (1, B_, U_))
    logvar0 = jnp.broadcast_to(gp_logvar, (1, B_, U_))
    pmean = gp_mean + (process[:-1] - gp_mean) * alpha
    plogvar = jnp.log(1.0 - alpha ** 2) + jnp.broadcast_to(gp_logvar, (T_ - 1, B_, U_))
    mean = jnp.concatenate([mean0, pmean], axis=0)
    logvar = jnp.concatenate([logvar0, plogvar], axis=0)
    return mean.transpose(1, 0, 2), logvar.transpose(1, 0, 2)


@jax.jit
def lfads_multisession_forward(x_btn, fused, eps_g0, eps_u):
    """x_btn: [batch, time, cells] for session 0 (dropout p=0.0 -> identity).
    `fused` is the output of prep_fused_params (computed once, reused)."""
    # time-major; build x_comb = [x(t) | x(T-1-t)] so the fused encoder input
    # projection is iteration-aligned; pad batch rows 2..7 with zeros.
    x_tm = jnp.transpose(x_btn, (1, 0, 2)).astype(F32)                  # [T, B, N]
    x_comb = jnp.concatenate([x_tm, x_tm[::-1]], axis=-1)               # [T, B, 2N]
    x_pad = jnp.zeros((T_STEPS, B_PAD, 2 * N_CELLS), F32).at[:, :BATCH].set(x_comb)
    x_flat = x_pad.reshape(T_STEPS * B_PAD, 2 * N_CELLS)
    eps_g0_pad = jnp.zeros((B_PAD, G_LAT), F32).at[:BATCH].set(eps_g0.astype(F32))
    eps_u_pad = jnp.zeros((T_STEPS, B_PAD, U_LAT), F32).at[:, :BATCH].set(eps_u.astype(F32))
    eps_u_flat = eps_u_pad.reshape(T_STEPS * B_PAD, U_LAT)

    args = [x_flat, eps_g0_pad, eps_u_flat] + [fused[k] for k in FUSED_ORDER]
    vmem = lambda: pl.BlockSpec(memory_space=pltpu.MemorySpace.VMEM)

    # NOTE: gridless single-program kernel (footprint << VMEM on v5e/v6e/v7x).
    # TODO(synk): if batch / sessions grow, add a leading grid axis over batch
    # with dimension_semantics=("parallel",) to use v7x's second TensorCore.
    slab = pl.pallas_call(
        lfads_kernel,
        out_shape=jax.ShapeDtypeStruct((T_STEPS * B_PAD, OUT_W), F32),
        in_specs=[vmem() for _ in args],
        out_specs=vmem(),
    )(*args)

    slab = slab.reshape(T_STEPS, B_PAD, OUT_W)
    rates = jnp.transpose(slab[:, :BATCH, :N_CELLS], (1, 0, 2))           # [B, T, N]
    factors = slab[:, :BATCH, N_CELLS:N_CELLS + FACTOR]                   # [T, B, F]
    gen_inputs = slab[:, :BATCH, N_CELLS + FACTOR:N_CELLS + FACTOR + U_LAT]  # [T, B, U]
    recon = {'rates': rates, 'data': rates}

    # u prior (attribute side-effects in the torch module; plain-JAX glue)
    u_prior_gp_mean = jnp.zeros((U_LAT,), F32)
    u_prior_gp_logvar = jnp.full((U_LAT,), jnp.log(0.1), F32)
    u_prior_gp_logtau = jnp.full((U_LAT,), jnp.log(10.0), F32)
    u_prior_mean, u_prior_logvar = gp_to_normal(
        u_prior_gp_mean, u_prior_gp_logvar, u_prior_gp_logtau, gen_inputs)

    aux = {'u_prior_mean': u_prior_mean, 'u_prior_logvar': u_prior_logvar}
    return recon, (factors, gen_inputs), aux


if __name__ == "__main__":
    key = jax.random.PRNGKey(0)
    k_x, k_p, k_e0, k_eu = jax.random.split(key, 4)

    # session-0 input, PyTorch layout [batch, time, cells]; input.session == 0
    x = jax.random.normal(k_x, (BATCH, T_STEPS, N_CELLS), F32)
    params = make_params(k_p)
    fused = prep_fused_params(params)          # computed ONCE, reused per call
    fused = jax.tree_util.tree_map(jax.block_until_ready, fused)
    # deterministic replacements for torch.randn in sample_gaussian
    eps_g0 = jax.random.normal(k_e0, (BATCH, G_LAT), F32)
    eps_u = jax.random.normal(k_eu, (T_STEPS, BATCH, U_LAT), F32)

    recon, (factors, gen_inputs), aux = lfads_multisession_forward(x, fused, eps_g0, eps_u)
    jax.block_until_ready(recon['rates'])
    jax.block_until_ready(factors)
    jax.block_until_ready(gen_inputs)

    assert recon['rates'].shape == (BATCH, T_STEPS, N_CELLS)
    assert factors.shape == (T_STEPS, BATCH, FACTOR)
    assert gen_inputs.shape == (T_STEPS, BATCH, U_LAT)
    assert bool(jnp.all(jnp.isfinite(recon['rates']))) and bool(jnp.all(recon['rates'] > 0))
    print("KERNEL_OK")
</pallas_src>

<mosaic_0001>
module attributes {stable_mosaic.version = 11 : i64} {
  func.func @lfads_kernel(%arg0: memref<64x32xf32, #tpu.memory_space<vmem>>, %arg1: memref<8x32xf32, #tpu.memory_space<vmem>>, %arg2: memref<64x4xf32, #tpu.memory_space<vmem>>, %arg3: memref<32x384xbf16, #tpu.memory_space<vmem>>, %arg4: memref<1x384xf32, #tpu.memory_space<vmem>>, %arg5: memref<128x384xbf16, #tpu.memory_space<vmem>>, %arg6: memref<1x384xf32, #tpu.memory_space<vmem>>, %arg7: memref<1x128xf32, #tpu.memory_space<vmem>>, %arg8: memref<1x32xf32, #tpu.memory_space<vmem>>, %arg9: memref<64x64xbf16, #tpu.memory_space<vmem>>, %arg10: memref<1x64xf32, #tpu.memory_space<vmem>>, %arg11: memref<64x96xbf16, #tpu.memory_space<vmem>>, %arg12: memref<32x64xbf16, #tpu.memory_space<vmem>>, %arg13: memref<1x64xf32, #tpu.memory_space<vmem>>, %arg14: memref<32x32xbf16, #tpu.memory_space<vmem>>, %arg15: memref<1x32xf32, #tpu.memory_space<vmem>>, %arg16: memref<32x8xbf16, #tpu.memory_space<vmem>>, %arg17: memref<1x8xf32, #tpu.memory_space<vmem>>, %arg18: memref<4x96xbf16, #tpu.memory_space<vmem>>, %arg19: memref<32x64xbf16, #tpu.memory_space<vmem>>, %arg20: memref<1x64xf32, #tpu.memory_space<vmem>>, %arg21: memref<32x32xbf16, #tpu.memory_space<vmem>>, %arg22: memref<1x32xf32, #tpu.memory_space<vmem>>, %arg23: memref<32x104xbf16, #tpu.memory_space<vmem>>, %arg24: memref<8x16xbf16, #tpu.memory_space<vmem>>, %arg25: memref<1x16xf32, #tpu.memory_space<vmem>>, %arg26: memref<64x128xf32, #tpu.memory_space<vmem>>) attributes {dimension_semantics = [], scalar_prefetch = 0 : i64, scratch_operands = 0 : i64, tpu.core_type = #tpu.core_type<tc>} {
    %c0 = arith.constant 0 : index
    %c0_0 = arith.constant 0 : index
    %0 = vector.load %arg0[%c0, %c0_0] : memref<64x32xf32, #tpu.memory_space<vmem>>, vector<64x32xf32>
    %c0_1 = arith.constant 0 : index
    %c0_2 = arith.constant 0 : index
    %1 = vector.load %arg3[%c0_1, %c0_2] : memref<32x384xbf16, #tpu.memory_space<vmem>>, vector<32x384xbf16>
    %2 = arith.truncf %0 : vector<64x32xf32> to vector<64x32xbf16>
    %cst = arith.constant dense<0.000000e+00> : vector<64x384xf32>
    %3 = tpu.matmul %2, %1, %cst {dimension_numbers = #tpu.dot_dimension_numbers<[1], [0], [0], [1], [0, 0, 1, 1], [], []>} : vector<64x32xbf16>, vector<32x384xbf16>, vector<64x384xf32> -> vector<64x384xf32>
    %c0_3 = arith.constant 0 : index
    %c0_4 = arith.constant 0 : index
    %4 = vector.load %arg4[%c0_3, %c0_4] : memref<1x384xf32, #tpu.memory_space<vmem>>, vector<1x384xf32>
    %5 = vector.broadcast %4 : vector<1x384xf32> to vector<64x384xf32>
    %6 = arith.addf %3, %5 : vector<64x384xf32>
    %c0_5 = arith.constant 0 : index
    %c0_6 = arith.constant 0 : index
    %7 = vector.load %arg5[%c0_5, %c0_6] : memref<128x384xbf16, #tpu.memory_space<vmem>>, vector<128x384xbf16>
    %c0_7 = arith.constant 0 : index
    %c0_8 = arith.constant 0 : index
    %8 = vector.load %arg6[%c0_7, %c0_8] : memref<1x384xf32, #tpu.memory_space<vmem>>, vector<1x384xf32>
    %c0_9 = arith.constant 0 : index
    %c0_10 = arith.constant 0 : index
    %9 = vector.load %arg7[%c0_9, %c0_10] : memref<1x128xf32, #tpu.memory_space<vmem>>, vector<1x128xf32>
    %10 = vector.shape_cast %9 : vector<1x128xf32> to vector<1x128xf32>
    %11 = vector.broadcast %10 : vector<1x128xf32> to vector<8x128xf32>
    %12 = vector.extract_strided_slice %6 {offsets = [0, 0], sizes = [8, 384], strides = [1, 1]} : vector<64x384xf32> to vector<8x384xf32>
    %13 = arith.truncf %11 : vector<8x128xf32> to vector<8x128xbf16>
    %cst_11 = arith.constant dense<0.000000e+00> : vector<8x384xf32>
    %14 = tpu.matmul %13, %7, %cst_11 {dimension_numbers = #tpu.dot_dimension_numbers<[1], [0], [0], [1], [0, 0, 1, 1], [], []>} : vector<8x128xbf16>, vector<128x384xbf16>, vector<8x384xf32> -> vector<8x384xf32>
    %15 = vector.broadcast %8 : vector<1x384xf32> to vector<8x384xf32>
    %16 = arith.addf %14, %15 : vector<8x384xf32>
    %17 = vector.extract_strided_slice %12 {offsets = [0, 0], sizes = [8, 128], strides = [1, 1]} : vector<8x384xf32> to vector<8x128xf32>
    %18 = vector.extract_strided_slice %16 {offsets = [0, 0], sizes = [8, 128], strides = [1, 1]} : vector<8x384xf32> to vector<8x128xf32>
    %19 = arith.addf %17, %18 : vector<8x128xf32>
    %20 = arith.negf %19 : vector<8x128xf32>
    %21 = math.exp %20 : vector<8x128xf32>
    %cst_12 = arith.constant 1.000000e+00 : f32
    %22 = vector.broadcast %cst_12 : f32 to vector<8x128xf32>
    %23 = arith.addf %22, %21 : vector<8x128xf32>
    %24 = arith.divf %22, %23 : vector<8x128xf32>
    %25 = vector.extract_strided_slice %12 {offsets = [0, 128], sizes = [8, 128], strides = [1, 1]} : vector<8x384xf32> to vector<8x128xf32>
    %26 = vector.extract_strided_slice %16 {offsets = [0, 128], sizes = [8, 128], strides = [1, 1]} : vector<8x384xf32> to vector<8x128xf32>
    %27 = arith.addf %25, %26 : vector<8x128xf32>
    %28 = arith.negf %27 : vector<8x128xf32>
    %29 = math.exp %28 : vector<8x128xf32>
    %cst_13 = arith.constant 1.000000e+00 : f32
    %30 = vector.broadcast %cst_13 : f32 to vector<8x128xf32>
    %31 = arith.addf %30, %29 : vector<8x128xf32>
    %32 = arith.divf %30, %31 : vector<8x128xf32>
    %33 = vector.extract_strided_slice %12 {offsets = [0, 256], sizes = [8, 128], strides = [1, 1]} : vector<8x384xf32> to vector<8x128xf32>
    %34 = vector.extract_strided_slice %16 {offsets = [0, 256], sizes = [8, 128], strides = [1, 1]} : vector<8x384xf32> to vector<8x128xf32>
    %35 = arith.mulf %24, %34 : vector<8x128xf32>
    %36 = arith.addf %33, %35 : vector<8x128xf32>
    %37 = math.tanh %36 : vector<8x128xf32>
    %cst_14 = arith.constant 1.000000e+00 : f32
    %38 = vector.broadcast %cst_14 : f32 to vector<8x128xf32>
    %39 = arith.subf %38, %32 : vector<8x128xf32>
    %40 = arith.mulf %39, %37 : vector<8x128xf32>
    %41 = arith.mulf %32, %11 : vector<8x128xf32>
    %42 = arith.addf %40, %41 : vector<8x128xf32>
    %43 = vector.extract_strided_slice %42 {offsets = [0, 32], sizes = [8, 32], strides = [1, 1]} : vector<8x128xf32> to vector<8x32xf32>
    %cst_15 = arith.constant -5.000000e+00 : f32
    %cst_16 = arith.constant 5.000000e+00 : f32
    %44 = vector.broadcast %cst_15 : f32 to vector<8x32xf32>
    %45 = arith.maximumf %44, %43 : vector<8x32xf32>
    %46 = vector.broadcast %cst_16 : f32 to vector<8x32xf32>
    %47 = arith.minimumf %46, %45 : vector<8x32xf32>
    %48 = vector.extract_strided_slice %42 {offsets = [0, 96], sizes = [8, 32], strides = [1, 1]} : vector<8x128xf32> to vector<8x32xf32>
    %cst_17 = arith.constant -5.000000e+00 : f32
    %cst_18 = arith.constant 5.000000e+00 : f32
    %49 = vector.broadcast %cst_17 : f32 to vector<8x32xf32>
    %50 = arith.maximumf %49, %48 : vector<8x32xf32>
    %51 = vector.broadcast %cst_18 : f32 to vector<8x32xf32>
    %52 = arith.minimumf %51, %50 : vector<8x32xf32>
    %53 = vector.extract_strided_slice %6 {offsets = [8, 0], sizes = [8, 384], strides = [1, 1]} : vector<64x384xf32> to vector<8x384xf32>
    %54 = arith.truncf %42 : vector<8x128xf32> to vector<8x128xbf16>
    %cst_19 = arith.constant dense<0.000000e+00> : vector<8x384xf32>
    %55 = tpu.matmul %54, %7, %cst_19 {dimension_numbers = #tpu.dot_dimension_numbers<[1], [0], [0], [1], [0, 0, 1, 1], [], []>} : vector<8x128xbf16>, vector<128x384xbf16>, vector<8x384xf32> -> vector<8x384xf32>
    %56 = vector.broadcast %8 : vector<1x384xf32> to vector<8x384xf32>
    %57 = arith.addf %55, %56 : vector<8x384xf32>
    %58 = vector.extract_strided_slice %53 {offsets = [0, 0], sizes = [8, 128], strides = [1, 1]} : vector<8x384xf32> to vector<8x128xf32>
    %59 = vector.extract_strided_slice %57 {offsets = [0, 0], sizes = [8, 128], strides = [1, 1]} : vector<8x384xf32> to vector<8x128xf32>
    %60 = arith.addf %58, %59 : vector<8x128xf32>
    %61 = arith.negf %60 : vector<8x128xf32>
    %62 = math.exp %61 : vector<8x128xf32>
    %cst_20 = arith.constant 1.000000e+00 : f32
    %63 = vector.broadcast %cst_20 : f32 to vector<8x128xf32>
    %64 = arith.addf %63, %62 : vector<8x128xf32>
    %65 = arith.divf %63, %64 : vector<8x128xf32>
    %66 = vector.extract_strided_slice %53 {offsets = [0, 128], sizes = [8, 128], strides = [1, 1]} : vector<8x384xf32> to vector<8x128xf32>
    %67 = vector.extract_strided_slice %57 {offsets = [0, 128], sizes = [8, 128], strides = [1, 1]} : vector<8x384xf32> to vector<8x128xf32>
    %68 = arith.addf %66, %67 : vector<8x128xf32>
    %69 = arith.negf %68 : vector<8x128xf32>
    %70 = math.exp %69 : vector<8x128xf32>
    %cst_21 = arith.constant 1.000000e+00 : f32
    %71 = vector.broadcast %cst_21 : f32 to vector<8x128xf32>
    %72 = arith.addf %71, %70 : vector<8x128xf32>
    %73 = arith.divf %71, %72 : vector<8x128xf32>
    %74 = vector.extract_strided_slice %53 {offsets = [0, 256], sizes = [8, 128], strides = [1, 1]} : vector<8x384xf32> to vector<8x128xf32>
    %75 = vector.extract_strided_slice %57 {offsets = [0, 256], sizes = [8, 128], strides = [1, 1]} : vector<8x384xf32> to vector<8x128xf32>
    %76 = arith.mulf %65, %75 : vector<8x128xf32>
    %77 = arith.addf %74, %76 : vector<8x128xf32>
    %78 = math.tanh %77 : vector<8x128xf32>
    %cst_22 = arith.constant 1.000000e+00 : f32
    %79 = vector.broadcast %cst_22 : f32 to vector<8x128xf32>
    %80 = arith.subf %79, %73 : vector<8x128xf32>
    %81 = arith.mulf %80, %78 : vector<8x128xf32>
    %82 = arith.mulf %73, %42 : vector<8x128xf32>
    %83 = arith.addf %81, %82 : vector<8x128xf32>
    %84 = vector.extract_strided_slice %83 {offsets = [0, 32], sizes = [8, 32], strides = [1, 1]} : vector<8x128xf32> to vector<8x32xf32>
    %cst_23 = arith.constant -5.000000e+00 : f32
    %cst_24 = arith.constant 5.000000e+00 : f32
    %85 = vector.broadcast %cst_23 : f32 to vector<8x32xf32>
    %86 = arith.maximumf %85, %84 : vector<8x32xf32>
    %87 = vector.broadcast %cst_24 : f32 to vector<8x32xf32>
    %88 = arith.minimumf %87, %86 : vector<8x32xf32>
    %89 = vector.extract_strided_slice %83 {offsets = [0, 96], sizes = [8, 32], strides = [1, 1]} : vector<8x128xf32> to vector<8x32xf32>
    %cst_25 = arith.constant -5.000000e+00 : f32
    %cst_26 = arith.constant 5.000000e+00 : f32
    %90 = vector.broadcast %cst_25 : f32 to vector<8x32xf32>
    %91 = arith.maximumf %90, %89 : vector<8x32xf32>
    %92 = vector.broadcast %cst_26 : f32 to vector<8x32xf32>
    %93 = arith.minimumf %92, %91 : vector<8x32xf32>
    %94 = vector.extract_strided_slice %6 {offsets = [16, 0], sizes = [8, 384], strides = [1, 1]} : vector<64x384xf32> to vector<8x384xf32>
    %95 = arith.truncf %83 : vector<8x128xf32> to vector<8x128xbf16>
    %cst_27 = arith.constant dense<0.000000e+00> : vector<8x384xf32>
    %96 = tpu.matmul %95, %7, %cst_27 {dimension_numbers = #tpu.dot_dimension_numbers<[1], [0], [0], [1], [0, 0, 1, 1], [], []>} : vector<8x128xbf16>, vector<128x384xbf16>, vector<8x384xf32> -> vector<8x384xf32>
    %97 = vector.broadcast %8 : vector<1x384xf32> to vector<8x384xf32>
    %98 = arith.addf %96, %97 : vector<8x384xf32>
    %99 = vector.extract_strided_slice %94 {offsets = [0, 0], sizes = [8, 128], strides = [1, 1]} : vector<8x384xf32> to vector<8x128xf32>
    %100 = vector.extract_strided_slice %98 {offsets = [0, 0], sizes = [8, 128], strides = [1, 1]} : vector<8x384xf32> to vector<8x128xf32>
    %101 = arith.addf %99, %100 : vector<8x128xf32>
    %102 = arith.negf %101 : vector<8x128xf32>
    %103 = math.exp %102 : vector<8x128xf32>
    %cst_28 = arith.constant 1.000000e+00 : f32
    %104 = vector.broadcast %cst_28 : f32 to vector<8x128xf32>
    %105 = arith.addf %104, %103 : vector<8x128xf32>
    %106 = arith.divf %104, %105 : vector<8x128xf32>
    %107 = vector.extract_strided_slice %94 {offsets = [0, 128], sizes = [8, 128], strides = [1, 1]} : vector<8x384xf32> to vector<8x128xf32>
    %108 = vector.extract_strided_slice %98 {offsets = [0, 128], sizes = [8, 128], strides = [1, 1]} : vector<8x384xf32> to vector<8x128xf32>
    %109 = arith.addf %107, %108 : vector<8x128xf32>
    %110 = arith.negf %109 : vector<8x128xf32>
    %111 = math.exp %110 : vector<8x128xf32>
    %cst_29 = arith.constant 1.000000e+00 : f32
    %112 = vector.broadcast %cst_29 : f32 to vector<8x128xf32>
    %113 = arith.addf %112, %111 : vector<8x128xf32>
    %114 = arith.divf %112, %113 : vector<8x128xf32>
    %115 = vector.extract_strided_slice %94 {offsets = [0, 256], sizes = [8, 128], strides = [1, 1]} : vector<8x384xf32> to vector<8x128xf32>
    %116 = vector.extract_strided_slice %98 {offsets = [0, 256], sizes = [8, 128], strides = [1, 1]} : vector<8x384xf32> to vector<8x128xf32>
    %117 = arith.mulf %106, %116 : vector<8x128xf32>
    %118 = arith.addf %115, %117 : vector<8x128xf32>
    %119 = math.tanh %118 : vector<8x128xf32>
    %cst_30 = arith.constant 1.000000e+00 : f32
    %120 = vector.broadcast %cst_30 : f32 to vector<8x128xf32>
    %121 = arith.subf %120, %114 : vector<8x128xf32>
    %122 = arith.mulf %121, %119 : vector<8x128xf32>
    %123 = arith.mulf %114, %83 : vector<8x128xf32>
    %124 = arith.addf %122, %123 : vector<8x128xf32>
    %125 = vector.extract_strided_slice %124 {offsets = [0, 32], sizes = [8, 32], strides = [1, 1]} : vector<8x128xf32> to vector<8x32xf32>
    %cst_31 = arith.constant -5.000000e+00 : f32
    %cst_32 = arith.constant 5.000000e+00 : f32
    %126 = vector.broadcast %cst_31 : f32 to vector<8x32xf32>
    %127 = arith.maximumf %126, %125 : vector<8x32xf32>
    %128 = vector.broadcast %cst_32 : f32 to vector<8x32xf32>
    %129 = arith.minimumf %128, %127 : vector<8x32xf32>
    %130 = vector.extract_strided_slice %124 {offsets = [0, 96], sizes = [8, 32], strides = [1, 1]} : vector<8x128xf32> to vector<8x32xf32>
    %cst_33 = arith.constant -5.000000e+00 : f32
    %cst_34 = arith.constant 5.000000e+00 : f32
    %131 = vector.broadcast %cst_33 : f32 to vector<8x32xf32>
    %132 = arith.maximumf %131, %130 : vector<8x32xf32>
    %133 = vector.broadcast %cst_34 : f32 to vector<8x32xf32>
    %134 = arith.minimumf %133, %132 : vector<8x32xf32>
    %135 = vector.extract_strided_slice %6 {offsets = [24, 0], sizes = [8, 384], strides = [1, 1]} : vector<64x384xf32> to vector<8x384xf32>
    %136 = arith.truncf %124 : vector<8x128xf32> to vector<8x128xbf16>
    %cst_35 = arith.constant dense<0.000000e+00> : vector<8x384xf32>
    %137 = tpu.matmul %136, %7, %cst_35 {dimension_numbers = #tpu.dot_dimension_numbers<[1], [0], [0], [1], [0, 0, 1, 1], [], []>} : vector<8x128xbf16>, vector<128x384xbf16>, vector<8x384xf32> -> vector<8x384xf32>
    %138 = vector.broadcast %8 : vector<1x384xf32> to vector<8x384xf32>
    %139 = arith.addf %137, %138 : vector<8x384xf32>
    %140 = vector.extract_strided_slice %135 {offsets = [0, 0], sizes = [8, 128], strides = [1, 1]} : vector<8x384xf32> to vector<8x128xf32>
    %141 = vector.extract_strided_slice %139 {offsets = [0, 0], sizes = [8, 128], strides = [1, 1]} : vector<8x384xf32> to vector<8x128xf32>
    %142 = arith.addf %140, %141 : vector<8x128xf32>
    %143 = arith.negf %142 : vector<8x128xf32>
    %144 = math.exp %143 : vector<8x128xf32>
    %cst_36 = arith.constant 1.000000e+00 : f32
    %145 = vector.broadcast %cst_36 : f32 to vector<8x128xf32>
    %146 = arith.addf %145, %144 : vector<8x128xf32>
    %147 = arith.divf %145, %146 : vector<8x128xf32>
    %148 = vector.extract_strided_slice %135 {offsets = [0, 128], sizes = [8, 128], strides = [1, 1]} : vector<8x384xf32> to vector<8x128xf32>
    %149 = vector.extract_strided_slice %139 {offsets = [0, 128], sizes = [8, 128], strides = [1, 1]} : vector<8x384xf32> to vector<8x128xf32>
    %150 = arith.addf %148, %149 : vector<8x128xf32>
    %151 = arith.negf %150 : vector<8x128xf32>
    %152 = math.exp %151 : vector<8x128xf32>
    %cst_37 = arith.constant 1.000000e+00 : f32
    %153 = vector.broadcast %cst_37 : f32 to vector<8x128xf32>
    %154 = arith.addf %153, %152 : vector<8x128xf32>
    %155 = arith.divf %153, %154 : vector<8x128xf32>
    %156 = vector.extract_strided_slice %135 {offsets = [0, 256], sizes = [8, 128], strides = [1, 1]} : vector<8x384xf32> to vector<8x128xf32>
    %157 = vector.extract_strided_slice %139 {offsets = [0, 256], sizes = [8, 128], strides = [1, 1]} : vector<8x384xf32> to vector<8x128xf32>
    %158 = arith.mulf %147, %157 : vector<8x128xf32>
    %159 = arith.addf %156, %158 : vector<8x128xf32>
    %160 = math.tanh %159 : vector<8x128xf32>
    %cst_38 = arith.constant 1.000000e+00 : f32
    %161 = vector.broadcast %cst_38 : f32 to vector<8x128xf32>
    %162 = arith.subf %161, %155 : vector<8x128xf32>
    %163 = arith.mulf %162, %160 : vector<8x128xf32>
    %164 = arith.mulf %155, %124 : vector<8x128xf32>
    %165 = arith.addf %163, %164 : vector<8x128xf32>
    %166 = vector.extract_strided_slice %165 {offsets = [0, 32], sizes = [8, 32], strides = [1, 1]} : vector<8x128xf32> to vector<8x32xf32>
    %cst_39 = arith.constant -5.000000e+00 : f32
    %cst_40 = arith.constant 5.000000e+00 : f32
    %167 = vector.broadcast %cst_39 : f32 to vector<8x32xf32>
    %168 = arith.maximumf %167, %166 : vector<8x32xf32>
    %169 = vector.broadcast %cst_40 : f32 to vector<8x32xf32>
    %170 = arith.minimumf %169, %168 : vector<8x32xf32>
    %171 = vector.extract_strided_slice %165 {offsets = [0, 96], sizes = [8, 32], strides = [1, 1]} : vector<8x128xf32> to vector<8x32xf32>
    %cst_41 = arith.constant -5.000000e+00 : f32
    %cst_42 = arith.constant 5.000000e+00 : f32
    %172 = vector.broadcast %cst_41 : f32 to vector<8x32xf32>
    %173 = arith.maximumf %172, %171 : vector<8x32xf32>
    %174 = vector.broadcast %cst_42 : f32 to vector<8x32xf32>
    %175 = arith.minimumf %174, %173 : vector<8x32xf32>
    %176 = vector.extract_strided_slice %6 {offsets = [32, 0], sizes = [8, 384], strides = [1, 1]} : vector<64x384xf32> to vector<8x384xf32>
    %177 = arith.truncf %165 : vector<8x128xf32> to vector<8x128xbf16>
    %cst_43 = arith.constant dense<0.000000e+00> : vector<8x384xf32>
    %178 = tpu.matmul %177, %7, %cst_43 {dimension_numbers = #tpu.dot_dimension_numbers<[1], [0], [0], [1], [0, 0, 1, 1], [], []>} : vector<8x128xbf16>, vector<128x384xbf16>, vector<8x384xf32> -> vector<8x384xf32>
    %179 = vector.broadcast %8 : vector<1x384xf32> to vector<8x384xf32>
    %180 = arith.addf %178, %179 : vector<8x384xf32>
    %181 = vector.extract_strided_slice %176 {offsets = [0, 0], sizes = [8, 128], strides = [1, 1]} : vector<8x384xf32> to vector<8x128xf32>
    %182 = vector.extract_strided_slice %180 {offsets = [0, 0], sizes = [8, 128], strides = [1, 1]} : vector<8x384xf32> to vector<8x128xf32>
    %183 = arith.addf %181, %182 : vector<8x128xf32>
    %184 = arith.negf %183 : vector<8x128xf32>
    %185 = math.exp %184 : vector<8x128xf32>
    %cst_44 = arith.constant 1.000000e+00 : f32
    %186 = vector.broadcast %cst_44 : f32 to vector<8x128xf32>
    %187 = arith.addf %186, %185 : vector<8x128xf32>
    %188 = arith.divf %186, %187 : vector<8x128xf32>
    %189 = vector.extract_strided_slice %176 {offsets = [0, 128], sizes = [8, 128], strides = [1, 1]} : vector<8x384xf32> to vector<8x128xf32>
    %190 = vector.extract_strided_slice %180 {offsets = [0, 128], sizes = [8, 128], strides = [1, 1]} : vector<8x384xf32> to vector<8x128xf32>
    %191 = arith.addf %189, %190 : vector<8x128xf32>
    %192 = arith.negf %191 : vector<8x128xf32>
    %193 = math.exp %192 : vector<8x128xf32>
    %cst_45 = arith.constant 1.000000e+00 : f32
    %194 = vector.broadcast %cst_45 : f32 to vector<8x128xf32>
    %195 = arith.addf %194, %193 : vector<8x128xf32>
    %196 = arith.divf %194, %195 : vector<8x128xf32>
    %197 = vector.extract_strided_slice %176 {offsets = [0, 256], sizes = [8, 128], strides = [1, 1]} : vector<8x384xf32> to vector<8x128xf32>
    %198 = vector.extract_strided_slice %180 {offsets = [0, 256], sizes = [8, 128], strides = [1, 1]} : vector<8x384xf32> to vector<8x128xf32>
    %199 = arith.mulf %188, %198 : vector<8x128xf32>
    %200 = arith.addf %197, %199 : vector<8x128xf32>
    %201 = math.tanh %200 : vector<8x128xf32>
    %cst_46 = arith.constant 1.000000e+00 : f32
    %202 = vector.broadcast %cst_46 : f32 to vector<8x128xf32>
    %203 = arith.subf %202, %196 : vector<8x128xf32>
    %204 = arith.mulf %203, %201 : vector<8x128xf32>
    %205 = arith.mulf %196, %165 : vector<8x128xf32>
    %206 = arith.addf %204, %205 : vector<8x128xf32>
    %207 = vector.extract_strided_slice %206 {offsets = [0, 32], sizes = [8, 32], strides = [1, 1]} : vector<8x128xf32> to vector<8x32xf32>
    %cst_47 = arith.constant -5.000000e+00 : f32
    %cst_48 = arith.constant 5.000000e+00 : f32
    %208 = vector.broadcast %cst_47 : f32 to vector<8x32xf32>
    %209 = arith.maximumf %208, %207 : vector<8x32xf32>
    %210 = vector.broadcast %cst_48 : f32 to vector<8x32xf32>
    %211 = arith.minimumf %210, %209 : vector<8x32xf32>
    %212 = vector.extract_strided_slice %206 {offsets = [0, 96], sizes = [8, 32], strides = [1, 1]} : vector<8x128xf32> to vector<8x32xf32>
    %cst_49 = arith.constant -5.000000e+00 : f32
    %cst_50 = arith.constant 5.000000e+00 : f32
    %213 = vector.broadcast %cst_49 : f32 to vector<8x32xf32>
    %214 = arith.maximumf %213, %212 : vector<8x32xf32>
    %215 = vector.broadcast %cst_50 : f32 to vector<8x32xf32>
    %216 = arith.minimumf %215, %214 : vector<8x32xf32>
    %217 = vector.extract_strided_slice %6 {offsets = [40, 0], sizes = [8, 384], strides = [1, 1]} : vector<64x384xf32> to vector<8x384xf32>
    %218 = arith.truncf %206 : vector<8x128xf32> to vector<8x128xbf16>
    %cst_51 = arith.constant dense<0.000000e+00> : vector<8x384xf32>
    %219 = tpu.matmul %218, %7, %cst_51 {dimension_numbers = #tpu.dot_dimension_numbers<[1], [0], [0], [1], [0, 0, 1, 1], [], []>} : vector<8x128xbf16>, vector<128x384xbf16>, vector<8x384xf32> -> vector<8x384xf32>
    %220 = vector.broadcast %8 : vector<1x384xf32> to vector<8x384xf32>
    %221 = arith.addf %219, %220 : vector<8x384xf32>
    %222 = vector.extract_strided_slice %217 {offsets = [0, 0], sizes = [8, 128], strides = [1, 1]} : vector<8x384xf32> to vector<8x128xf32>
    %223 = vector.extract_strided_slice %221 {offsets = [0, 0], sizes = [8, 128], strides = [1, 1]} : vector<8x384xf32> to vector<8x128xf32>
    %224 = arith.addf %222, %223 : vector<8x128xf32>
    %225 = arith.negf %224 : vector<8x128xf32>
    %226 = math.exp %225 : vector<8x128xf32>
    %cst_52 = arith.constant 1.000000e+00 : f32
    %227 = vector.broadcast %cst_52 : f32 to vector<8x128xf32>
    %228 = arith.addf %227, %226 : vector<8x128xf32>
    %229 = arith.divf %227, %228 : vector<8x128xf32>
    %230 = vector.extract_strided_slice %217 {offsets = [0, 128], sizes = [8, 128], strides = [1, 1]} : vector<8x384xf32> to vector<8x128xf32>
    %231 = vector.extract_strided_slice %221 {offsets = [0, 128], sizes = [8, 128], strides = [1, 1]} : vector<8x384xf32> to vector<8x128xf32>
    %232 = arith.addf %230, %231 : vector<8x128xf32>
    %233 = arith.negf %232 : vector<8x128xf32>
    %234 = math.exp %233 : vector<8x128xf32>
    %cst_53 = arith.constant 1.000000e+00 : f32
    %235 = vector.broadcast %cst_53 : f32 to vector<8x128xf32>
    %236 = arith.addf %235, %234 : vector<8x128xf32>
    %237 = arith.divf %235, %236 : vector<8x128xf32>
    %238 = vector.extract_strided_slice %217 {offsets = [0, 256], sizes = [8, 128], strides = [1, 1]} : vector<8x384xf32> to vector<8x128xf32>
    %239 = vector.extract_strided_slice %221 {offsets = [0, 256], sizes = [8, 128], strides = [1, 1]} : vector<8x384xf32> to vector<8x128xf32>
    %240 = arith.mulf %229, %239 : vector<8x128xf32>
    %241 = arith.addf %238, %240 : vector<8x128xf32>
    %242 = math.tanh %241 : vector<8x128xf32>
    %cst_54 = arith.constant 1.000000e+00 : f32
    %243 = vector.broadcast %cst_54 : f32 to vector<8x128xf32>
    %244 = arith.subf %243, %237 : vector<8x128xf32>
    %245 = arith.mulf %244, %242 : vector<8x128xf32>
    %246 = arith.mulf %237, %206 : vector<8x128xf32>
    %247 = arith.addf %245, %246 : vector<8x128xf32>
    %248 = vector.extract_strided_slice %247 {offsets = [0, 32], sizes = [8, 32], strides = [1, 1]} : vector<8x128xf32> to vector<8x32xf32>
    %cst_55 = arith.constant -5.000000e+00 : f32
    %cst_56 = arith.constant 5.000000e+00 : f32
    %249 = vector.broadcast %cst_55 : f32 to vector<8x32xf32>
    %250 = arith.maximumf %249, %248 : vector<8x32xf32>
    %251 = vector.broadcast %cst_56 : f32 to vector<8x32xf32>
    %252 = arith.minimumf %251, %250 : vector<8x32xf32>
    %253 = vector.extract_strided_slice %247 {offsets = [0, 96], sizes = [8, 32], strides = [1, 1]} : vector<8x128xf32> to vector<8x32xf32>
    %cst_57 = arith.constant -5.000000e+00 : f32
    %cst_58 = arith.constant 5.000000e+00 : f32
    %254 = vector.broadcast %cst_57 : f32 to vector<8x32xf32>
    %255 = arith.maximumf %254, %253 : vector<8x32xf32>
    %256 = vector.broadcast %cst_58 : f32 to vector<8x32xf32>
    %257 = arith.minimumf %256, %255 : vector<8x32xf32>
    %258 = vector.extract_strided_slice %6 {offsets = [48, 0], sizes = [8, 384], strides = [1, 1]} : vector<64x384xf32> to vector<8x384xf32>
    %259 = arith.truncf %247 : vector<8x128xf32> to vector<8x128xbf16>
    %cst_59 = arith.constant dense<0.000000e+00> : vector<8x384xf32>
    %260 = tpu.matmul %259, %7, %cst_59 {dimension_numbers = #tpu.dot_dimension_numbers<[1], [0], [0], [1], [0, 0, 1, 1], [], []>} : vector<8x128xbf16>, vector<128x384xbf16>, vector<8x384xf32> -> vector<8x384xf32>
    %261 = vector.broadcast %8 : vector<1x384xf32> to vector<8x384xf32>
    %262 = arith.addf %260, %261 : vector<8x384xf32>
    %263 = vector.extract_strided_slice %258 {offsets = [0, 0], sizes = [8, 128], strides = [1, 1]} : vector<8x384xf32> to vector<8x128xf32>
    %264 = vector.extract_strided_slice %262 {offsets = [0, 0], sizes = [8, 128], strides = [1, 1]} : vector<8x384xf32> to vector<8x128xf32>
    %265 = arith.addf %263, %264 : vector<8x128xf32>
    %266 = arith.negf %265 : vector<8x128xf32>
    %267 = math.exp %266 : vector<8x128xf32>
    %cst_60 = arith.constant 1.000000e+00 : f32
    %268 = vector.broadcast %cst_60 : f32 to vector<8x128xf32>
    %269 = arith.addf %268, %267 : vector<8x128xf32>
    %270 = arith.divf %268, %269 : vector<8x128xf32>
    %271 = vector.extract_strided_slice %258 {offsets = [0, 128], sizes = [8, 128], strides = [1, 1]} : vector<8x384xf32> to vector<8x128xf32>
    %272 = vector.extract_strided_slice %262 {offsets = [0, 128], sizes = [8, 128], strides = [1, 1]} : vector<8x384xf32> to vector<8x128xf32>
    %273 = arith.addf %271, %272 : vector<8x128xf32>
    %274 = arith.negf %273 : vector<8x128xf32>
    %275 = math.exp %274 : vector<8x128xf32>
    %cst_61 = arith.constant 1.000000e+00 : f32
    %276 = vector.broadcast %cst_61 : f32 to vector<8x128xf32>
    %277 = arith.addf %276, %275 : vector<8x128xf32>
    %278 = arith.divf %276, %277 : vector<8x128xf32>
    %279 = vector.extract_strided_slice %258 {offsets = [0, 256], sizes = [8, 128], strides = [1, 1]} : vector<8x384xf32> to vector<8x128xf32>
    %280 = vector.extract_strided_slice %262 {offsets = [0, 256], sizes = [8, 128], strides = [1, 1]} : vector<8x384xf32> to vector<8x128xf32>
    %281 = arith.mulf %270, %280 : vector<8x128xf32>
    %282 = arith.addf %279, %281 : vector<8x128xf32>
    %283 = math.tanh %282 : vector<8x128xf32>
    %cst_62 = arith.constant 1.000000e+00 : f32
    %284 = vector.broadcast %cst_62 : f32 to vector<8x128xf32>
    %285 = arith.subf %284, %278 : vector<8x128xf32>
    %286 = arith.mulf %285, %283 : vector<8x128xf32>
    %287 = arith.mulf %278, %247 : vector<8x128xf32>
    %288 = arith.addf %286, %287 : vector<8x128xf32>
    %289 = vector.extract_strided_slice %288 {offsets = [0, 32], sizes = [8, 32], strides = [1, 1]} : vector<8x128xf32> to vector<8x32xf32>
    %cst_63 = arith.constant -5.000000e+00 : f32
    %cst_64 = arith.constant 5.000000e+00 : f32
    %290 = vector.broadcast %cst_63 : f32 to vector<8x32xf32>
    %291 = arith.maximumf %290, %289 : vector<8x32xf32>
    %292 = vector.broadcast %cst_64 : f32 to vector<8x32xf32>
    %293 = arith.minimumf %292, %291 : vector<8x32xf32>
    %294 = vector.extract_strided_slice %288 {offsets = [0, 96], sizes = [8, 32], strides = [1, 1]} : vector<8x128xf32> to vector<8x32xf32>
    %cst_65 = arith.constant -5.000000e+00 : f32
    %cst_66 = arith.constant 5.000000e+00 : f32
    %295 = vector.broadcast %cst_65 : f32 to vector<8x32xf32>
    %296 = arith.maximumf %295, %294 : vector<8x32xf32>
    %297 = vector.broadcast %cst_66 : f32 to vector<8x32xf32>
    %298 = arith.minimumf %297, %296 : vector<8x32xf32>
    %299 = vector.extract_strided_slice %6 {offsets = [56, 0], sizes = [8, 384], strides = [1, 1]} : vector<64x384xf32> to vector<8x384xf32>
    %300 = arith.truncf %288 : vector<8x128xf32> to vector<8x128xbf16>
    %cst_67 = arith.constant dense<0.000000e+00> : vector<8x384xf32>
    %301 = tpu.matmul %300, %7, %cst_67 {dimension_numbers = #tpu.dot_dimension_numbers<[1], [0], [0], [1], [0, 0, 1, 1], [], []>} : vector<8x128xbf16>, vector<128x384xbf16>, vector<8x384xf32> -> vector<8x384xf32>
    %302 = vector.broadcast %8 : vector<1x384xf32> to vector<8x384xf32>
    %303 = arith.addf %301, %302 : vector<8x384xf32>
    %304 = vector.extract_strided_slice %299 {offsets = [0, 0], sizes = [8, 128], strides = [1, 1]} : vector<8x384xf32> to vector<8x128xf32>
    %305 = vector.extract_strided_slice %303 {offsets = [0, 0], sizes = [8, 128], strides = [1, 1]} : vector<8x384xf32> to vector<8x128xf32>
    %306 = arith.addf %304, %305 : vector<8x128xf32>
    %307 = arith.negf %306 : vector<8x128xf32>
    %308 = math.exp %307 : vector<8x128xf32>
    %cst_68 = arith.constant 1.000000e+00 : f32
    %309 = vector.broadcast %cst_68 : f32 to vector<8x128xf32>
    %310 = arith.addf %309, %308 : vector<8x128xf32>
    %311 = arith.divf %309, %310 : vector<8x128xf32>
    %312 = vector.extract_strided_slice %299 {offsets = [0, 128], sizes = [8, 128], strides = [1, 1]} : vector<8x384xf32> to vector<8x128xf32>
    %313 = vector.extract_strided_slice %303 {offsets = [0, 128], sizes = [8, 128], strides = [1, 1]} : vector<8x384xf32> to vector<8x128xf32>
    %314 = arith.addf %312, %313 : vector<8x128xf32>
    %315 = arith.negf %314 : vector<8x128xf32>
    %316 = math.exp %315 : vector<8x128xf32>
    %cst_69 = arith.constant 1.000000e+00 : f32
    %317 = vector.broadcast %cst_69 : f32 to vector<8x128xf32>
    %318 = arith.addf %317, %316 : vector<8x128xf32>
    %319 = arith.divf %317, %318 : vector<8x128xf32>
    %320 = vector.extract_strided_slice %299 {offsets = [0, 256], sizes = [8, 128], strides = [1, 1]} : vector<8x384xf32> to vector<8x128xf32>
    %321 = vector.extract_strided_slice %303 {offsets = [0, 256], sizes = [8, 128], strides = [1, 1]} : vector<8x384xf32> to vector<8x128xf32>
    %322 = arith.mulf %311, %321 : vector<8x128xf32>
    %323 = arith.addf %320, %322 : vector<8x128xf32>
    %324 = math.tanh %323 : vector<8x128xf32>
    %cst_70 = arith.constant 1.000000e+00 : f32
    %325 = vector.broadcast %cst_70 : f32 to vector<8x128xf32>
    %326 = arith.subf %325, %319 : vector<8x128xf32>
    %327 = arith.mulf %326, %324 : vector<8x128xf32>
    %328 = arith.mulf %319, %288 : vector<8x128xf32>
    %329 = arith.addf %327, %328 : vector<8x128xf32>
    %330 = vector.extract_strided_slice %329 {offsets = [0, 32], sizes = [8, 32], strides = [1, 1]} : vector<8x128xf32> to vector<8x32xf32>
    %cst_71 = arith.constant -5.000000e+00 : f32
    %cst_72 = arith.constant 5.000000e+00 : f32
    %331 = vector.broadcast %cst_71 : f32 to vector<8x32xf32>
    %332 = arith.maximumf %331, %330 : vector<8x32xf32>
    %333 = vector.broadcast %cst_72 : f32 to vector<8x32xf32>
    %334 = arith.minimumf %333, %332 : vector<8x32xf32>
    %335 = vector.extract_strided_slice %329 {offsets = [0, 96], sizes = [8, 32], strides = [1, 1]} : vector<8x128xf32> to vector<8x32xf32>
    %cst_73 = arith.constant -5.000000e+00 : f32
    %cst_74 = arith.constant 5.000000e+00 : f32
    %336 = vector.broadcast %cst_73 : f32 to vector<8x32xf32>
    %337 = arith.maximumf %336, %335 : vector<8x32xf32>
    %338 = vector.broadcast %cst_74 : f32 to vector<8x32xf32>
    %339 = arith.minimumf %338, %337 : vector<8x32xf32>
    %340 = vector.extract_strided_slice %329 {offsets = [0, 0], sizes = [8, 32], strides = [1, 1]} : vector<8x128xf32> to vector<8x32xf32>
    %341 = vector.extract_strided_slice %329 {offsets = [0, 64], sizes = [8, 32], strides = [1, 1]} : vector<8x128xf32> to vector<8x32xf32>
    %342 = tpu.concatenate %340, %341 in 1 : vector<8x32xf32>, vector<8x32xf32> -> vector<8x64xf32>
    %cst_75 = arith.constant -5.000000e+00 : f32
    %cst_76 = arith.constant 5.000000e+00 : f32
    %343 = vector.broadcast %cst_75 : f32 to vector<8x64xf32>
    %344 = arith.maximumf %343, %342 : vector<8x64xf32>
    %345 = vector.broadcast %cst_76 : f32 to vector<8x64xf32>
    %346 = arith.minimumf %345, %344 : vector<8x64xf32>
    %c0_77 = arith.constant 0 : index
    %c0_78 = arith.constant 0 : index
    %347 = vector.load %arg9[%c0_77, %c0_78] : memref<64x64xbf16, #tpu.memory_space<vmem>>, vector<64x64xbf16>
    %348 = arith.truncf %346 : vector<8x64xf32> to vector<8x64xbf16>
    %cst_79 = arith.constant dense<0.000000e+00> : vector<8x64xf32>
    %349 = tpu.matmul %348, %347, %cst_79 {dimension_numbers = #tpu.dot_dimension_numbers<[1], [0], [0], [1], [0, 0, 1, 1], [], []>} : vector<8x64xbf16>, vector<64x64xbf16>, vector<8x64xf32> -> vector<8x64xf32>
    %c0_80 = arith.constant 0 : index
    %c0_81 = arith.constant 0 : index
    %350 = vector.load %arg10[%c0_80, %c0_81] : memref<1x64xf32, #tpu.memory_space<vmem>>, vector<1x64xf32>
    %351 = vector.broadcast %350 : vector<1x64xf32> to vector<8x64xf32>
    %352 = arith.addf %349, %351 : vector<8x64xf32>
    %353 = vector.extract_strided_slice %352 {offsets = [0, 32], sizes = [8, 32], strides = [1, 1]} : vector<8x64xf32> to vector<8x32xf32>
    %cst_82 = arith.constant 5.000000e-01 : f32
    %354 = vector.broadcast %cst_82 : f32 to vector<8x32xf32>
    %355 = arith.mulf %354, %353 : vector<8x32xf32>
    %356 = math.exp %355 : vector<8x32xf32>
    %c0_83 = arith.constant 0 : index
    %c0_84 = arith.constant 0 : index
    %357 = vector.load %arg1[%c0_83, %c0_84] : memref<8x32xf32, #tpu.memory_space<vmem>>, vector<8x32xf32>
    %358 = arith.mulf %356, %357 : vector<8x32xf32>
    %359 = vector.extract_strided_slice %352 {offsets = [0, 0], sizes = [8, 32], strides = [1, 1]} : vector<8x64xf32> to vector<8x32xf32>
    %360 = arith.addf %358, %359 : vector<8x32xf32>
    %361 = tpu.concatenate %47, %339 in 1 : vector<8x32xf32>, vector<8x32xf32> -> vector<8x64xf32>
    %362 = tpu.concatenate %88, %298 in 1 : vector<8x32xf32>, vector<8x32xf32> -> vector<8x64xf32>
    %363 = tpu.concatenate %129, %257 in 1 : vector<8x32xf32>, vector<8x32xf32> -> vector<8x64xf32>
    %364 = tpu.concatenate %170, %216 in 1 : vector<8x32xf32>, vector<8x32xf32> -> vector<8x64xf32>
    %365 = tpu.concatenate %211, %175 in 1 : vector<8x32xf32>, vector<8x32xf32> -> vector<8x64xf32>
    %366 = tpu.concatenate %252, %134 in 1 : vector<8x32xf32>, vector<8x32xf32> -> vector<8x64xf32>
    %367 = tpu.concatenate %293, %93 in 1 : vector<8x32xf32>, vector<8x32xf32> -> vector<8x64xf32>
    %368 = tpu.concatenate %334, %52 in 1 : vector<8x32xf32>, vector<8x32xf32> -> vector<8x64xf32>
    %369 = tpu.concatenate %361, %362, %363, %364, %365, %366, %367, %368 in 0 : vector<8x64xf32>, vector<8x64xf32>, vector<8x64xf32>, vector<8x64xf32>, vector<8x64xf32>, vector<8x64xf32>, vector<8x64xf32>, vector<8x64xf32> -> vector<64x64xf32>
    %c0_85 = arith.constant 0 : index
    %c0_86 = arith.constant 0 : index
    %370 = vector.load %arg11[%c0_85, %c0_86] : memref<64x96xbf16, #tpu.memory_space<vmem>>, vector<64x96xbf16>
    %371 = arith.truncf %369 : vector<64x64xf32> to vector<64x64xbf16>
    %cst_87 = arith.constant dense<0.000000e+00> : vector<64x96xf32>
    %372 = tpu.matmul %371, %370, %cst_87 {dimension_numbers = #tpu.dot_dimension_numbers<[1], [0], [0], [1], [0, 0, 1, 1], [], []>} : vector<64x64xbf16>, vector<64x96xbf16>, vector<64x96xf32> -> vector<64x96xf32>
    %c0_88 = arith.constant 0 : index
    %c0_89 = arith.constant 0 : index
    %373 = vector.load %arg12[%c0_88, %c0_89] : memref<32x64xbf16, #tpu.memory_space<vmem>>, vector<32x64xbf16>
    %c0_90 = arith.constant 0 : index
    %c0_91 = arith.constant 0 : index
    %374 = vector.load %arg13[%c0_90, %c0_91] : memref<1x64xf32, #tpu.memory_space<vmem>>, vector<1x64xf32>
    %c0_92 = arith.constant 0 : index
    %c0_93 = arith.constant 0 : index
    %375 = vector.load %arg14[%c0_92, %c0_93] : memref<32x32xbf16, #tpu.memory_space<vmem>>, vector<32x32xbf16>
    %c0_94 = arith.constant 0 : index
    %c0_95 = arith.constant 0 : index
    %376 = vector.load %arg15[%c0_94, %c0_95] : memref<1x32xf32, #tpu.memory_space<vmem>>, vector<1x32xf32>
    %c0_96 = arith.constant 0 : index
    %c0_97 = arith.constant 0 : index
    %377 = vector.load %arg16[%c0_96, %c0_97] : memref<32x8xbf16, #tpu.memory_space<vmem>>, vector<32x8xbf16>
    %c0_98 = arith.constant 0 : index
    %c0_99 = arith.constant 0 : index
    %378 = vector.load %arg17[%c0_98, %c0_99] : memref<1x8xf32, #tpu.memory_space<vmem>>, vector<1x8xf32>
    %c0_100 = arith.constant 0 : index
    %c0_101 = arith.constant 0 : index
    %379 = vector.load %arg18[%c0_100, %c0_101] : memref<4x96xbf16, #tpu.memory_space<vmem>>, vector<4x96xbf16>
    %c0_102 = arith.constant 0 : index
    %c0_103 = arith.constant 0 : index
    %380 = vector.load %arg19[%c0_102, %c0_103] : memref<32x64xbf16, #tpu.memory_space<vmem>>, vector<32x64xbf16>
    %c0_104 = arith.constant 0 : index
    %c0_105 = arith.constant 0 : index
    %381 = vector.load %arg20[%c0_104, %c0_105] : memref<1x64xf32, #tpu.memory_space<vmem>>, vector<1x64xf32>
    %c0_106 = arith.constant 0 : index
    %c0_107 = arith.constant 0 : index
    %382 = vector.load %arg21[%c0_106, %c0_107] : memref<32x32xbf16, #tpu.memory_space<vmem>>, vector<32x32xbf16>
    %c0_108 = arith.constant 0 : index
    %c0_109 = arith.constant 0 : index
    %383 = vector.load %arg22[%c0_108, %c0_109] : memref<1x32xf32, #tpu.memory_space<vmem>>, vector<1x32xf32>
    %c0_110 = arith.constant 0 : index
    %c0_111 = arith.constant 0 : index
    %384 = vector.load %arg23[%c0_110, %c0_111] : memref<32x104xbf16, #tpu.memory_space<vmem>>, vector<32x104xbf16>
    %c0_112 = arith.constant 0 : index
    %c0_113 = arith.constant 0 : index
    %385 = vector.load %arg2[%c0_112, %c0_113] : memref<64x4xf32, #tpu.memory_space<vmem>>, vector<64x4xf32>
    %386 = arith.truncf %360 : vector<8x32xf32> to vector<8x32xbf16>
    %cst_114 = arith.constant dense<0.000000e+00> : vector<8x104xf32>
    %387 = tpu.matmul %386, %384, %cst_114 {dimension_numbers = #tpu.dot_dimension_numbers<[1], [0], [0], [1], [0, 0, 1, 1], [], []>} : vector<8x32xbf16>, vector<32x104xbf16>, vector<8x104xf32> -> vector<8x104xf32>
    %c0_115 = arith.constant 0 : index
    %c0_116 = arith.constant 0 : index
    %388 = vector.load %arg8[%c0_115, %c0_116] : memref<1x32xf32, #tpu.memory_space<vmem>>, vector<1x32xf32>
    %389 = vector.shape_cast %388 : vector<1x32xf32> to vector<1x32xf32>
    %390 = vector.broadcast %389 : vector<1x32xf32> to vector<8x32xf32>
    %391 = vector.extract_strided_slice %372 {offsets = [0, 0], sizes = [8, 96], strides = [1, 1]} : vector<64x96xf32> to vector<8x96xf32>
    %392 = vector.extract_strided_slice %387 {offsets = [0, 8], sizes = [8, 96], strides = [1, 1]} : vector<8x104xf32> to vector<8x96xf32>
    %393 = arith.addf %391, %392 : vector<8x96xf32>
    %394 = vector.extract_strided_slice %393 {offsets = [0, 0], sizes = [8, 64], strides = [1, 1]} : vector<8x96xf32> to vector<8x64xf32>
    %395 = arith.truncf %390 : vector<8x32xf32> to vector<8x32xbf16>
    %cst_117 = arith.constant dense<0.000000e+00> : vector<8x64xf32>
    %396 = tpu.matmul %395, %373, %cst_117 {dimension_numbers = #tpu.dot_dimension_numbers<[1], [0], [0], [1], [0, 0, 1, 1], [], []>} : vector<8x32xbf16>, vector<32x64xbf16>, vector<8x64xf32> -> vector<8x64xf32>
    %397 = arith.addf %394, %396 : vector<8x64xf32>
    %398 = vector.broadcast %374 : vector<1x64xf32> to vector<8x64xf32>
    %399 = arith.addf %397, %398 : vector<8x64xf32>
    %400 = arith.negf %399 : vector<8x64xf32>
    %401 = math.exp %400 : vector<8x64xf32>
    %cst_118 = arith.constant 1.000000e+00 : f32
    %402 = vector.broadcast %cst_118 : f32 to vector<8x64xf32>
    %403 = arith.addf %402, %401 : vector<8x64xf32>
    %404 = arith.divf %402, %403 : vector<8x64xf32>
    %405 = vector.extract_strided_slice %404 {offsets = [0, 0], sizes = [8, 32], strides = [1, 1]} : vector<8x64xf32> to vector<8x32xf32>
    %406 = vector.extract_strided_slice %404 {offsets = [0, 32], sizes = [8, 32], strides = [1, 1]} : vector<8x64xf32> to vector<8x32xf32>
    %407 = vector.extract_strided_slice %393 {offsets = [0, 64], sizes = [8, 32], strides = [1, 1]} : vector<8x96xf32> to vector<8x32xf32>
    %408 = arith.mulf %405, %390 : vector<8x32xf32>
    %409 = arith.truncf %408 : vector<8x32xf32> to vector<8x32xbf16>
    %cst_119 = arith.constant dense<0.000000e+00> : vector<8x32xf32>
    %410 = tpu.matmul %409, %375, %cst_119 {dimension_numbers = #tpu.dot_dimension_numbers<[1], [0], [0], [1], [0, 0, 1, 1], [], []>} : vector<8x32xbf16>, vector<32x32xbf16>, vector<8x32xf32> -> vector<8x32xf32>
    %411 = arith.addf %407, %410 : vector<8x32xf32>
    %412 = vector.broadcast %376 : vector<1x32xf32> to vector<8x32xf32>
    %413 = arith.addf %411, %412 : vector<8x32xf32>
    %414 = math.tanh %413 : vector<8x32xf32>
    %415 = arith.mulf %406, %390 : vector<8x32xf32>
    %cst_120 = arith.constant 1.000000e+00 : f32
    %416 = vector.broadcast %cst_120 : f32 to vector<8x32xf32>
    %417 = arith.subf %416, %406 : vector<8x32xf32>
    %418 = arith.mulf %417, %414 : vector<8x32xf32>
    %419 = arith.addf %415, %418 : vector<8x32xf32>
    %cst_121 = arith.constant -5.000000e+00 : f32
    %cst_122 = arith.constant 5.000000e+00 : f32
    %420 = vector.broadcast %cst_121 : f32 to vector<8x32xf32>
    %421 = arith.maximumf %420, %419 : vector<8x32xf32>
    %422 = vector.broadcast %cst_122 : f32 to vector<8x32xf32>
    %423 = arith.minimumf %422, %421 : vector<8x32xf32>
    %424 = arith.truncf %423 : vector<8x32xf32> to vector<8x32xbf16>
    %cst_123 = arith.constant dense<0.000000e+00> : vector<8x8xf32>
    %425 = tpu.matmul %424, %377, %cst_123 {dimension_numbers = #tpu.dot_dimension_numbers<[1], [0], [0], [1], [0, 0, 1, 1], [], []>} : vector<8x32xbf16>, vector<32x8xbf16>, vector<8x8xf32> -> vector<8x8xf32>
    %426 = vector.broadcast %378 : vector<1x8xf32> to vector<8x8xf32>
    %427 = arith.addf %425, %426 : vector<8x8xf32>
    %428 = vector.extract_strided_slice %427 {offsets = [0, 4], sizes = [8, 4], strides = [1, 1]} : vector<8x8xf32> to vector<8x4xf32>
    %cst_124 = arith.constant 5.000000e-01 : f32
    %429 = vector.broadcast %cst_124 : f32 to vector<8x4xf32>
    %430 = arith.mulf %429, %428 : vector<8x4xf32>
    %431 = math.exp %430 : vector<8x4xf32>
    %432 = vector.extract_strided_slice %385 {offsets = [0, 0], sizes = [8, 4], strides = [1, 1]} : vector<64x4xf32> to vector<8x4xf32>
    %433 = arith.mulf %431, %432 : vector<8x4xf32>
    %434 = vector.extract_strided_slice %427 {offsets = [0, 0], sizes = [8, 4], strides = [1, 1]} : vector<8x8xf32> to vector<8x4xf32>
    %435 = arith.addf %433, %434 : vector<8x4xf32>
    %436 = arith.truncf %435 : vector<8x4xf32> to vector<8x4xbf16>
    %cst_125 = arith.constant dense<0.000000e+00> : vector<8x96xf32>
    %437 = tpu.matmul %436, %379, %cst_125 {dimension_numbers = #tpu.dot_dimension_numbers<[1], [0], [0], [1], [0, 0, 1, 1], [], []>} : vector<8x4xbf16>, vector<4x96xbf16>, vector<8x96xf32> -> vector<8x96xf32>
    %438 = vector.extract_strided_slice %437 {offsets = [0, 0], sizes = [8, 64], strides = [1, 1]} : vector<8x96xf32> to vector<8x64xf32>
    %439 = arith.truncf %360 : vector<8x32xf32> to vector<8x32xbf16>
    %cst_126 = arith.constant dense<0.000000e+00> : vector<8x64xf32>
    %440 = tpu.matmul %439, %380, %cst_126 {dimension_numbers = #tpu.dot_dimension_numbers<[1], [0], [0], [1], [0, 0, 1, 1], [], []>} : vector<8x32xbf16>, vector<32x64xbf16>, vector<8x64xf32> -> vector<8x64xf32>
    %441 = arith.addf %438, %440 : vector<8x64xf32>
    %442 = vector.broadcast %381 : vector<1x64xf32> to vector<8x64xf32>
    %443 = arith.addf %441, %442 : vector<8x64xf32>
    %444 = arith.negf %443 : vector<8x64xf32>
    %445 = math.exp %444 : vector<8x64xf32>
    %cst_127 = arith.constant 1.000000e+00 : f32
    %446 = vector.broadcast %cst_127 : f32 to vector<8x64xf32>
    %447 = arith.addf %446, %445 : vector<8x64xf32>
    %448 = arith.divf %446, %447 : vector<8x64xf32>
    %449 = vector.extract_strided_slice %448 {offsets = [0, 0], sizes = [8, 32], strides = [1, 1]} : vector<8x64xf32> to vector<8x32xf32>
    %450 = vector.extract_strided_slice %448 {offsets = [0, 32], sizes = [8, 32], strides = [1, 1]} : vector<8x64xf32> to vector<8x32xf32>
    %451 = vector.extract_strided_slice %437 {offsets = [0, 64], sizes = [8, 32], strides = [1, 1]} : vector<8x96xf32> to vector<8x32xf32>
    %452 = arith.mulf %449, %360 : vector<8x32xf32>
    %453 = arith.truncf %452 : vector<8x32xf32> to vector<8x32xbf16>
    %cst_128 = arith.constant dense<0.000000e+00> : vector<8x32xf32>
    %454 = tpu.matmul %453, %382, %cst_128 {dimension_numbers = #tpu.dot_dimension_numbers<[1], [0], [0], [1], [0, 0, 1, 1], [], []>} : vector<8x32xbf16>, vector<32x32xbf16>, vector<8x32xf32> -> vector<8x32xf32>
    %455 = arith.addf %451, %454 : vector<8x32xf32>
    %456 = vector.broadcast %383 : vector<1x32xf32> to vector<8x32xf32>
    %457 = arith.addf %455, %456 : vector<8x32xf32>
    %458 = math.tanh %457 : vector<8x32xf32>
    %459 = arith.mulf %450, %360 : vector<8x32xf32>
    %cst_129 = arith.constant 1.000000e+00 : f32
    %460 = vector.broadcast %cst_129 : f32 to vector<8x32xf32>
    %461 = arith.subf %460, %450 : vector<8x32xf32>
    %462 = arith.mulf %461, %458 : vector<8x32xf32>
    %463 = arith.addf %459, %462 : vector<8x32xf32>
    %cst_130 = arith.constant -5.000000e+00 : f32
    %cst_131 = arith.constant 5.000000e+00 : f32
    %464 = vector.broadcast %cst_130 : f32 to vector<8x32xf32>
    %465 = arith.maximumf %464, %463 : vector<8x32xf32>
    %466 = vector.broadcast %cst_131 : f32 to vector<8x32xf32>
    %467 = arith.minimumf %466, %465 : vector<8x32xf32>
    %468 = arith.truncf %467 : vector<8x32xf32> to vector<8x32xbf16>
    %cst_132 = arith.constant dense<0.000000e+00> : vector<8x104xf32>
    %469 = tpu.matmul %468, %384, %cst_132 {dimension_numbers = #tpu.dot_dimension_numbers<[1], [0], [0], [1], [0, 0, 1, 1], [], []>} : vector<8x32xbf16>, vector<32x104xbf16>, vector<8x104xf32> -> vector<8x104xf32>
    %470 = vector.extract_strided_slice %469 {offsets = [0, 0], sizes = [8, 8], strides = [1, 1]} : vector<8x104xf32> to vector<8x8xf32>
    %471 = vector.extract_strided_slice %372 {offsets = [8, 0], sizes = [8, 96], strides = [1, 1]} : vector<64x96xf32> to vector<8x96xf32>
    %472 = vector.extract_strided_slice %469 {offsets = [0, 8], sizes = [8, 96], strides = [1, 1]} : vector<8x104xf32> to vector<8x96xf32>
    %473 = arith.addf %471, %472 : vector<8x96xf32>
    %474 = vector.extract_strided_slice %473 {offsets = [0, 0], sizes = [8, 64], strides = [1, 1]} : vector<8x96xf32> to vector<8x64xf32>
    %475 = arith.truncf %423 : vector<8x32xf32> to vector<8x32xbf16>
    %cst_133 = arith.constant dense<0.000000e+00> : vector<8x64xf32>
    %476 = tpu.matmul %475, %373, %cst_133 {dimension_numbers = #tpu.dot_dimension_numbers<[1], [0], [0], [1], [0, 0, 1, 1], [], []>} : vector<8x32xbf16>, vector<32x64xbf16>, vector<8x64xf32> -> vector<8x64xf32>
    %477 = arith.addf %474, %476 : vector<8x64xf32>
    %478 = vector.broadcast %374 : vector<1x64xf32> to vector<8x64xf32>
    %479 = arith.addf %477, %478 : vector<8x64xf32>
    %480 = arith.negf %479 : vector<8x64xf32>
    %481 = math.exp %480 : vector<8x64xf32>
    %cst_134 = arith.constant 1.000000e+00 : f32
    %482 = vector.broadcast %cst_134 : f32 to vector<8x64xf32>
    %483 = arith.addf %482, %481 : vector<8x64xf32>
    %484 = arith.divf %482, %483 : vector<8x64xf32>
    %485 = vector.extract_strided_slice %484 {offsets = [0, 0], sizes = [8, 32], strides = [1, 1]} : vector<8x64xf32> to vector<8x32xf32>
    %486 = vector.extract_strided_slice %484 {offsets = [0, 32], sizes = [8, 32], strides = [1, 1]} : vector<8x64xf32> to vector<8x32xf32>
    %487 = vector.extract_strided_slice %473 {offsets = [0, 64], sizes = [8, 32], strides = [1, 1]} : vector<8x96xf32> to vector<8x32xf32>
    %488 = arith.mulf %485, %423 : vector<8x32xf32>
    %489 = arith.truncf %488 : vector<8x32xf32> to vector<8x32xbf16>
    %cst_135 = arith.constant dense<0.000000e+00> : vector<8x32xf32>
    %490 = tpu.matmul %489, %375, %cst_135 {dimension_numbers = #tpu.dot_dimension_numbers<[1], [0], [0], [1], [0, 0, 1, 1], [], []>} : vector<8x32xbf16>, vector<32x32xbf16>, vector<8x32xf32> -> vector<8x32xf32>
    %491 = arith.addf %487, %490 : vector<8x32xf32>
    %492 = vector.broadcast %376 : vector<1x32xf32> to vector<8x32xf32>
    %493 = arith.addf %491, %492 : vector<8x32xf32>
    %494 = math.tanh %493 : vector<8x32xf32>
    %495 = arith.mulf %486, %423 : vector<8x32xf32>
    %cst_136 = arith.constant 1.000000e+00 : f32
    %496 = vector.broadcast %cst_136 : f32 to vector<8x32xf32>
    %497 = arith.subf %496, %486 : vector<8x32xf32>
    %498 = arith.mulf %497, %494 : vector<8x32xf32>
    %499 = arith.addf %495, %498 : vector<8x32xf32>
    %cst_137 = arith.constant -5.000000e+00 : f32
    %cst_138 = arith.constant 5.000000e+00 : f32
    %500 = vector.broadcast %cst_137 : f32 to vector<8x32xf32>
    %501 = arith.maximumf %500, %499 : vector<8x32xf32>
    %502 = vector.broadcast %cst_138 : f32 to vector<8x32xf32>
    %503 = arith.minimumf %502, %501 : vector<8x32xf32>
    %504 = arith.truncf %503 : vector<8x32xf32> to vector<8x32xbf16>
    %cst_139 = arith.constant dense<0.000000e+00> : vector<8x8xf32>
    %505 = tpu.matmul %504, %377, %cst_139 {dimension_numbers = #tpu.dot_dimension_numbers<[1], [0], [0], [1], [0, 0, 1, 1], [], []>} : vector<8x32xbf16>, vector<32x8xbf16>, vector<8x8xf32> -> vector<8x8xf32>
    %506 = vector.broadcast %378 : vector<1x8xf32> to vector<8x8xf32>
    %507 = arith.addf %505, %506 : vector<8x8xf32>
    %508 = vector.extract_strided_slice %507 {offsets = [0, 4], sizes = [8, 4], strides = [1, 1]} : vector<8x8xf32> to vector<8x4xf32>
    %cst_140 = arith.constant 5.000000e-01 : f32
    %509 = vector.broadcast %cst_140 : f32 to vector<8x4xf32>
    %510 = arith.mulf %509, %508 : vector<8x4xf32>
    %511 = math.exp %510 : vector<8x4xf32>
    %512 = vector.extract_strided_slice %385 {offsets = [8, 0], sizes = [8, 4], strides = [1, 1]} : vector<64x4xf32> to vector<8x4xf32>
    %513 = arith.mulf %511, %512 : vector<8x4xf32>
    %514 = vector.extract_strided_slice %507 {offsets = [0, 0], sizes = [8, 4], strides = [1, 1]} : vector<8x8xf32> to vector<8x4xf32>
    %515 = arith.addf %513, %514 : vector<8x4xf32>
    %516 = arith.truncf %515 : vector<8x4xf32> to vector<8x4xbf16>
    %cst_141 = arith.constant dense<0.000000e+00> : vector<8x96xf32>
    %517 = tpu.matmul %516, %379, %cst_141 {dimension_numbers = #tpu.dot_dimension_numbers<[1], [0], [0], [1], [0, 0, 1, 1], [], []>} : vector<8x4xbf16>, vector<4x96xbf16>, vector<8x96xf32> -> vector<8x96xf32>
    %518 = vector.extract_strided_slice %517 {offsets = [0, 0], sizes = [8, 64], strides = [1, 1]} : vector<8x96xf32> to vector<8x64xf32>
    %519 = arith.truncf %467 : vector<8x32xf32> to vector<8x32xbf16>
    %cst_142 = arith.constant dense<0.000000e+00> : vector<8x64xf32>
    %520 = tpu.matmul %519, %380, %cst_142 {dimension_numbers = #tpu.dot_dimension_numbers<[1], [0], [0], [1], [0, 0, 1, 1], [], []>} : vector<8x32xbf16>, vector<32x64xbf16>, vector<8x64xf32> -> vector<8x64xf32>
    %521 = arith.addf %518, %520 : vector<8x64xf32>
    %522 = vector.broadcast %381 : vector<1x64xf32> to vector<8x64xf32>
    %523 = arith.addf %521, %522 : vector<8x64xf32>
    %524 = arith.negf %523 : vector<8x64xf32>
    %525 = math.exp %524 : vector<8x64xf32>
    %cst_143 = arith.constant 1.000000e+00 : f32
    %526 = vector.broadcast %cst_143 : f32 to vector<8x64xf32>
    %527 = arith.addf %526, %525 : vector<8x64xf32>
    %528 = arith.divf %526, %527 : vector<8x64xf32>
    %529 = vector.extract_strided_slice %528 {offsets = [0, 0], sizes = [8, 32], strides = [1, 1]} : vector<8x64xf32> to vector<8x32xf32>
    %530 = vector.extract_strided_slice %528 {offsets = [0, 32], sizes = [8, 32], strides = [1, 1]} : vector<8x64xf32> to vector<8x32xf32>
    %531 = vector.extract_strided_slice %517 {offsets = [0, 64], sizes = [8, 32], strides = [1, 1]} : vector<8x96xf32> to vector<8x32xf32>
    %532 = arith.mulf %529, %467 : vector<8x32xf32>
    %533 = arith.truncf %532 : vector<8x32xf32> to vector<8x32xbf16>
    %cst_144 = arith.constant dense<0.000000e+00> : vector<8x32xf32>
    %534 = tpu.matmul %533, %382, %cst_144 {dimension_numbers = #tpu.dot_dimension_numbers<[1], [0], [0], [1], [0, 0, 1, 1], [], []>} : vector<8x32xbf16>, vector<32x32xbf16>, vector<8x32xf32> -> vector<8x32xf32>
    %535 = arith.addf %531, %534 : vector<8x32xf32>
    %536 = vector.broadcast %383 : vector<1x32xf32> to vector<8x32xf32>
    %537 = arith.addf %535, %536 : vector<8x32xf32>
    %538 = math.tanh %537 : vector<8x32xf32>
    %539 = arith.mulf %530, %467 : vector<8x32xf32>
    %cst_145 = arith.constant 1.000000e+00 : f32
    %540 = vector.broadcast %cst_145 : f32 to vector<8x32xf32>
    %541 = arith.subf %540, %530 : vector<8x32xf32>
    %542 = arith.mulf %541, %538 : vector<8x32xf32>
    %543 = arith.addf %539, %542 : vector<8x32xf32>
    %cst_146 = arith.constant -5.000000e+00 : f32
    %cst_147 = arith.constant 5.000000e+00 : f32
    %544 = vector.broadcast %cst_146 : f32 to vector<8x32xf32>
    %545 = arith.maximumf %544, %543 : vector<8x32xf32>
    %546 = vector.broadcast %cst_147 : f32 to vector<8x32xf32>
    %547 = arith.minimumf %546, %545 : vector<8x32xf32>
    %548 = arith.truncf %547 : vector<8x32xf32> to vector<8x32xbf16>
    %cst_148 = arith.constant dense<0.000000e+00> : vector<8x104xf32>
    %549 = tpu.matmul %548, %384, %cst_148 {dimension_numbers = #tpu.dot_dimension_numbers<[1], [0], [0], [1], [0, 0, 1, 1], [], []>} : vector<8x32xbf16>, vector<32x104xbf16>, vector<8x104xf32> -> vector<8x104xf32>
    %550 = vector.extract_strided_slice %549 {offsets = [0, 0], sizes = [8, 8], strides = [1, 1]} : vector<8x104xf32> to vector<8x8xf32>
    %551 = vector.extract_strided_slice %372 {offsets = [16, 0], sizes = [8, 96], strides = [1, 1]} : vector<64x96xf32> to vector<8x96xf32>
    %552 = vector.extract_strided_slice %549 {offsets = [0, 8], sizes = [8, 96], strides = [1, 1]} : vector<8x104xf32> to vector<8x96xf32>
    %553 = arith.addf %551, %552 : vector<8x96xf32>
    %554 = vector.extract_strided_slice %553 {offsets = [0, 0], sizes = [8, 64], strides = [1, 1]} : vector<8x96xf32> to vector<8x64xf32>
    %555 = arith.truncf %503 : vector<8x32xf32> to vector<8x32xbf16>
    %cst_149 = arith.constant dense<0.000000e+00> : vector<8x64xf32>
    %556 = tpu.matmul %555, %373, %cst_149 {dimension_numbers = #tpu.dot_dimension_numbers<[1], [0], [0], [1], [0, 0, 1, 1], [], []>} : vector<8x32xbf16>, vector<32x64xbf16>, vector<8x64xf32> -> vector<8x64xf32>
    %557 = arith.addf %554, %556 : vector<8x64xf32>
    %558 = vector.broadcast %374 : vector<1x64xf32> to vector<8x64xf32>
    %559 = arith.addf %557, %558 : vector<8x64xf32>
    %560 = arith.negf %559 : vector<8x64xf32>
    %561 = math.exp %560 : vector<8x64xf32>
    %cst_150 = arith.constant 1.000000e+00 : f32
    %562 = vector.broadcast %cst_150 : f32 to vector<8x64xf32>
    %563 = arith.addf %562, %561 : vector<8x64xf32>
    %564 = arith.divf %562, %563 : vector<8x64xf32>
    %565 = vector.extract_strided_slice %564 {offsets = [0, 0], sizes = [8, 32], strides = [1, 1]} : vector<8x64xf32> to vector<8x32xf32>
    %566 = vector.extract_strided_slice %564 {offsets = [0, 32], sizes = [8, 32], strides = [1, 1]} : vector<8x64xf32> to vector<8x32xf32>
    %567 = vector.extract_strided_slice %553 {offsets = [0, 64], sizes = [8, 32], strides = [1, 1]} : vector<8x96xf32> to vector<8x32xf32>
    %568 = arith.mulf %565, %503 : vector<8x32xf32>
    %569 = arith.truncf %568 : vector<8x32xf32> to vector<8x32xbf16>
    %cst_151 = arith.constant dense<0.000000e+00> : vector<8x32xf32>
    %570 = tpu.matmul %569, %375, %cst_151 {dimension_numbers = #tpu.dot_dimension_numbers<[1], [0], [0], [1], [0, 0, 1, 1], [], []>} : vector<8x32xbf16>, vector<32x32xbf16>, vector<8x32xf32> -> vector<8x32xf32>
    %571 = arith.addf %567, %570 : vector<8x32xf32>
    %572 = vector.broadcast %376 : vector<1x32xf32> to vector<8x32xf32>
    %573 = arith.addf %571, %572 : vector<8x32xf32>
    %574 = math.tanh %573 : vector<8x32xf32>
    %575 = arith.mulf %566, %503 : vector<8x32xf32>
    %cst_152 = arith.constant 1.000000e+00 : f32
    %576 = vector.broadcast %cst_152 : f32 to vector<8x32xf32>
    %577 = arith.subf %576, %566 : vector<8x32xf32>
    %578 = arith.mulf %577, %574 : vector<8x32xf32>
    %579 = arith.addf %575, %578 : vector<8x32xf32>
    %cst_153 = arith.constant -5.000000e+00 : f32
    %cst_154 = arith.constant 5.000000e+00 : f32
    %580 = vector.broadcast %cst_153 : f32 to vector<8x32xf32>
    %581 = arith.maximumf %580, %579 : vector<8x32xf32>
    %582 = vector.broadcast %cst_154 : f32 to vector<8x32xf32>
    %583 = arith.minimumf %582, %581 : vector<8x32xf32>
    %584 = arith.truncf %583 : vector<8x32xf32> to vector<8x32xbf16>
    %cst_155 = arith.constant dense<0.000000e+00> : vector<8x8xf32>
    %585 = tpu.matmul %584, %377, %cst_155 {dimension_numbers = #tpu.dot_dimension_numbers<[1], [0], [0], [1], [0, 0, 1, 1], [], []>} : vector<8x32xbf16>, vector<32x8xbf16>, vector<8x8xf32> -> vector<8x8xf32>
    %586 = vector.broadcast %378 : vector<1x8xf32> to vector<8x8xf32>
    %587 = arith.addf %585, %586 : vector<8x8xf32>
    %588 = vector.extract_strided_slice %587 {offsets = [0, 4], sizes = [8, 4], strides = [1, 1]} : vector<8x8xf32> to vector<8x4xf32>
    %cst_156 = arith.constant 5.000000e-01 : f32
    %589 = vector.broadcast %cst_156 : f32 to vector<8x4xf32>
    %590 = arith.mulf %589, %588 : vector<8x4xf32>
    %591 = math.exp %590 : vector<8x4xf32>
    %592 = vector.extract_strided_slice %385 {offsets = [16, 0], sizes = [8, 4], strides = [1, 1]} : vector<64x4xf32> to vector<8x4xf32>
    %593 = arith.mulf %591, %592 : vector<8x4xf32>
    %594 = vector.extract_strided_slice %587 {offsets = [0, 0], sizes = [8, 4], strides = [1, 1]} : vector<8x8xf32> to vector<8x4xf32>
    %595 = arith.addf %593, %594 : vector<8x4xf32>
    %596 = arith.truncf %595 : vector<8x4xf32> to vector<8x4xbf16>
    %cst_157 = arith.constant dense<0.000000e+00> : vector<8x96xf32>
    %597 = tpu.matmul %596, %379, %cst_157 {dimension_numbers = #tpu.dot_dimension_numbers<[1], [0], [0], [1], [0, 0, 1, 1], [], []>} : vector<8x4xbf16>, vector<4x96xbf16>, vector<8x96xf32> -> vector<8x96xf32>
    %598 = vector.extract_strided_slice %597 {offsets = [0, 0], sizes = [8, 64], strides = [1, 1]} : vector<8x96xf32> to vector<8x64xf32>
    %599 = arith.truncf %547 : vector<8x32xf32> to vector<8x32xbf16>
    %cst_158 = arith.constant dense<0.000000e+00> : vector<8x64xf32>
    %600 = tpu.matmul %599, %380, %cst_158 {dimension_numbers = #tpu.dot_dimension_numbers<[1], [0], [0], [1], [0, 0, 1, 1], [], []>} : vector<8x32xbf16>, vector<32x64xbf16>, vector<8x64xf32> -> vector<8x64xf32>
    %601 = arith.addf %598, %600 : vector<8x64xf32>
    %602 = vector.broadcast %381 : vector<1x64xf32> to vector<8x64xf32>
    %603 = arith.addf %601, %602 : vector<8x64xf32>
    %604 = arith.negf %603 : vector<8x64xf32>
    %605 = math.exp %604 : vector<8x64xf32>
    %cst_159 = arith.constant 1.000000e+00 : f32
    %606 = vector.broadcast %cst_159 : f32 to vector<8x64xf32>
    %607 = arith.addf %606, %605 : vector<8x64xf32>
    %608 = arith.divf %606, %607 : vector<8x64xf32>
    %609 = vector.extract_strided_slice %608 {offsets = [0, 0], sizes = [8, 32], strides = [1, 1]} : vector<8x64xf32> to vector<8x32xf32>
    %610 = vector.extract_strided_slice %608 {offsets = [0, 32], sizes = [8, 32], strides = [1, 1]} : vector<8x64xf32> to vector<8x32xf32>
    %611 = vector.extract_strided_slice %597 {offsets = [0, 64], sizes = [8, 32], strides = [1, 1]} : vector<8x96xf32> to vector<8x32xf32>
    %612 = arith.mulf %609, %547 : vector<8x32xf32>
    %613 = arith.truncf %612 : vector<8x32xf32> to vector<8x32xbf16>
    %cst_160 = arith.constant dense<0.000000e+00> : vector<8x32xf32>
    %614 = tpu.matmul %613, %382, %cst_160 {dimension_numbers = #tpu.dot_dimension_numbers<[1], [0], [0], [1], [0, 0, 1, 1], [], []>} : vector<8x32xbf16>, vector<32x32xbf16>, vector<8x32xf32> -> vector<8x32xf32>
    %615 = arith.addf %611, %614 : vector<8x32xf32>
    %616 = vector.broadcast %383 : vector<1x32xf32> to vector<8x32xf32>
    %617 = arith.addf %615, %616 : vector<8x32xf32>
    %618 = math.tanh %617 : vector<8x32xf32>
    %619 = arith.mulf %610, %547 : vector<8x32xf32>
    %cst_161 = arith.constant 1.000000e+00 : f32
    %620 = vector.broadcast %cst_161 : f32 to vector<8x32xf32>
    %621 = arith.subf %620, %610 : vector<8x32xf32>
    %622 = arith.mulf %621, %618 : vector<8x32xf32>
    %623 = arith.addf %619, %622 : vector<8x32xf32>
    %cst_162 = arith.constant -5.000000e+00 : f32
    %cst_163 = arith.constant 5.000000e+00 : f32
    %624 = vector.broadcast %cst_162 : f32 to vector<8x32xf32>
    %625 = arith.maximumf %624, %623 : vector<8x32xf32>
    %626 = vector.broadcast %cst_163 : f32 to vector<8x32xf32>
    %627 = arith.minimumf %626, %625 : vector<8x32xf32>
    %628 = arith.truncf %627 : vector<8x32xf32> to vector<8x32xbf16>
    %cst_164 = arith.constant dense<0.000000e+00> : vector<8x104xf32>
    %629 = tpu.matmul %628, %384, %cst_164 {dimension_numbers = #tpu.dot_dimension_numbers<[1], [0], [0], [1], [0, 0, 1, 1], [], []>} : vector<8x32xbf16>, vector<32x104xbf16>, vector<8x104xf32> -> vector<8x104xf32>
    %630 = vector.extract_strided_slice %629 {offsets = [0, 0], sizes = [8, 8], strides = [1, 1]} : vector<8x104xf32> to vector<8x8xf32>
    %631 = vector.extract_strided_slice %372 {offsets = [24, 0], sizes = [8, 96], strides = [1, 1]} : vector<64x96xf32> to vector<8x96xf32>
    %632 = vector.extract_strided_slice %629 {offsets = [0, 8], sizes = [8, 96], strides = [1, 1]} : vector<8x104xf32> to vector<8x96xf32>
    %633 = arith.addf %631, %632 : vector<8x96xf32>
    %634 = vector.extract_strided_slice %633 {offsets = [0, 0], sizes = [8, 64], strides = [1, 1]} : vector<8x96xf32> to vector<8x64xf32>
    %635 = arith.truncf %583 : vector<8x32xf32> to vector<8x32xbf16>
    %cst_165 = arith.constant dense<0.000000e+00> : vector<8x64xf32>
    %636 = tpu.matmul %635, %373, %cst_165 {dimension_numbers = #tpu.dot_dimension_numbers<[1], [0], [0], [1], [0, 0, 1, 1], [], []>} : vector<8x32xbf16>, vector<32x64xbf16>, vector<8x64xf32> -> vector<8x64xf32>
    %637 = arith.addf %634, %636 : vector<8x64xf32>
    %638 = vector.broadcast %374 : vector<1x64xf32> to vector<8x64xf32>
    %639 = arith.addf %637, %638 : vector<8x64xf32>
    %640 = arith.negf %639 : vector<8x64xf32>
    %641 = math.exp %640 : vector<8x64xf32>
    %cst_166 = arith.constant 1.000000e+00 : f32
    %642 = vector.broadcast %cst_166 : f32 to vector<8x64xf32>
    %643 = arith.addf %642, %641 : vector<8x64xf32>
    %644 = arith.divf %642, %643 : vector<8x64xf32>
    %645 = vector.extract_strided_slice %644 {offsets = [0, 0], sizes = [8, 32], strides = [1, 1]} : vector<8x64xf32> to vector<8x32xf32>
    %646 = vector.extract_strided_slice %644 {offsets = [0, 32], sizes = [8, 32], strides = [1, 1]} : vector<8x64xf32> to vector<8x32xf32>
    %647 = vector.extract_strided_slice %633 {offsets = [0, 64], sizes = [8, 32], strides = [1, 1]} : vector<8x96xf32> to vector<8x32xf32>
    %648 = arith.mulf %645, %583 : vector<8x32xf32>
    %649 = arith.truncf %648 : vector<8x32xf32> to vector<8x32xbf16>
    %cst_167 = arith.constant dense<0.000000e+00> : vector<8x32xf32>
    %650 = tpu.matmul %649, %375, %cst_167 {dimension_numbers = #tpu.dot_dimension_numbers<[1], [0], [0], [1], [0, 0, 1, 1], [], []>} : vector<8x32xbf16>, vector<32x32xbf16>, vector<8x32xf32> -> vector<8x32xf32>
    %651 = arith.addf %647, %650 : vector<8x32xf32>
    %652 = vector.broadcast %376 : vector<1x32xf32> to vector<8x32xf32>
    %653 = arith.addf %651, %652 : vector<8x32xf32>
    %654 = math.tanh %653 : vector<8x32xf32>
    %655 = arith.mulf %646, %583 : vector<8x32xf32>
    %cst_168 = arith.constant 1.000000e+00 : f32
    %656 = vector.broadcast %cst_168 : f32 to vector<8x32xf32>
    %657 = arith.subf %656, %646 : vector<8x32xf32>
    %658 = arith.mulf %657, %654 : vector<8x32xf32>
    %659 = arith.addf %655, %658 : vector<8x32xf32>
    %cst_169 = arith.constant -5.000000e+00 : f32
    %cst_170 = arith.constant 5.000000e+00 : f32
    %660 = vector.broadcast %cst_169 : f32 to vector<8x32xf32>
    %661 = arith.maximumf %660, %659 : vector<8x32xf32>
    %662 = vector.broadcast %cst_170 : f32 to vector<8x32xf32>
    %663 = arith.minimumf %662, %661 : vector<8x32xf32>
    %664 = arith.truncf %663 : vector<8x32xf32> to vector<8x32xbf16>
    %cst_171 = arith.constant dense<0.000000e+00> : vector<8x8xf32>
    %665 = tpu.matmul %664, %377, %cst_171 {dimension_numbers = #tpu.dot_dimension_numbers<[1], [0], [0], [1], [0, 0, 1, 1], [], []>} : vector<8x32xbf16>, vector<32x8xbf16>, vector<8x8xf32> -> vector<8x8xf32>
    %666 = vector.broadcast %378 : vector<1x8xf32> to vector<8x8xf32>
    %667 = arith.addf %665, %666 : vector<8x8xf32>
    %668 = vector.extract_strided_slice %667 {offsets = [0, 4], sizes = [8, 4], strides = [1, 1]} : vector<8x8xf32> to vector<8x4xf32>
    %cst_172 = arith.constant 5.000000e-01 : f32
    %669 = vector.broadcast %cst_172 : f32 to vector<8x4xf32>
    %670 = arith.mulf %669, %668 : vector<8x4xf32>
    %671 = math.exp %670 : vector<8x4xf32>
    %672 = vector.extract_strided_slice %385 {offsets = [24, 0], sizes = [8, 4], strides = [1, 1]} : vector<64x4xf32> to vector<8x4xf32>
    %673 = arith.mulf %671, %672 : vector<8x4xf32>
    %674 = vector.extract_strided_slice %667 {offsets = [0, 0], sizes = [8, 4], strides = [1, 1]} : vector<8x8xf32> to vector<8x4xf32>
    %675 = arith.addf %673, %674 : vector<8x4xf32>
    %676 = arith.truncf %675 : vector<8x4xf32> to vector<8x4xbf16>
    %cst_173 = arith.constant dense<0.000000e+00> : vector<8x96xf32>
    %677 = tpu.matmul %676, %379, %cst_173 {dimension_numbers = #tpu.dot_dimension_numbers<[1], [0], [0], [1], [0, 0, 1, 1], [], []>} : vector<8x4xbf16>, vector<4x96xbf16>, vector<8x96xf32> -> vector<8x96xf32>
    %678 = vector.extract_strided_slice %677 {offsets = [0, 0], sizes = [8, 64], strides = [1, 1]} : vector<8x96xf32> to vector<8x64xf32>
    %679 = arith.truncf %627 : vector<8x32xf32> to vector<8x32xbf16>
    %cst_174 = arith.constant dense<0.000000e+00> : vector<8x64xf32>
    %680 = tpu.matmul %679, %380, %cst_174 {dimension_numbers = #tpu.dot_dimension_numbers<[1], [0], [0], [1], [0, 0, 1, 1], [], []>} : vector<8x32xbf16>, vector<32x64xbf16>, vector<8x64xf32> -> vector<8x64xf32>
    %681 = arith.addf %678, %680 : vector<8x64xf32>
    %682 = vector.broadcast %381 : vector<1x64xf32> to vector<8x64xf32>
    %683 = arith.addf %681, %682 : vector<8x64xf32>
    %684 = arith.negf %683 : vector<8x64xf32>
    %685 = math.exp %684 : vector<8x64xf32>
    %cst_175 = arith.constant 1.000000e+00 : f32
    %686 = vector.broadcast %cst_175 : f32 to vector<8x64xf32>
    %687 = arith.addf %686, %685 : vector<8x64xf32>
    %688 = arith.divf %686, %687 : vector<8x64xf32>
    %689 = vector.extract_strided_slice %688 {offsets = [0, 0], sizes = [8, 32], strides = [1, 1]} : vector<8x64xf32> to vector<8x32xf32>
    %690 = vector.extract_strided_slice %688 {offsets = [0, 32], sizes = [8, 32], strides = [1, 1]} : vector<8x64xf32> to vector<8x32xf32>
    %691 = vector.extract_strided_slice %677 {offsets = [0, 64], sizes = [8, 32], strides = [1, 1]} : vector<8x96xf32> to vector<8x32xf32>
    %692 = arith.mulf %689, %627 : vector<8x32xf32>
    %693 = arith.truncf %692 : vector<8x32xf32> to vector<8x32xbf16>
    %cst_176 = arith.constant dense<0.000000e+00> : vector<8x32xf32>
    %694 = tpu.matmul %693, %382, %cst_176 {dimension_numbers = #tpu.dot_dimension_numbers<[1], [0], [0], [1], [0, 0, 1, 1], [], []>} : vector<8x32xbf16>, vector<32x32xbf16>, vector<8x32xf32> -> vector<8x32xf32>
    %695 = arith.addf %691, %694 : vector<8x32xf32>
    %696 = vector.broadcast %383 : vector<1x32xf32> to vector<8x32xf32>
    %697 = arith.addf %695, %696 : vector<8x32xf32>
    %698 = math.tanh %697 : vector<8x32xf32>
    %699 = arith.mulf %690, %627 : vector<8x32xf32>
    %cst_177 = arith.constant 1.000000e+00 : f32
    %700 = vector.broadcast %cst_177 : f32 to vector<8x32xf32>
    %701 = arith.subf %700, %690 : vector<8x32xf32>
    %702 = arith.mulf %701, %698 : vector<8x32xf32>
    %703 = arith.addf %699, %702 : vector<8x32xf32>
    %cst_178 = arith.constant -5.000000e+00 : f32
    %cst_179 = arith.constant 5.000000e+00 : f32
    %704 = vector.broadcast %cst_178 : f32 to vector<8x32xf32>
    %705 = arith.maximumf %704, %703 : vector<8x32xf32>
    %706 = vector.broadcast %cst_179 : f32 to vector<8x32xf32>
    %707 = arith.minimumf %706, %705 : vector<8x32xf32>
    %708 = arith.truncf %707 : vector<8x32xf32> to vector<8x32xbf16>
    %cst_180 = arith.constant dense<0.000000e+00> : vector<8x104xf32>
    %709 = tpu.matmul %708, %384, %cst_180 {dimension_numbers = #tpu.dot_dimension_numbers<[1], [0], [0], [1], [0, 0, 1, 1], [], []>} : vector<8x32xbf16>, vector<32x104xbf16>, vector<8x104xf32> -> vector<8x104xf32>
    %710 = vector.extract_strided_slice %709 {offsets = [0, 0], sizes = [8, 8], strides = [1, 1]} : vector<8x104xf32> to vector<8x8xf32>
    %711 = vector.extract_strided_slice %372 {offsets = [32, 0], sizes = [8, 96], strides = [1, 1]} : vector<64x96xf32> to vector<8x96xf32>
    %712 = vector.extract_strided_slice %709 {offsets = [0, 8], sizes = [8, 96], strides = [1, 1]} : vector<8x104xf32> to vector<8x96xf32>
    %713 = arith.addf %711, %712 : vector<8x96xf32>
    %714 = vector.extract_strided_slice %713 {offsets = [0, 0], sizes = [8, 64], strides = [1, 1]} : vector<8x96xf32> to vector<8x64xf32>
    %715 = arith.truncf %663 : vector<8x32xf32> to vector<8x32xbf16>
    %cst_181 = arith.constant dense<0.000000e+00> : vector<8x64xf32>
    %716 = tpu.matmul %715, %373, %cst_181 {dimension_numbers = #tpu.dot_dimension_numbers<[1], [0], [0], [1], [0, 0, 1, 1], [], []>} : vector<8x32xbf16>, vector<32x64xbf16>, vector<8x64xf32> -> vector<8x64xf32>
    %717 = arith.addf %714, %716 : vector<8x64xf32>
    %718 = vector.broadcast %374 : vector<1x64xf32> to vector<8x64xf32>
    %719 = arith.addf %717, %718 : vector<8x64xf32>
    %720 = arith.negf %719 : vector<8x64xf32>
    %721 = math.exp %720 : vector<8x64xf32>
    %cst_182 = arith.constant 1.000000e+00 : f32
    %722 = vector.broadcast %cst_182 : f32 to vector<8x64xf32>
    %723 = arith.addf %722, %721 : vector<8x64xf32>
    %724 = arith.divf %722, %723 : vector<8x64xf32>
    %725 = vector.extract_strided_slice %724 {offsets = [0, 0], sizes = [8, 32], strides = [1, 1]} : vector<8x64xf32> to vector<8x32xf32>
    %726 = vector.extract_strided_slice %724 {offsets = [0, 32], sizes = [8, 32], strides = [1, 1]} : vector<8x64xf32> to vector<8x32xf32>
    %727 = vector.extract_strided_slice %713 {offsets = [0, 64], sizes = [8, 32], strides = [1, 1]} : vector<8x96xf32> to vector<8x32xf32>
    %728 = arith.mulf %725, %663 : vector<8x32xf32>
    %729 = arith.truncf %728 : vector<8x32xf32> to vector<8x32xbf16>
    %cst_183 = arith.constant dense<0.000000e+00> : vector<8x32xf32>
    %730 = tpu.matmul %729, %375, %cst_183 {dimension_numbers = #tpu.dot_dimension_numbers<[1], [0], [0], [1], [0, 0, 1, 1], [], []>} : vector<8x32xbf16>, vector<32x32xbf16>, vector<8x32xf32> -> vector<8x32xf32>
    %731 = arith.addf %727, %730 : vector<8x32xf32>
    %732 = vector.broadcast %376 : vector<1x32xf32> to vector<8x32xf32>
    %733 = arith.addf %731, %732 : vector<8x32xf32>
    %734 = math.tanh %733 : vector<8x32xf32>
    %735 = arith.mulf %726, %663 : vector<8x32xf32>
    %cst_184 = arith.constant 1.000000e+00 : f32
    %736 = vector.broadcast %cst_184 : f32 to vector<8x32xf32>
    %737 = arith.subf %736, %726 : vector<8x32xf32>
    %738 = arith.mulf %737, %734 : vector<8x32xf32>
    %739 = arith.addf %735, %738 : vector<8x32xf32>
    %cst_185 = arith.constant -5.000000e+00 : f32
    %cst_186 = arith.constant 5.000000e+00 : f32
    %740 = vector.broadcast %cst_185 : f32 to vector<8x32xf32>
    %741 = arith.maximumf %740, %739 : vector<8x32xf32>
    %742 = vector.broadcast %cst_186 : f32 to vector<8x32xf32>
    %743 = arith.minimumf %742, %741 : vector<8x32xf32>
    %744 = arith.truncf %743 : vector<8x32xf32> to vector<8x32xbf16>
    %cst_187 = arith.constant dense<0.000000e+00> : vector<8x8xf32>
    %745 = tpu.matmul %744, %377, %cst_187 {dimension_numbers = #tpu.dot_dimension_numbers<[1], [0], [0], [1], [0, 0, 1, 1], [], []>} : vector<8x32xbf16>, vector<32x8xbf16>, vector<8x8xf32> -> vector<8x8xf32>
    %746 = vector.broadcast %378 : vector<1x8xf32> to vector<8x8xf32>
    %747 = arith.addf %745, %746 : vector<8x8xf32>
    %748 = vector.extract_strided_slice %747 {offsets = [0, 4], sizes = [8, 4], strides = [1, 1]} : vector<8x8xf32> to vector<8x4xf32>
    %cst_188 = arith.constant 5.000000e-01 : f32
    %749 = vector.broadcast %cst_188 : f32 to vector<8x4xf32>
    %750 = arith.mulf %749, %748 : vector<8x4xf32>
    %751 = math.exp %750 : vector<8x4xf32>
    %752 = vector.extract_strided_slice %385 {offsets = [32, 0], sizes = [8, 4], strides = [1, 1]} : vector<64x4xf32> to vector<8x4xf32>
    %753 = arith.mulf %751, %752 : vector<8x4xf32>
    %754 = vector.extract_strided_slice %747 {offsets = [0, 0], sizes = [8, 4], strides = [1, 1]} : vector<8x8xf32> to vector<8x4xf32>
    %755 = arith.addf %753, %754 : vector<8x4xf32>
    %756 = arith.truncf %755 : vector<8x4xf32> to vector<8x4xbf16>
    %cst_189 = arith.constant dense<0.000000e+00> : vector<8x96xf32>
    %757 = tpu.matmul %756, %379, %cst_189 {dimension_numbers = #tpu.dot_dimension_numbers<[1], [0], [0], [1], [0, 0, 1, 1], [], []>} : vector<8x4xbf16>, vector<4x96xbf16>, vector<8x96xf32> -> vector<8x96xf32>
    %758 = vector.extract_strided_slice %757 {offsets = [0, 0], sizes = [8, 64], strides = [1, 1]} : vector<8x96xf32> to vector<8x64xf32>
    %759 = arith.truncf %707 : vector<8x32xf32> to vector<8x32xbf16>
    %cst_190 = arith.constant dense<0.000000e+00> : vector<8x64xf32>
    %760 = tpu.matmul %759, %380, %cst_190 {dimension_numbers = #tpu.dot_dimension_numbers<[1], [0], [0], [1], [0, 0, 1, 1], [], []>} : vector<8x32xbf16>, vector<32x64xbf16>, vector<8x64xf32> -> vector<8x64xf32>
    %761 = arith.addf %758, %760 : vector<8x64xf32>
    %762 = vector.broadcast %381 : vector<1x64xf32> to vector<8x64xf32>
    %763 = arith.addf %761, %762 : vector<8x64xf32>
    %764 = arith.negf %763 : vector<8x64xf32>
    %765 = math.exp %764 : vector<8x64xf32>
    %cst_191 = arith.constant 1.000000e+00 : f32
    %766 = vector.broadcast %cst_191 : f32 to vector<8x64xf32>
    %767 = arith.addf %766, %765 : vector<8x64xf32>
    %768 = arith.divf %766, %767 : vector<8x64xf32>
    %769 = vector.extract_strided_slice %768 {offsets = [0, 0], sizes = [8, 32], strides = [1, 1]} : vector<8x64xf32> to vector<8x32xf32>
    %770 = vector.extract_strided_slice %768 {offsets = [0, 32], sizes = [8, 32], strides = [1, 1]} : vector<8x64xf32> to vector<8x32xf32>
    %771 = vector.extract_strided_slice %757 {offsets = [0, 64], sizes = [8, 32], strides = [1, 1]} : vector<8x96xf32> to vector<8x32xf32>
    %772 = arith.mulf %769, %707 : vector<8x32xf32>
    %773 = arith.truncf %772 : vector<8x32xf32> to vector<8x32xbf16>
    %cst_192 = arith.constant dense<0.000000e+00> : vector<8x32xf32>
    %774 = tpu.matmul %773, %382, %cst_192 {dimension_numbers = #tpu.dot_dimension_numbers<[1], [0], [0], [1], [0, 0, 1, 1], [], []>} : vector<8x32xbf16>, vector<32x32xbf16>, vector<8x32xf32> -> vector<8x32xf32>
    %775 = arith.addf %771, %774 : vector<8x32xf32>
    %776 = vector.broadcast %383 : vector<1x32xf32> to vector<8x32xf32>
    %777 = arith.addf %775, %776 : vector<8x32xf32>
    %778 = math.tanh %777 : vector<8x32xf32>
    %779 = arith.mulf %770, %707 : vector<8x32xf32>
    %cst_193 = arith.constant 1.000000e+00 : f32
    %780 = vector.broadcast %cst_193 : f32 to vector<8x32xf32>
    %781 = arith.subf %780, %770 : vector<8x32xf32>
    %782 = arith.mulf %781, %778 : vector<8x32xf32>
    %783 = arith.addf %779, %782 : vector<8x32xf32>
    %cst_194 = arith.constant -5.000000e+00 : f32
    %cst_195 = arith.constant 5.000000e+00 : f32
    %784 = vector.broadcast %cst_194 : f32 to vector<8x32xf32>
    %785 = arith.maximumf %784, %783 : vector<8x32xf32>
    %786 = vector.broadcast %cst_195 : f32 to vector<8x32xf32>
    %787 = arith.minimumf %786, %785 : vector<8x32xf32>
    %788 = arith.truncf %787 : vector<8x32xf32> to vector<8x32xbf16>
    %cst_196 = arith.constant dense<0.000000e+00> : vector<8x104xf32>
    %789 = tpu.matmul %788, %384, %cst_196 {dimension_numbers = #tpu.dot_dimension_numbers<[1], [0], [0], [1], [0, 0, 1, 1], [], []>} : vector<8x32xbf16>, vector<32x104xbf16>, vector<8x104xf32> -> vector<8x104xf32>
    %790 = vector.extract_strided_slice %789 {offsets = [0, 0], sizes = [8, 8], strides = [1, 1]} : vector<8x104xf32> to vector<8x8xf32>
    %791 = vector.extract_strided_slice %372 {offsets = [40, 0], sizes = [8, 96], strides = [1, 1]} : vector<64x96xf32> to vector<8x96xf32>
    %792 = vector.extract_strided_slice %789 {offsets = [0, 8], sizes = [8, 96], strides = [1, 1]} : vector<8x104xf32> to vector<8x96xf32>
    %793 = arith.addf %791, %792 : vector<8x96xf32>
    %794 = vector.extract_strided_slice %793 {offsets = [0, 0], sizes = [8, 64], strides = [1, 1]} : vector<8x96xf32> to vector<8x64xf32>
    %795 = arith.truncf %743 : vector<8x32xf32> to vector<8x32xbf16>
    %cst_197 = arith.constant dense<0.000000e+00> : vector<8x64xf32>
    %796 = tpu.matmul %795, %373, %cst_197 {dimension_numbers = #tpu.dot_dimension_numbers<[1], [0], [0], [1], [0, 0, 1, 1], [], []>} : vector<8x32xbf16>, vector<32x64xbf16>, vector<8x64xf32> -> vector<8x64xf32>
    %797 = arith.addf %794, %796 : vector<8x64xf32>
    %798 = vector.broadcast %374 : vector<1x64xf32> to vector<8x64xf32>
    %799 = arith.addf %797, %798 : vector<8x64xf32>
    %800 = arith.negf %799 : vector<8x64xf32>
    %801 = math.exp %800 : vector<8x64xf32>
    %cst_198 = arith.constant 1.000000e+00 : f32
    %802 = vector.broadcast %cst_198 : f32 to vector<8x64xf32>
    %803 = arith.addf %802, %801 : vector<8x64xf32>
    %804 = arith.divf %802, %803 : vector<8x64xf32>
    %805 = vector.extract_strided_slice %804 {offsets = [0, 0], sizes = [8, 32], strides = [1, 1]} : vector<8x64xf32> to vector<8x32xf32>
    %806 = vector.extract_strided_slice %804 {offsets = [0, 32], sizes = [8, 32], strides = [1, 1]} : vector<8x64xf32> to vector<8x32xf32>
    %807 = vector.extract_strided_slice %793 {offsets = [0, 64], sizes = [8, 32], strides = [1, 1]} : vector<8x96xf32> to vector<8x32xf32>
    %808 = arith.mulf %805, %743 : vector<8x32xf32>
    %809 = arith.truncf %808 : vector<8x32xf32> to vector<8x32xbf16>
    %cst_199 = arith.constant dense<0.000000e+00> : vector<8x32xf32>
    %810 = tpu.matmul %809, %375, %cst_199 {dimension_numbers = #tpu.dot_dimension_numbers<[1], [0], [0], [1], [0, 0, 1, 1], [], []>} : vector<8x32xbf16>, vector<32x32xbf16>, vector<8x32xf32> -> vector<8x32xf32>
    %811 = arith.addf %807, %810 : vector<8x32xf32>
    %812 = vector.broadcast %376 : vector<1x32xf32> to vector<8x32xf32>
    %813 = arith.addf %811, %812 : vector<8x32xf32>
    %814 = math.tanh %813 : vector<8x32xf32>
    %815 = arith.mulf %806, %743 : vector<8x32xf32>
    %cst_200 = arith.constant 1.000000e+00 : f32
    %816 = vector.broadcast %cst_200 : f32 to vector<8x32xf32>
    %817 = arith.subf %816, %806 : vector<8x32xf32>
    %818 = arith.mulf %817, %814 : vector<8x32xf32>
    %819 = arith.addf %815, %818 : vector<8x32xf32>
    %cst_201 = arith.constant -5.000000e+00 : f32
    %cst_202 = arith.constant 5.000000e+00 : f32
    %820 = vector.broadcast %cst_201 : f32 to vector<8x32xf32>
    %821 = arith.maximumf %820, %819 : vector<8x32xf32>
    %822 = vector.broadcast %cst_202 : f32 to vector<8x32xf32>
    %823 = arith.minimumf %822, %821 : vector<8x32xf32>
    %824 = arith.truncf %823 : vector<8x32xf32> to vector<8x32xbf16>
    %cst_203 = arith.constant dense<0.000000e+00> : vector<8x8xf32>
    %825 = tpu.matmul %824, %377, %cst_203 {dimension_numbers = #tpu.dot_dimension_numbers<[1], [0], [0], [1], [0, 0, 1, 1], [], []>} : vector<8x32xbf16>, vector<32x8xbf16>, vector<8x8xf32> -> vector<8x8xf32>
    %826 = vector.broadcast %378 : vector<1x8xf32> to vector<8x8xf32>
    %827 = arith.addf %825, %826 : vector<8x8xf32>
    %828 = vector.extract_strided_slice %827 {offsets = [0, 4], sizes = [8, 4], strides = [1, 1]} : vector<8x8xf32> to vector<8x4xf32>
    %cst_204 = arith.constant 5.000000e-01 : f32
    %829 = vector.broadcast %cst_204 : f32 to vector<8x4xf32>
    %830 = arith.mulf %829, %828 : vector<8x4xf32>
    %831 = math.exp %830 : vector<8x4xf32>
    %832 = vector.extract_strided_slice %385 {offsets = [40, 0], sizes = [8, 4], strides = [1, 1]} : vector<64x4xf32> to vector<8x4xf32>
    %833 = arith.mulf %831, %832 : vector<8x4xf32>
    %834 = vector.extract_strided_slice %827 {offsets = [0, 0], sizes = [8, 4], strides = [1, 1]} : vector<8x8xf32> to vector<8x4xf32>
    %835 = arith.addf %833, %834 : vector<8x4xf32>
    %836 = arith.truncf %835 : vector<8x4xf32> to vector<8x4xbf16>
    %cst_205 = arith.constant dense<0.000000e+00> : vector<8x96xf32>
    %837 = tpu.matmul %836, %379, %cst_205 {dimension_numbers = #tpu.dot_dimension_numbers<[1], [0], [0], [1], [0, 0, 1, 1], [], []>} : vector<8x4xbf16>, vector<4x96xbf16>, vector<8x96xf32> -> vector<8x96xf32>
    %838 = vector.extract_strided_slice %837 {offsets = [0, 0], sizes = [8, 64], strides = [1, 1]} : vector<8x96xf32> to vector<8x64xf32>
    %839 = arith.truncf %787 : vector<8x32xf32> to vector<8x32xbf16>
    %cst_206 = arith.constant dense<0.000000e+00> : vector<8x64xf32>
    %840 = tpu.matmul %839, %380, %cst_206 {dimension_numbers = #tpu.dot_dimension_numbers<[1], [0], [0], [1], [0, 0, 1, 1], [], []>} : vector<8x32xbf16>, vector<32x64xbf16>, vector<8x64xf32> -> vector<8x64xf32>
    %841 = arith.addf %838, %840 : vector<8x64xf32>
    %842 = vector.broadcast %381 : vector<1x64xf32> to vector<8x64xf32>
    %843 = arith.addf %841, %842 : vector<8x64xf32>
    %844 = arith.negf %843 : vector<8x64xf32>
    %845 = math.exp %844 : vector<8x64xf32>
    %cst_207 = arith.constant 1.000000e+00 : f32
    %846 = vector.broadcast %cst_207 : f32 to vector<8x64xf32>
    %847 = arith.addf %846, %845 : vector<8x64xf32>
    %848 = arith.divf %846, %847 : vector<8x64xf32>
    %849 = vector.extract_strided_slice %848 {offsets = [0, 0], sizes = [8, 32], strides = [1, 1]} : vector<8x64xf32> to vector<8x32xf32>
    %850 = vector.extract_strided_slice %848 {offsets = [0, 32], sizes = [8, 32], strides = [1, 1]} : vector<8x64xf32> to vector<8x32xf32>
    %851 = vector.extract_strided_slice %837 {offsets = [0, 64], sizes = [8, 32], strides = [1, 1]} : vector<8x96xf32> to vector<8x32xf32>
    %852 = arith.mulf %849, %787 : vector<8x32xf32>
    %853 = arith.truncf %852 : vector<8x32xf32> to vector<8x32xbf16>
    %cst_208 = arith.constant dense<0.000000e+00> : vector<8x32xf32>
    %854 = tpu.matmul %853, %382, %cst_208 {dimension_numbers = #tpu.dot_dimension_numbers<[1], [0], [0], [1], [0, 0, 1, 1], [], []>} : vector<8x32xbf16>, vector<32x32xbf16>, vector<8x32xf32> -> vector<8x32xf32>
    %855 = arith.addf %851, %854 : vector<8x32xf32>
    %856 = vector.broadcast %383 : vector<1x32xf32> to vector<8x32xf32>
    %857 = arith.addf %855, %856 : vector<8x32xf32>
    %858 = math.tanh %857 : vector<8x32xf32>
    %859 = arith.mulf %850, %787 : vector<8x32xf32>
    %cst_209 = arith.constant 1.000000e+00 : f32
    %860 = vector.broadcast %cst_209 : f32 to vector<8x32xf32>
    %861 = arith.subf %860, %850 : vector<8x32xf32>
    %862 = arith.mulf %861, %858 : vector<8x32xf32>
    %863 = arith.addf %859, %862 : vector<8x32xf32>
    %cst_210 = arith.constant -5.000000e+00 : f32
    %cst_211 = arith.constant 5.000000e+00 : f32
    %864 = vector.broadcast %cst_210 : f32 to vector<8x32xf32>
    %865 = arith.maximumf %864, %863 : vector<8x32xf32>
    %866 = vector.broadcast %cst_211 : f32 to vector<8x32xf32>
    %867 = arith.minimumf %866, %865 : vector<8x32xf32>
    %868 = arith.truncf %867 : vector<8x32xf32> to vector<8x32xbf16>
    %cst_212 = arith.constant dense<0.000000e+00> : vector<8x104xf32>
    %869 = tpu.matmul %868, %384, %cst_212 {dimension_numbers = #tpu.dot_dimension_numbers<[1], [0], [0], [1], [0, 0, 1, 1], [], []>} : vector<8x32xbf16>, vector<32x104xbf16>, vector<8x104xf32> -> vector<8x104xf32>
    %870 = vector.extract_strided_slice %869 {offsets = [0, 0], sizes = [8, 8], strides = [1, 1]} : vector<8x104xf32> to vector<8x8xf32>
    %871 = vector.extract_strided_slice %372 {offsets = [48, 0], sizes = [8, 96], strides = [1, 1]} : vector<64x96xf32> to vector<8x96xf32>
    %872 = vector.extract_strided_slice %869 {offsets = [0, 8], sizes = [8, 96], strides = [1, 1]} : vector<8x104xf32> to vector<8x96xf32>
    %873 = arith.addf %871, %872 : vector<8x96xf32>
    %874 = vector.extract_strided_slice %873 {offsets = [0, 0], sizes = [8, 64], strides = [1, 1]} : vector<8x96xf32> to vector<8x64xf32>
    %875 = arith.truncf %823 : vector<8x32xf32> to vector<8x32xbf16>
    %cst_213 = arith.constant dense<0.000000e+00> : vector<8x64xf32>
    %876 = tpu.matmul %875, %373, %cst_213 {dimension_numbers = #tpu.dot_dimension_numbers<[1], [0], [0], [1], [0, 0, 1, 1], [], []>} : vector<8x32xbf16>, vector<32x64xbf16>, vector<8x64xf32> -> vector<8x64xf32>
    %877 = arith.addf %874, %876 : vector<8x64xf32>
    %878 = vector.broadcast %374 : vector<1x64xf32> to vector<8x64xf32>
    %879 = arith.addf %877, %878 : vector<8x64xf32>
    %880 = arith.negf %879 : vector<8x64xf32>
    %881 = math.exp %880 : vector<8x64xf32>
    %cst_214 = arith.constant 1.000000e+00 : f32
    %882 = vector.broadcast %cst_214 : f32 to vector<8x64xf32>
    %883 = arith.addf %882, %881 : vector<8x64xf32>
    %884 = arith.divf %882, %883 : vector<8x64xf32>
    %885 = vector.extract_strided_slice %884 {offsets = [0, 0], sizes = [8, 32], strides = [1, 1]} : vector<8x64xf32> to vector<8x32xf32>
    %886 = vector.extract_strided_slice %884 {offsets = [0, 32], sizes = [8, 32], strides = [1, 1]} : vector<8x64xf32> to vector<8x32xf32>
    %887 = vector.extract_strided_slice %873 {offsets = [0, 64], sizes = [8, 32], strides = [1, 1]} : vector<8x96xf32> to vector<8x32xf32>
    %888 = arith.mulf %885, %823 : vector<8x32xf32>
    %889 = arith.truncf %888 : vector<8x32xf32> to vector<8x32xbf16>
    %cst_215 = arith.constant dense<0.000000e+00> : vector<8x32xf32>
    %890 = tpu.matmul %889, %375, %cst_215 {dimension_numbers = #tpu.dot_dimension_numbers<[1], [0], [0], [1], [0, 0, 1, 1], [], []>} : vector<8x32xbf16>, vector<32x32xbf16>, vector<8x32xf32> -> vector<8x32xf32>
    %891 = arith.addf %887, %890 : vector<8x32xf32>
    %892 = vector.broadcast %376 : vector<1x32xf32> to vector<8x32xf32>
    %893 = arith.addf %891, %892 : vector<8x32xf32>
    %894 = math.tanh %893 : vector<8x32xf32>
    %895 = arith.mulf %886, %823 : vector<8x32xf32>
    %cst_216 = arith.constant 1.000000e+00 : f32
    %896 = vector.broadcast %cst_216 : f32 to vector<8x32xf32>
    %897 = arith.subf %896, %886 : vector<8x32xf32>
    %898 = arith.mulf %897, %894 : vector<8x32xf32>
    %899 = arith.addf %895, %898 : vector<8x32xf32>
    %cst_217 = arith.constant -5.000000e+00 : f32
    %cst_218 = arith.constant 5.000000e+00 : f32
    %900 = vector.broadcast %cst_217 : f32 to vector<8x32xf32>
    %901 = arith.maximumf %900, %899 : vector<8x32xf32>
    %902 = vector.broadcast %cst_218 : f32 to vector<8x32xf32>
    %903 = arith.minimumf %902, %901 : vector<8x32xf32>
    %904 = arith.truncf %903 : vector<8x32xf32> to vector<8x32xbf16>
    %cst_219 = arith.constant dense<0.000000e+00> : vector<8x8xf32>
    %905 = tpu.matmul %904, %377, %cst_219 {dimension_numbers = #tpu.dot_dimension_numbers<[1], [0], [0], [1], [0, 0, 1, 1], [], []>} : vector<8x32xbf16>, vector<32x8xbf16>, vector<8x8xf32> -> vector<8x8xf32>
    %906 = vector.broadcast %378 : vector<1x8xf32> to vector<8x8xf32>
    %907 = arith.addf %905, %906 : vector<8x8xf32>
    %908 = vector.extract_strided_slice %907 {offsets = [0, 4], sizes = [8, 4], strides = [1, 1]} : vector<8x8xf32> to vector<8x4xf32>
    %cst_220 = arith.constant 5.000000e-01 : f32
    %909 = vector.broadcast %cst_220 : f32 to vector<8x4xf32>
    %910 = arith.mulf %909, %908 : vector<8x4xf32>
    %911 = math.exp %910 : vector<8x4xf32>
    %912 = vector.extract_strided_slice %385 {offsets = [48, 0], sizes = [8, 4], strides = [1, 1]} : vector<64x4xf32> to vector<8x4xf32>
    %913 = arith.mulf %911, %912 : vector<8x4xf32>
    %914 = vector.extract_strided_slice %907 {offsets = [0, 0], sizes = [8, 4], strides = [1, 1]} : vector<8x8xf32> to vector<8x4xf32>
    %915 = arith.addf %913, %914 : vector<8x4xf32>
    %916 = arith.truncf %915 : vector<8x4xf32> to vector<8x4xbf16>
    %cst_221 = arith.constant dense<0.000000e+00> : vector<8x96xf32>
    %917 = tpu.matmul %916, %379, %cst_221 {dimension_numbers = #tpu.dot_dimension_numbers<[1], [0], [0], [1], [0, 0, 1, 1], [], []>} : vector<8x4xbf16>, vector<4x96xbf16>, vector<8x96xf32> -> vector<8x96xf32>
    %918 = vector.extract_strided_slice %917 {offsets = [0, 0], sizes = [8, 64], strides = [1, 1]} : vector<8x96xf32> to vector<8x64xf32>
    %919 = arith.truncf %867 : vector<8x32xf32> to vector<8x32xbf16>
    %cst_222 = arith.constant dense<0.000000e+00> : vector<8x64xf32>
    %920 = tpu.matmul %919, %380, %cst_222 {dimension_numbers = #tpu.dot_dimension_numbers<[1], [0], [0], [1], [0, 0, 1, 1], [], []>} : vector<8x32xbf16>, vector<32x64xbf16>, vector<8x64xf32> -> vector<8x64xf32>
    %921 = arith.addf %918, %920 : vector<8x64xf32>
    %922 = vector.broadcast %381 : vector<1x64xf32> to vector<8x64xf32>
    %923 = arith.addf %921, %922 : vector<8x64xf32>
    %924 = arith.negf %923 : vector<8x64xf32>
    %925 = math.exp %924 : vector<8x64xf32>
    %cst_223 = arith.constant 1.000000e+00 : f32
    %926 = vector.broadcast %cst_223 : f32 to vector<8x64xf32>
    %927 = arith.addf %926, %925 : vector<8x64xf32>
    %928 = arith.divf %926, %927 : vector<8x64xf32>
    %929 = vector.extract_strided_slice %928 {offsets = [0, 0], sizes = [8, 32], strides = [1, 1]} : vector<8x64xf32> to vector<8x32xf32>
    %930 = vector.extract_strided_slice %928 {offsets = [0, 32], sizes = [8, 32], strides = [1, 1]} : vector<8x64xf32> to vector<8x32xf32>
    %931 = vector.extract_strided_slice %917 {offsets = [0, 64], sizes = [8, 32], strides = [1, 1]} : vector<8x96xf32> to vector<8x32xf32>
    %932 = arith.mulf %929, %867 : vector<8x32xf32>
    %933 = arith.truncf %932 : vector<8x32xf32> to vector<8x32xbf16>
    %cst_224 = arith.constant dense<0.000000e+00> : vector<8x32xf32>
    %934 = tpu.matmul %933, %382, %cst_224 {dimension_numbers = #tpu.dot_dimension_numbers<[1], [0], [0], [1], [0, 0, 1, 1], [], []>} : vector<8x32xbf16>, vector<32x32xbf16>, vector<8x32xf32> -> vector<8x32xf32>
    %935 = arith.addf %931, %934 : vector<8x32xf32>
    %936 = vector.broadcast %383 : vector<1x32xf32> to vector<8x32xf32>
    %937 = arith.addf %935, %936 : vector<8x32xf32>
    %938 = math.tanh %937 : vector<8x32xf32>
    %939 = arith.mulf %930, %867 : vector<8x32xf32>
    %cst_225 = arith.constant 1.000000e+00 : f32
    %940 = vector.broadcast %cst_225 : f32 to vector<8x32xf32>
    %941 = arith.subf %940, %930 : vector<8x32xf32>
    %942 = arith.mulf %941, %938 : vector<8x32xf32>
    %943 = arith.addf %939, %942 : vector<8x32xf32>
    %cst_226 = arith.constant -5.000000e+00 : f32
    %cst_227 = arith.constant 5.000000e+00 : f32
    %944 = vector.broadcast %cst_226 : f32 to vector<8x32xf32>
    %945 = arith.maximumf %944, %943 : vector<8x32xf32>
    %946 = vector.broadcast %cst_227 : f32 to vector<8x32xf32>
    %947 = arith.minimumf %946, %945 : vector<8x32xf32>
    %948 = arith.truncf %947 : vector<8x32xf32> to vector<8x32xbf16>
    %cst_228 = arith.constant dense<0.000000e+00> : vector<8x104xf32>
    %949 = tpu.matmul %948, %384, %cst_228 {dimension_numbers = #tpu.dot_dimension_numbers<[1], [0], [0], [1], [0, 0, 1, 1], [], []>} : vector<8x32xbf16>, vector<32x104xbf16>, vector<8x104xf32> -> vector<8x104xf32>
    %950 = vector.extract_strided_slice %949 {offsets = [0, 0], sizes = [8, 8], strides = [1, 1]} : vector<8x104xf32> to vector<8x8xf32>
    %951 = vector.extract_strided_slice %372 {offsets = [56, 0], sizes = [8, 96], strides = [1, 1]} : vector<64x96xf32> to vector<8x96xf32>
    %952 = vector.extract_strided_slice %949 {offsets = [0, 8], sizes = [8, 96], strides = [1, 1]} : vector<8x104xf32> to vector<8x96xf32>
    %953 = arith.addf %951, %952 : vector<8x96xf32>
    %954 = vector.extract_strided_slice %953 {offsets = [0, 0], sizes = [8, 64], strides = [1, 1]} : vector<8x96xf32> to vector<8x64xf32>
    %955 = arith.truncf %903 : vector<8x32xf32> to vector<8x32xbf16>
    %cst_229 = arith.constant dense<0.000000e+00> : vector<8x64xf32>
    %956 = tpu.matmul %955, %373, %cst_229 {dimension_numbers = #tpu.dot_dimension_numbers<[1], [0], [0], [1], [0, 0, 1, 1], [], []>} : vector<8x32xbf16>, vector<32x64xbf16>, vector<8x64xf32> -> vector<8x64xf32>
    %957 = arith.addf %954, %956 : vector<8x64xf32>
    %958 = vector.broadcast %374 : vector<1x64xf32> to vector<8x64xf32>
    %959 = arith.addf %957, %958 : vector<8x64xf32>
    %960 = arith.negf %959 : vector<8x64xf32>
    %961 = math.exp %960 : vector<8x64xf32>
    %cst_230 = arith.constant 1.000000e+00 : f32
    %962 = vector.broadcast %cst_230 : f32 to vector<8x64xf32>
    %963 = arith.addf %962, %961 : vector<8x64xf32>
    %964 = arith.divf %962, %963 : vector<8x64xf32>
    %965 = vector.extract_strided_slice %964 {offsets = [0, 0], sizes = [8, 32], strides = [1, 1]} : vector<8x64xf32> to vector<8x32xf32>
    %966 = vector.extract_strided_slice %964 {offsets = [0, 32], sizes = [8, 32], strides = [1, 1]} : vector<8x64xf32> to vector<8x32xf32>
    %967 = vector.extract_strided_slice %953 {offsets = [0, 64], sizes = [8, 32], strides = [1, 1]} : vector<8x96xf32> to vector<8x32xf32>
    %968 = arith.mulf %965, %903 : vector<8x32xf32>
    %969 = arith.truncf %968 : vector<8x32xf32> to vector<8x32xbf16>
    %cst_231 = arith.constant dense<0.000000e+00> : vector<8x32xf32>
    %970 = tpu.matmul %969, %375, %cst_231 {dimension_numbers = #tpu.dot_dimension_numbers<[1], [0], [0], [1], [0, 0, 1, 1], [], []>} : vector<8x32xbf16>, vector<32x32xbf16>, vector<8x32xf32> -> vector<8x32xf32>
    %971 = arith.addf %967, %970 : vector<8x32xf32>
    %972 = vector.broadcast %376 : vector<1x32xf32> to vector<8x32xf32>
    %973 = arith.addf %971, %972 : vector<8x32xf32>
    %974 = math.tanh %973 : vector<8x32xf32>
    %975 = arith.mulf %966, %903 : vector<8x32xf32>
    %cst_232 = arith.constant 1.000000e+00 : f32
    %976 = vector.broadcast %cst_232 : f32 to vector<8x32xf32>
    %977 = arith.subf %976, %966 : vector<8x32xf32>
    %978 = arith.mulf %977, %974 : vector<8x32xf32>
    %979 = arith.addf %975, %978 : vector<8x32xf32>
    %cst_233 = arith.constant -5.000000e+00 : f32
    %cst_234 = arith.constant 5.000000e+00 : f32
    %980 = vector.broadcast %cst_233 : f32 to vector<8x32xf32>
    %981 = arith.maximumf %980, %979 : vector<8x32xf32>
    %982 = vector.broadcast %cst_234 : f32 to vector<8x32xf32>
    %983 = arith.minimumf %982, %981 : vector<8x32xf32>
    %984 = arith.truncf %983 : vector<8x32xf32> to vector<8x32xbf16>
    %cst_235 = arith.constant dense<0.000000e+00> : vector<8x8xf32>
    %985 = tpu.matmul %984, %377, %cst_235 {dimension_numbers = #tpu.dot_dimension_numbers<[1], [0], [0], [1], [0, 0, 1, 1], [], []>} : vector<8x32xbf16>, vector<32x8xbf16>, vector<8x8xf32> -> vector<8x8xf32>
    %986 = vector.broadcast %378 : vector<1x8xf32> to vector<8x8xf32>
    %987 = arith.addf %985, %986 : vector<8x8xf32>
    %988 = vector.extract_strided_slice %987 {offsets = [0, 4], sizes = [8, 4], strides = [1, 1]} : vector<8x8xf32> to vector<8x4xf32>
    %cst_236 = arith.constant 5.000000e-01 : f32
    %989 = vector.broadcast %cst_236 : f32 to vector<8x4xf32>
    %990 = arith.mulf %989, %988 : vector<8x4xf32>
    %991 = math.exp %990 : vector<8x4xf32>
    %992 = vector.extract_strided_slice %385 {offsets = [56, 0], sizes = [8, 4], strides = [1, 1]} : vector<64x4xf32> to vector<8x4xf32>
    %993 = arith.mulf %991, %992 : vector<8x4xf32>
    %994 = vector.extract_strided_slice %987 {offsets = [0, 0], sizes = [8, 4], strides = [1, 1]} : vector<8x8xf32> to vector<8x4xf32>
    %995 = arith.addf %993, %994 : vector<8x4xf32>
    %996 = arith.truncf %995 : vector<8x4xf32> to vector<8x4xbf16>
    %cst_237 = arith.constant dense<0.000000e+00> : vector<8x96xf32>
    %997 = tpu.matmul %996, %379, %cst_237 {dimension_numbers = #tpu.dot_dimension_numbers<[1], [0], [0], [1], [0, 0, 1, 1], [], []>} : vector<8x4xbf16>, vector<4x96xbf16>, vector<8x96xf32> -> vector<8x96xf32>
    %998 = vector.extract_strided_slice %997 {offsets = [0, 0], sizes = [8, 64], strides = [1, 1]} : vector<8x96xf32> to vector<8x64xf32>
    %999 = arith.truncf %947 : vector<8x32xf32> to vector<8x32xbf16>
    %cst_238 = arith.constant dense<0.000000e+00> : vector<8x64xf32>
    %1000 = tpu.matmul %999, %380, %cst_238 {dimension_numbers = #tpu.dot_dimension_numbers<[1], [0], [0], [1], [0, 0, 1, 1], [], []>} : vector<8x32xbf16>, vector<32x64xbf16>, vector<8x64xf32> -> vector<8x64xf32>
    %1001 = arith.addf %998, %1000 : vector<8x64xf32>
    %1002 = vector.broadcast %381 : vector<1x64xf32> to vector<8x64xf32>
    %1003 = arith.addf %1001, %1002 : vector<8x64xf32>
    %1004 = arith.negf %1003 : vector<8x64xf32>
    %1005 = math.exp %1004 : vector<8x64xf32>
    %cst_239 = arith.constant 1.000000e+00 : f32
    %1006 = vector.broadcast %cst_239 : f32 to vector<8x64xf32>
    %1007 = arith.addf %1006, %1005 : vector<8x64xf32>
    %1008 = arith.divf %1006, %1007 : vector<8x64xf32>
    %1009 = vector.extract_strided_slice %1008 {offsets = [0, 0], sizes = [8, 32], strides = [1, 1]} : vector<8x64xf32> to vector<8x32xf32>
    %1010 = vector.extract_strided_slice %1008 {offsets = [0, 32], sizes = [8, 32], strides = [1, 1]} : vector<8x64xf32> to vector<8x32xf32>
    %1011 = vector.extract_strided_slice %997 {offsets = [0, 64], sizes = [8, 32], strides = [1, 1]} : vector<8x96xf32> to vector<8x32xf32>
    %1012 = arith.mulf %1009, %947 : vector<8x32xf32>
    %1013 = arith.truncf %1012 : vector<8x32xf32> to vector<8x32xbf16>
    %cst_240 = arith.constant dense<0.000000e+00> : vector<8x32xf32>
    %1014 = tpu.matmul %1013, %382, %cst_240 {dimension_numbers = #tpu.dot_dimension_numbers<[1], [0], [0], [1], [0, 0, 1, 1], [], []>} : vector<8x32xbf16>, vector<32x32xbf16>, vector<8x32xf32> -> vector<8x32xf32>
    %1015 = arith.addf %1011, %1014 : vector<8x32xf32>
    %1016 = vector.broadcast %383 : vector<1x32xf32> to vector<8x32xf32>
    %1017 = arith.addf %1015, %1016 : vector<8x32xf32>
    %1018 = math.tanh %1017 : vector<8x32xf32>
    %1019 = arith.mulf %1010, %947 : vector<8x32xf32>
    %cst_241 = arith.constant 1.000000e+00 : f32
    %1020 = vector.broadcast %cst_241 : f32 to vector<8x32xf32>
    %1021 = arith.subf %1020, %1010 : vector<8x32xf32>
    %1022 = arith.mulf %1021, %1018 : vector<8x32xf32>
    %1023 = arith.addf %1019, %1022 : vector<8x32xf32>
    %cst_242 = arith.constant -5.000000e+00 : f32
    %cst_243 = arith.constant 5.000000e+00 : f32
    %1024 = vector.broadcast %cst_242 : f32 to vector<8x32xf32>
    %1025 = arith.maximumf %1024, %1023 : vector<8x32xf32>
    %1026 = vector.broadcast %cst_243 : f32 to vector<8x32xf32>
    %1027 = arith.minimumf %1026, %1025 : vector<8x32xf32>
    %1028 = arith.truncf %1027 : vector<8x32xf32> to vector<8x32xbf16>
    %cst_244 = arith.constant dense<0.000000e+00> : vector<8x104xf32>
    %1029 = tpu.matmul %1028, %384, %cst_244 {dimension_numbers = #tpu.dot_dimension_numbers<[1], [0], [0], [1], [0, 0, 1, 1], [], []>} : vector<8x32xbf16>, vector<32x104xbf16>, vector<8x104xf32> -> vector<8x104xf32>
    %1030 = vector.extract_strided_slice %1029 {offsets = [0, 0], sizes = [8, 8], strides = [1, 1]} : vector<8x104xf32> to vector<8x8xf32>
    %1031 = tpu.concatenate %470, %550, %630, %710, %790, %870, %950, %1030 in 0 : vector<8x8xf32>, vector<8x8xf32>, vector<8x8xf32>, vector<8x8xf32>, vector<8x8xf32>, vector<8x8xf32>, vector<8x8xf32>, vector<8x8xf32> -> vector<64x8xf32>
    %1032 = tpu.concatenate %435, %515, %595, %675, %755, %835, %915, %995 in 0 : vector<8x4xf32>, vector<8x4xf32>, vector<8x4xf32>, vector<8x4xf32>, vector<8x4xf32>, vector<8x4xf32>, vector<8x4xf32>, vector<8x4xf32> -> vector<64x4xf32>
    %c0_245 = arith.constant 0 : index
    %c0_246 = arith.constant 0 : index
    %1033 = vector.load %arg24[%c0_245, %c0_246] : memref<8x16xbf16, #tpu.memory_space<vmem>>, vector<8x16xbf16>
    %1034 = arith.truncf %1031 : vector<64x8xf32> to vector<64x8xbf16>
    %cst_247 = arith.constant dense<0.000000e+00> : vector<64x16xf32>
    %1035 = tpu.matmul %1034, %1033, %cst_247 {dimension_numbers = #tpu.dot_dimension_numbers<[1], [0], [0], [1], [0, 0, 1, 1], [], []>} : vector<64x8xbf16>, vector<8x16xbf16>, vector<64x16xf32> -> vector<64x16xf32>
    %c0_248 = arith.constant 0 : index
    %c0_249 = arith.constant 0 : index
    %1036 = vector.load %arg25[%c0_248, %c0_249] : memref<1x16xf32, #tpu.memory_space<vmem>>, vector<1x16xf32>
    %1037 = vector.broadcast %1036 : vector<1x16xf32> to vector<64x16xf32>
    %1038 = arith.addf %1035, %1037 : vector<64x16xf32>
    %1039 = math.exp %1038 : vector<64x16xf32>
    %cst_250 = arith.constant 0.000000e+00 : f32
    %1040 = vector.broadcast %cst_250 : f32 to vector<64x100xf32>
    %1041 = tpu.concatenate %1039, %1031, %1032, %1040 in 1 : vector<64x16xf32>, vector<64x8xf32>, vector<64x4xf32>, vector<64x100xf32> -> vector<64x128xf32>
    %c0_251 = arith.constant 0 : index
    %c0_252 = arith.constant 0 : index
    %1042 = vector.load %arg26[%c0_251, %c0_252] : memref<64x128xf32, #tpu.memory_space<vmem>>, vector<64x128xf32>
    tpu.vector_store %arg26[%c0_251, %c0_252], %1041 {strides = array<i32>} : memref<64x128xf32, #tpu.memory_space<vmem>>, vector<64x128xf32>,
    return
  }
}

</mosaic_0001>

<bundles_post_ra>
// kernel: lfads_multisession_forward.1
= control target key start
LH: loop header
LB: loop body
LE: loop exit
PB: predicated region body
PF: predicated region fallthrough
CT: control target
= control target key end

     0   :  { %s8811_s0 = inlined_call_operand.vmem [shape: f32[64,32], index: 0, kind: input, shape index: {}]   ;;  %s8812_s1 = inlined_call_operand.vmem [shape: f32[8,32], index: 1, kind: input, shape index: {}]   ;;  %s8813_s2 = inlined_call_operand.vmem [shape: f32[64,4], index: 2, kind: input, shape index: {}]   ;;  %s8814_s3 = inlined_call_operand.vmem [shape: bf16[32,384], index: 3, kind: input, shape index: {}]   ;;  %s8815_s4 = inlined_call_operand.vmem [shape: f32[1,384], index: 4, kind: input, shape index: {}]   ;;  %s8816_s5 = inlined_call_operand.vmem [shape: bf16[128,384], index: 5, kind: input, shape index: {}]   ;;  %s8817_s6 = inlined_call_operand.vmem [shape: f32[1,384], index: 6, kind: input, shape index: {}]   ;;  %s8818_s7 = inlined_call_operand.vmem [shape: f32[1,128], index: 7, kind: input, shape index: {}]   ;;  %s8819_s8 = inlined_call_operand.vmem [shape: f32[1,32], index: 8, kind: input, shape index: {}]   ;;  %s8820_s9 = inlined_call_operand.vmem [shape: bf16[64,64], index: 9, kind: input, shape index: {}]   ;;  %s8821_s10 = inlined_call_operand.vmem [shape: f32[1,64], index: 10, kind: input, shape index: {}]   ;;  %s8822_s11 = inlined_call_operand.vmem [shape: bf16[64,96], index: 11, kind: input, shape index: {}]   ;;  %s8823_s12 = inlined_call_operand.vmem [shape: bf16[32,64], index: 12, kind: input, shape index: {}]   ;;  %s8824_s13 = inlined_call_operand.vmem [shape: f32[1,64], index: 13, kind: input, shape index: {}]   ;;  %s8825_s14 = inlined_call_operand.vmem [shape: bf16[32,32], index: 14, kind: input, shape index: {}]   ;;  %s8826_s15 = inlined_call_operand.vmem [shape: f32[1,32], index: 15, kind: input, shape index: {}]   ;;  %s8827_s16 = inlined_call_operand.vmem [shape: bf16[32,8], index: 16, kind: input, shape index: {}]   ;;  %s8828_s17 = inlined_call_operand.hbm [shape: f32[1,8], index: 17, kind: input, shape index: {}]   ;;  %s8829_s18 = inlined_call_operand.hbm [shape: bf16[4,96], index: 18, kind: input, shape index: {}]   ;;  %s8830_s19 = inlined_call_operand.hbm [shape: bf16[32,64], index: 19, kind: input, shape index: {}]   ;;  %s8831_s20 = inlined_call_operand.vmem [shape: f32[1,64], index: 20, kind: input, shape index: {}]   ;;  %s8832_s21 = inlined_call_operand.hbm [shape: bf16[32,32], index: 21, kind: input, shape index: {}]   ;;  %s8833_s22 = inlined_call_operand.hbm [shape: f32[1,32], index: 22, kind: input, shape index: {}]   ;;  %s8834_s23 = inlined_call_operand.hbm [shape: bf16[32,104], index: 23, kind: input, shape index: {}]   ;;  %s8835_s24 = inlined_call_operand.vmem [shape: bf16[8,16], index: 24, kind: input, shape index: {}]   ;;  %s8836_s25 = inlined_call_operand.vmem [shape: f32[1,16], index: 25, kind: input, shape index: {}]   ;;  %s8837_s26 = inlined_call_operand.vmem [shape: f32[64,128], index: 26, kind: output, shape index: {}]  }
   0x1   :  { %8848 = sst [smem:[#allocation25_spill]] %s8811_s0 }
   0x2   :  { %8849 = sst [smem:[#allocation26_spill]] %s8812_s1 }
   0x3   :  { %8850 = sst [smem:[#allocation27_spill]] %s8813_s2 }
   0x4   :  { %8851 = sst [smem:[#allocation28_spill]] %s8814_s3 }
   0x5   :  { %8852 = sst [smem:[#allocation29_spill]] %s8815_s4 }
   0x6   :  { %8853 = sst [smem:[#allocation30_spill]] %s8816_s5 }
   0x7   :  { %8854 = sst [smem:[#allocation31_spill]] %s8817_s6 }
   0x8   :  { %8855 = sst [smem:[#allocation32_spill]] %s8818_s7 }
   0x9   :  { %8856 = sst [smem:[#allocation33_spill]] %s8819_s8 }
   0xa   :  { %8857 = sst [smem:[#allocation34_spill]] %s8820_s9 }
   0xb   :  { %8858 = sst [smem:[#allocation35_spill]] %s8821_s10 }
   0xc   :  { %31 = vsyncpa [#allocation3], 0 }
   0xd   :  { %32 = vsyncpa [#allocation5], 0 }
   0xe   :  { %33 = vsyncpa [#allocation8], 0 }
   0xf   :  { %34 = vsyncpa [#allocation11], 0  ;;  %s6806_s27 = smov [#allocation4]   ;;  %s6666_s8 = scalar_lea.hbm %s8829_s18, 32 }
  0x10   :  { %s85_s3 = sshll.u32 %s6806_s27, 4  ;;  %p6667_p0 = scmp.ne.s32.totalorder %s8829_s18, %s6666_s8  ;;  %s86_s3 = int_to_ptr.vmem [resolvable:$true] %s85_s3 }
  0x11   :  { %p6670_p1 = scmp.lt.u32.totalorder %s6666_s8, %s8829_s18 }
  0x13   :  { %p6672_p2 = pnand %p6670_p1, %p6667_p0 }
  0x15   :  { %6675 = shalt.err (!%p6672_p2)
}
  0x16   :  { %s6676_s30 = scalar_lea.vmem %s86_s3, 32  ;;  %p6681_p4 = scmp.lt.s32.totalorder %s86_s3, %s86_s3 }
  0x17   :  { %p6677_p3 = scmp.ne.s32.totalorder %s86_s3, %s6676_s30  ;;  %p6682_p5 = scmp.lt.s32.totalorder %s6676_s30, %s6676_s30 }
  0x19   :  { %p6683_p6 = por %p6682_p5, %p6681_p4 }
  0x1b   :  { %p6684_p7 = pnand %p6683_p6, %p6677_p3 }
  0x1d   :  { %6687 = shalt.err (!%p6684_p7)
}
  0x1e   :  { %88 = dma.hbm_to_vmem [thread:$0]  %s8829_s18, 32, %s86_s3, [#allocation5]  }
  0x1f   :  { %s6807_s10 = smov [#allocation7]   ;;  %s6808_s1 = smov [#allocation2]  }
  0x20   :  { %s108_s6 = sshll.u32 %s6807_s10, 4  ;;  %s75_s27 = sshll.u32 %s6808_s1, 4  ;;  %s109_s6 = int_to_ptr.vmem [resolvable:$true] %s108_s6  ;;  %s76_s27 = int_to_ptr.vmem [resolvable:$true] %s75_s27 }
  0x21   :  { %s6688_s8 = scalar_lea.hbm %s8832_s21, 256 }
  0x22   :  { %p6689_p8 = scmp.ne.s32.totalorder %s8832_s21, %s6688_s8  ;;  %p6692_p9 = scmp.lt.u32.totalorder %s6688_s8, %s8832_s21 }
  0x24   :  { %p6694_p10 = pnand %p6692_p9, %p6689_p8 }
  0x26   :  { %6697 = shalt.err (!%p6694_p10)
}
  0x27   :  { %s6698_s18 = scalar_lea.vmem %s109_s6, 256  ;;  %p6703_p12 = scmp.lt.s32.totalorder %s109_s6, %s109_s6 }
  0x28   :  { %p6699_p11 = scmp.ne.s32.totalorder %s109_s6, %s6698_s18  ;;  %p6704_p13 = scmp.lt.s32.totalorder %s6698_s18, %s6698_s18 }
  0x2a   :  { %p6705_p0 = por %p6704_p13, %p6703_p12 }
  0x2c   :  { %p6706_p1 = pnand %p6705_p0, %p6699_p11 }
  0x2e   :  { %6709 = shalt.err (!%p6706_p1)
}
  0x2f   :  { %s6809_s3 = smov 64   ;;  %s6810_s30 = smov 4  }
  0x30   :  { %114 = dma.hbm_to_vmem [thread:$0]  %s8832_s21, 256, %s109_s6, [#allocation8], %s6809_s3, %s6809_s3, %s6810_s30  }
  0x31   :  { %s6710_s7 = scalar_lea.hbm %s8828_s17, 16 }
  0x32   :  { %p6711_p2 = scmp.ne.s32.totalorder %s8828_s17, %s6710_s7  ;;  %p6714_p3 = scmp.lt.u32.totalorder %s6710_s7, %s8828_s17 }
  0x34   :  { %p6716_p4 = pnand %p6714_p3, %p6711_p2 }
  0x36   :  { %6719 = shalt.err (!%p6716_p4)
}
  0x37   :  { %s6720_s0 = scalar_lea.vmem %s76_s27, 16  ;;  %s6724_s9 = scalar_lea.vmem %s76_s27, 32 }
  0x38   :  { %p6721_p5 = scmp.ne.s32.totalorder %s76_s27, %s6720_s0  ;;  %p6725_p6 = scmp.lt.s32.totalorder %s76_s27, %s76_s27 }
  0x39   :  { %p6726_p7 = scmp.lt.s32.totalorder %s6724_s9, %s6720_s0 }
  0x3b   :  { %p6727_p8 = por %p6726_p7, %p6725_p6 }
  0x3d   :  { %p6728_p9 = pnand %p6727_p8, %p6721_p5 }
  0x3f   :  { %6731 = shalt.err (!%p6728_p9)
}
  0x40   :  { %78 = dma.hbm_to_vmem [thread:$0]  %s8828_s17, 16, %s76_s27, [#allocation3]  }
  0x41   :  { %s6811_s18 = smov [#allocation6]   ;;  %s6812_s5 = smov [#allocation9]  }
  0x42   :  { %s94_s2 = sshll.u32 %s6811_s18, 4  ;;  %s121_s10 = sshll.u32 %s6812_s5, 4  ;;  %s95_s2 = int_to_ptr.vmem [resolvable:$true] %s94_s2  ;;  %s122_s10 = int_to_ptr.vmem [resolvable:$true] %s121_s10 }
  0x43   :  { %s6732_s28 = scalar_lea.hbm %s8830_s19, 256 }
  0x44   :  { %p6733_p10 = scmp.ne.s32.totalorder %s8830_s19, %s6732_s28  ;;  %p6736_p11 = scmp.lt.u32.totalorder %s6732_s28, %s8830_s19 }
  0x46   :  { %p6738_p12 = pnand %p6736_p11, %p6733_p10 }
  0x48   :  { %6741 = shalt.err (!%p6738_p12)
}
  0x49   :  { %s6742_s17 = scalar_lea.vmem %s95_s2, 256  ;;  %p6747_p0 = scmp.lt.s32.totalorder %s95_s2, %s95_s2 }
  0x4a   :  { %p6743_p13 = scmp.ne.s32.totalorder %s95_s2, %s6742_s17  ;;  %p6748_p1 = scmp.lt.s32.totalorder %s6742_s17, %s6742_s17 }
  0x4c   :  { %p6749_p2 = por %p6748_p1, %p6747_p0 }
  0x4e   :  { %p6750_p3 = pnand %p6749_p2, %p6743_p13 }
  0x50   :  { %6753 = shalt.err (!%p6750_p3)
}
  0x51   :  { %100 = dma.hbm_to_vmem [thread:$0]  %s8830_s19, 256, %s95_s2, [#allocation5], %s6809_s3, %s6809_s3, %s6810_s30  }
  0x52   :  { %s6754_s18 = scalar_lea.hbm %s8833_s22, 16 }
  0x53   :  { %p6755_p4 = scmp.ne.s32.totalorder %s8833_s22, %s6754_s18  ;;  %p6758_p5 = scmp.lt.u32.totalorder %s6754_s18, %s8833_s22 }
  0x55   :  { %p6760_p6 = pnand %p6758_p5, %p6755_p4 }
  0x57   :  { %6763 = shalt.err (!%p6760_p6)
}
  0x58   :  { %s6764_s8 = scalar_lea.vmem %s122_s10, 16  ;;  %s6768_s4 = scalar_lea.vmem %s122_s10, 32 }
  0x59   :  { %p6765_p7 = scmp.ne.s32.totalorder %s122_s10, %s6764_s8  ;;  %p6769_p8 = scmp.lt.s32.totalorder %s122_s10, %s122_s10 }
  0x5a   :  { %p6770_p9 = scmp.lt.s32.totalorder %s6768_s4, %s6764_s8 }
  0x5c   :  { %p6771_p10 = por %p6770_p9, %p6769_p8 }
  0x5e   :  { %p6772_p11 = pnand %p6771_p10, %p6765_p7 }
  0x60   :  { %6775 = shalt.err (!%p6772_p11)
}
  0x61   :  { %124 = dma.hbm_to_vmem [thread:$0]  %s8833_s22, 16, %s122_s10, [#allocation8]  }
  0x62   :  { %s6813_s29 = smov [#allocation10]   ;;  %s6776_s9 = scalar_lea.hbm %s8834_s23, 256 }
  0x63   :  { %s130_s0 = sshll.u32 %s6813_s29, 4  ;;  %p6777_p12 = scmp.ne.s32.totalorder %s8834_s23, %s6776_s9  ;;  %s131_s0 = int_to_ptr.vmem [resolvable:$true] %s130_s0 }
  0x64   :  { %p6780_p13 = scmp.lt.u32.totalorder %s6776_s9, %s8834_s23 }
  0x66   :  { %p6782_p0 = pnand %p6780_p13, %p6777_p12 }
  0x68   :  { %6785 = shalt.err (!%p6782_p0)
}
  0x69   :  { %s6786_s1 = scalar_lea.vmem %s131_s0, 256  ;;  %p6791_p2 = scmp.lt.s32.totalorder %s131_s0, %s131_s0 }
  0x6a   :  { %p6787_p1 = scmp.ne.s32.totalorder %s131_s0, %s6786_s1  ;;  %p6792_p3 = scmp.lt.s32.totalorder %s6786_s1, %s6786_s1 }
  0x6c   :  { %p6793_p4 = por %p6792_p3, %p6791_p2 }
  0x6e   :  { %p6794_p5 = pnand %p6793_p4, %p6787_p1 }
  0x70   :  { %6797 = shalt.err (!%p6794_p5)
}
  0x71   :  { %136 = dma.hbm_to_vmem [thread:$0]  %s8834_s23, 256, %s131_s0, [#allocation11], %s6809_s3, %s6809_s3, %s6810_s30  }
  0x72   :  { %6798 = dma.done.wait [#allocation3], 16  }
  0x73   :  { %6799 = vsyncadd [#allocation3], 4294967280 }
  0x74   :  { %6800 = dma.done.wait [#allocation5], 288  }
  0x75   :  { %6801 = vsyncadd [#allocation5], 4294967008 }
  0x76   :  { %6802 = dma.done.wait [#allocation8], 272  }
  0x77   :  { %6803 = vsyncadd [#allocation8], 4294967024 }
  0x78   :  { %6804 = dma.done.wait [#allocation11], 256  }
  0x79   :  { %6805 = vsyncadd [#allocation11], 4294967040  ;;  %v8843_v0 = vmov 0   ;;  %s8859_s8 = sld [smem:[#allocation28_spill]]  ;;  %s8860_s9 = sld [smem:[#allocation25_spill]]  ;;  %vm229_vm0 = vcmask 261120   ;;  %v182_v46 = vlaneseq }
  0x7a   :  { %274 = vmatprep.mubr.bf16.mxu0 %v8843_v0  ;;  %s8861_s1 = sld [smem:[#allocation30_spill]]  ;;  %v8845_v25 = vmov 0.0   ;;  %s8862_s19 = sld [smem:[#allocation32_spill]]  ;;  %vm6816_vm1 = vmmov 0   ;;  %vm1451_vm2 = vcmask 523264   ;;  %vm2036_vm3 = vcmask 1041408  }
  0x7b   :  { %v7292_v47 = vshrl.u32 %v182_v46, 7  ;;  %s8863_s18 = sld [smem:[#allocation29_spill]]  ;;  %s8871_s10 = sld [smem:[#allocation31_spill]]  ;;  %vm2032_vm4 = vcmask 31744   ;;  %vm5013_vm5 = vcmask 1043456   ;;  %vm5000_vm6 = vcmask 64512  }
  0x7c   :  { %s8883_s6 = sld [smem:[#allocation34_spill]]  ;;  %s6817_s4 = smov 96   ;;  %vm5155_vm7 = vcmask 130048   ;;  %vm5164_vm8 = vcmask 195584   ;;  %vm5173_vm9 = vcmask 228352  }
  0x7d   :  { %v184_v48 = vsub.s32 0, %v7292_v47  ;;  %v188_v50 = vsub.s32 1, %v7292_v47  ;;  %v8847_v59 = vsub.s32 2, %v7292_v47  ;;  %s8887_s23 = sld [smem:[#allocation26_spill]]  ;;  %s6818_s2 = smov 32  }
  0x7e   :  { %s8888_s22 = sld [smem:[#allocation35_spill]]  ;;  %s6819_s29 = smov 120  }
  0x7f   :  { %v6355_v1 = vld [vmem:[%s8859_s8 + $0x4] ss:$12 sps:$4 sm:$0xff]   ;;  %v6357_v2 = vld [vmem:[%s8859_s8] ss:$12 sps:$4 sm:$0xff]   ;;  %v6358_v3 = vld [vmem:[%s8859_s8 + $0x1c] ss:$12 sps:$4 sm:$0xff]  }
  0x80   :  { %242 = vmatprep.subr.bf16.mxu0 %v6355_v1  ;;  %v6360_v4 = vld [vmem:[%s8859_s8 + $0x18] ss:$12 sps:$4 sm:$0xff]   ;;  %v161_v6 = vld [vmem:[%s8860_s9 + $0x8] sm:$0xff]  ;;  %v162_v12 = vld [vmem:[%s8860_s9 + $0x10] sm:$0xff]  ;;  %s8890_s7 = sld [smem:[#allocation27_spill]]  ;;  %s6820_s28 = smov 124  }
  0x81   :  { %v160_v5 = vld [vmem:[%s8860_s9] sm:$0xff]  ;;  %243 = vmatpush1.bf16.msra.mxu0 %v6357_v2  ;;  %v7073_v10 = vld [vmem:[%s8861_s1 + $0x1c] ss:$12 sps:$4 sm:$0xff]   ;;  %v7111_v19 = vld [vmem:[%s8861_s1 + $0x4c] ss:$12 sps:$4 sm:$0xff]  }
  0x82   :  { %244 = vmatprep.subr.bf16.mxu0 %v6358_v3  ;;  %v176_v7 = vpack.c.bf16 %v161_v6, %v160_v5  ;;  %v7061_v8 = vld [vmem:[%s8861_s1 + $0x4] ss:$12 sps:$4 sm:$0xff]   ;;  %v7067_v9 = vld [vmem:[%s8861_s1] ss:$12 sps:$4 sm:$0xff]   ;;  %v163_v13 = vld [vmem:[%s8860_s9 + $0x18] sm:$0xff] }
  0x83   :  { %v7078_v11 = vld [vmem:[%s8861_s1 + $0x18] ss:$12 sps:$4 sm:$0xff]   ;;  %v7092_v14 = vld [vmem:[%s8861_s1 + $0x34] ss:$12 sps:$4 sm:$0xff]   ;;  %v177_v16 = vpack.c.bf16 %v163_v13, %v162_v12  ;;  %v7105_v18 = vld [vmem:[%s8861_s1 + $0x30] ss:$12 sps:$4 sm:$0xff]  }
  0x84   :  { %5651 = vmatprep.mubr.msk.bf16.mxu1 %vm229_vm0, %v176_v7  ;;  %v6376_v15 = vld [vmem:[%s8859_s8 + $0x8] ss:$12 sps:$4 sm:$0xff]   ;;  %v6380_v17 = vld [vmem:[%s8859_s8 + $0x20] ss:$12 sps:$4 sm:$0xff]   ;;  %v7130_v23 = vld [vmem:[%s8861_s1 + $0x64] ss:$12 sps:$4 sm:$0xff]  }
  0x85   :  { %245 = vmatpush1.bf16.msra.mxu0 %v6360_v4  ;;  %5647 = vmatprep.subr.bf16.mxu1 %v6376_v15  ;;  %v7116_v20 = vld [vmem:[%s8861_s1 + $0x48] ss:$12 sps:$4 sm:$0xff]   ;;  %v164_v21 = vld [vmem:[%s8860_s9 + $0x20] sm:$0xff]  ;;  %v167_v32 = vld [vmem:[%s8860_s9 + $0x38] sm:$0xff] }
  0x86   :  { %565 = vmatprep.subr.bf16.mxu0 %v7061_v8  ;;  %5648 = vmatpush3.bf16.msra.mxu1 %v6376_v15  ;;  %v165_v22 = vld [vmem:[%s8860_s9 + $0x28] sm:$0xff]  ;;  %v166_v29 = vld [vmem:[%s8860_s9 + $0x30] sm:$0xff]  ;;  %v7164_v31 = vld [vmem:[%s8861_s1 + $0x78] ss:$12 sps:$4 sm:$0xff]  }
  0x87   :  { %5649 = vmatprep.subr.bf16.mxu1 %v6380_v17  ;;  %v7136_v24 = vld [vmem:[%s8861_s1 + $0x8] ss:$12 sps:$4 sm:$0xff]   ;;  %v178_v26 = vpack.c.bf16 %v165_v22, %v164_v21  ;;  %v7142_v27 = vld [vmem:[%s8861_s1 + $0x60] ss:$12 sps:$4 sm:$0xff]   ;;  %v7180_v34 = vld [vmem:[%s8861_s1 + $0x38] ss:$12 sps:$4 sm:$0xff]   ;;  %v179_v35 = vpack.c.bf16 %v167_v32, %v166_v29 }
  0x88   :  { %5204 = vmatmul.mubr.msk.bf16.vlgmr.msra.gmra.mrb[0].mxu0 %vm229_vm0, %v176_v7  ;;  %v7148_v28 = vld [vmem:[%s8861_s1 + $0x7c] ss:$12 sps:$4 sm:$0xff]   ;;  %v7159_v30 = vld [vmem:[%s8861_s1 + $0x20] ss:$12 sps:$4 sm:$0xff]   ;;  %v7247_v44 = vld [vmem:[%s8861_s1 + $0x98] ss:$12 sps:$4 sm:$0xff]  }
  0x89   :  { %566 = vmatpush1.bf16.msra.mxu0 %v7067_v9  ;;  %284 = vmatprep.mubr.bf16.mxu0 %v8843_v0  ;;  %v7175_v33 = vld [vmem:[%s8861_s1 + $0x94] ss:$12 sps:$4 sm:$0xff]   ;;  %v7189_v36 = vld [vmem:[%s8861_s1 + $0x90] ss:$12 sps:$4 sm:$0xff]   ;;  %v7195_v37 = vld [vmem:[%s8861_s1 + $0xac] ss:$12 sps:$4 sm:$0xff]  }
  0x8a   :  { %567 = vmatprep.subr.bf16.mxu0 %v7073_v10  ;;  %5650 = vmatpush3.bf16.msra.mxu1 %v6380_v17  ;;  %v7200_v38 = vld [vmem:[%s8861_s1 + $0x50] ss:$12 sps:$4 sm:$0xff]   ;;  %v7209_v39 = vld [vmem:[%s8861_s1 + $0xa8] ss:$12 sps:$4 sm:$0xff]   ;;  %v7214_v40 = vld [vmem:[%s8862_s19] ss:$0 sm:$0xff] }
  0x8b   :  { %5659 = vmatprep.subr.bf16.mxu1 %v8845_v25  ;;  %v7223_v41 = vld [vmem:[%s8861_s1 + $0x68] ss:$12 sps:$4 sm:$0xff]   ;;  %v420_v42 = vpack.c.bf16 %v7214_v40, %v7214_v40  ;;  %v7237_v43 = vld [vmem:[%s8861_s1 + $0x80] ss:$12 sps:$4 sm:$0xff]   ;;  %v7256_v45 = vld [vmem:[%s8861_s1 + $0xb0] ss:$12 sps:$4 sm:$0xff]  }
  0x8c   :  { %v180_v49 = vld [vmem:[%s8863_s18] sm:$0x7] }
  0x8d   :  { %568 = vmatpush1.bf16.msra.mxu0 %v7078_v11  ;;  %5652 = vmatmul.mubr.msk.bf16.vlgmr.msra.gmra.mrb[0].mxu1 %vm229_vm0, %v177_v16  ;;  %v185_v52 = vrot.slane %v180_v49, %v184_v48  ;;  %v189_v54 = vrot.slane %v180_v49, %v188_v50  ;;  %v7310_v2 = vrot.slane %v180_v49, %v8847_v59 }
  0x8e   :  { %569 = vmatprep.subr.bf16.mxu0 %v7092_v14  ;;  %5660 = vmatpush3.bf16.msra.mxu1 %v7136_v24 }
  0x8f   :  { %5661 = vmatprep.subr.bf16.mxu1 %v8845_v25  ;;  %5655 = vmatprep.mubr.msk.bf16.mxu1 %vm229_vm0, %v178_v26 }
  0x90   :  { %5205 = vmatmul.mubr.msk.bf16.gmra.mrb[4].mxu0 %vm229_vm0, %v177_v16 }
  0x91   :  { %570 = vmatpush1.bf16.msra.mxu0 %v7105_v18  ;;  %294 = vmatprep.mubr.bf16.mxu0 %v8843_v0 }
  0x92   :  { %571 = vmatprep.subr.bf16.mxu0 %v7111_v19  ;;  %5662 = vmatpush3.bf16.msra.mxu1 %v7159_v30 }
  0x93   :  { %5663 = vmatprep.subr.bf16.mxu1 %v8845_v25 }
  0x95   :  { %572 = vmatpush1.bf16.msra.mxu0 %v7116_v20  ;;  %5656 = vmatmul.mubr.msk.bf16.gmra.mrb[4].mxu1 %vm229_vm0, %v179_v35 }
  0x96   :  { %573 = vmatprep.subr.bf16.mxu0 %v7130_v23  ;;  %5664 = vmatpush3.bf16.msra.mxu1 %v7180_v34 }
  0x97   :  { %5665 = vmatprep.subr.bf16.mxu1 %v8845_v25  ;;  %5675 = vmatprep.mubr.msk.bf16.mxu1 %vm6816_vm1, %v8845_v25 }
  0x98   :  { %5206 = vmatmul.mubr.msk.bf16.gmra.mrb[8].mxu0 %vm229_vm0, %v178_v26 }
  0x99   :  { %574 = vmatpush1.bf16.msra.mxu0 %v7142_v27  ;;  %304 = vmatprep.mubr.bf16.mxu0 %v8843_v0 }
  0x9a   :  { %575 = vmatprep.subr.bf16.mxu0 %v7148_v28  ;;  %5666 = vmatpush3.bf16.msra.mxu1 %v7200_v38 }
  0x9b   :  { %5667 = vmatprep.subr.bf16.mxu1 %v8845_v25 }
  0x9d   :  { %576 = vmatpush1.bf16.msra.mxu0 %v7164_v31 }
  0x9e   :  { %577 = vmatprep.subr.bf16.mxu0 %v7175_v33  ;;  %5668 = vmatpush3.bf16.msra.mxu1 %v7223_v41 }
  0x9f   :  { %5669 = vmatprep.subr.bf16.mxu1 %v8845_v25 }
  0xa0   :  { %5207 = vmatmul.mubr.msk.bf16.gmra.mrb[12].mxu0 %vm229_vm0, %v179_v35 }
  0xa1   :  { %578 = vmatpush1.bf16.msra.mxu0 %v7189_v36  ;;  %597 = vmatprep.mubr.bf16.mxu0 %v8843_v0 }
  0xa2   :  { %579 = vmatprep.subr.bf16.mxu0 %v7195_v37  ;;  %5670 = vmatpush3.bf16.msra.mxu1 %v7237_v43 }
  0xa3   :  { %5671 = vmatprep.subr.bf16.mxu1 %v8845_v25 }
  0xa5   :  { %580 = vmatpush1.bf16.msra.mxu0 %v7209_v39 }
  0xa6   :  { %670 = vmatprep.subr.bf16.mxu0 %v7061_v8  ;;  %5672 = vmatpush3.bf16.msra.mxu1 %v7247_v44 }
  0xa7   :  { %5673 = vmatprep.subr.bf16.mxu1 %v8845_v25 }
  0xa8   :  { %598 = vmatmul.mubr.bf16.vlgmr.msra.gmra.mrb[16].mxu0 %v420_v42 }
  0xa9   :  { %671 = vmatpush1.bf16.msra.mxu0 %v7067_v9  ;;  %702 = vmatprep.mubr.bf16.mxu0 %v8843_v0 }
  0xaa   :  { %672 = vmatprep.subr.bf16.mxu0 %v7073_v10  ;;  %5674 = vmatpush3.bf16.msra.mxu1 %v7256_v45 }
  0xab   :  { %5679 = vmatprep.subr.bf16.mxu1 %v8845_v25 }
  0xad   :  { %673 = vmatpush1.bf16.msra.mxu0 %v7078_v11  ;;  %5676 = vmatmul.mubr.bf16.vlgmr.msra.gmra.mrb[8].mxu1 %v420_v42 }
  0xae   :  { %674 = vmatprep.subr.bf16.mxu0 %v7092_v14  ;;  %5680 = vmatpush3.bf16.msra.mxu1 %v7136_v24 }
  0xaf   :  { %5681 = vmatprep.subr.bf16.mxu1 %v8845_v25  ;;  %5695 = vmatprep.mubr.msk.bf16.mxu1 %vm6816_vm1, %v8845_v25 }
  0xb1   :  { %675 = vmatpush1.bf16.msra.mxu0 %v7105_v18 }
  0xb2   :  { %676 = vmatprep.subr.bf16.mxu0 %v7111_v19  ;;  %5682 = vmatpush3.bf16.msra.mxu1 %v7159_v30 }
  0xb3   :  { %5683 = vmatprep.subr.bf16.mxu1 %v8845_v25 }
  0xb5   :  { %677 = vmatpush1.bf16.msra.mxu0 %v7116_v20 }
  0xb6   :  { %678 = vmatprep.subr.bf16.mxu0 %v7130_v23  ;;  %5684 = vmatpush3.bf16.msra.mxu1 %v7180_v34 }
  0xb7   :  { %5685 = vmatprep.subr.bf16.mxu1 %v8845_v25 }
  0xb9   :  { %679 = vmatpush1.bf16.msra.mxu0 %v7142_v27 }
  0xba   :  { %680 = vmatprep.subr.bf16.mxu0 %v7148_v28  ;;  %5686 = vmatpush3.bf16.msra.mxu1 %v7200_v38 }
  0xbb   :  { %5687 = vmatprep.subr.bf16.mxu1 %v8845_v25 }
  0xbd   :  { %681 = vmatpush1.bf16.msra.mxu0 %v7164_v31 }
  0xbe   :  { %682 = vmatprep.subr.bf16.mxu0 %v7175_v33  ;;  %5688 = vmatpush3.bf16.msra.mxu1 %v7223_v41 }
  0xbf   :  { %5689 = vmatprep.subr.bf16.mxu1 %v8845_v25 }
  0xc1   :  { %683 = vmatpush1.bf16.msra.mxu0 %v7189_v36 }
  0xc2   :  { %684 = vmatprep.subr.bf16.mxu0 %v7195_v37  ;;  %5690 = vmatpush3.bf16.msra.mxu1 %v7237_v43 }
  0xc3   :  { %5691 = vmatprep.subr.bf16.mxu1 %v8845_v25 }
  0xc5   :  { %685 = vmatpush1.bf16.msra.mxu0 %v7209_v39 }
  0xc6   :  { %775 = vmatprep.subr.bf16.mxu0 %v7061_v8  ;;  %5692 = vmatpush3.bf16.msra.mxu1 %v7247_v44 }
  0xc7   :  { %5693 = vmatprep.subr.bf16.mxu1 %v8845_v25 }
  0xca   :  { %5694 = vmatpush3.bf16.msra.mxu1 %v7256_v45 }
  0xcb   :  { %5699 = vmatprep.subr.bf16.mxu1 %v8845_v25 }
 0x15b   :  { %v276_v51 = vpop.f32.mrb[0].mxu0 }
 0x15c   :  { %v278_v53 = vpop.f32.mrb[1].mxu0  ;;  %v277_v59 = vadd.f32 %v276_v51, %v185_v52 }
 0x15d   :  { %v280_v55 = vpop.f32.mrb[2].mxu0 }
 0x15e   :  { %v7299_v56 = vadd.f32 %v280_v55, %v185_v52  ;;  %v282_v57 = vpop.f32.mrb[3].mxu0 }
 0x15f   :  { %v7301_v58 = vadd.f32 %v282_v57, %v189_v54 }
 0x160   :  { %v5653_v6 = vpop.f32.mrb[0].mxu1 }
 0x161   :  { %v7317_v7 = vadd.f32 %v5653_v6, %v7310_v2  ;;  %v349_v12 = vpop.f32.mrb[1].mxu1 }
 0x162   :  { %v5654_v13 = vpop.f32.mrb[2].mxu1 }
 0x163   :  { %v286_v60 = vpop.f32.mrb[4].mxu0  ;;  %v7320_v16 = vadd.f32 %v5654_v13, %v7310_v2  ;;  %v352_v17 = vpop.f32.mrb[3].mxu1 }
 0x164   :  { %v7304_v61 = vadd.f32 %v286_v60, %v185_v52  ;;  %v288_v62 = vpop.f32.mrb[5].mxu0  ;;  %v7325_v26 = vadd.f32 %v352_v17, %v7310_v2 }
 0x165   :  { %v7306_v63 = vadd.f32 %v288_v62, %v189_v54  ;;  %v290_v1 = vpop.f32.mrb[6].mxu0 }
 0x166   :  { %v7312_v3 = vadd.f32 %v290_v1, %v185_v52  ;;  %v292_v4 = vpop.f32.mrb[7].mxu0 }
 0x167   :  { %v7314_v5 = vadd.f32 %v292_v4, %v189_v54 }
 0x168   :  { %v5657_v49 = vpop.f32.mrb[4].mxu1 }
 0x169   :  { %v7334_v55 = vadd.f32 %v5657_v49, %v7310_v2  ;;  %v365_v57 = vpop.f32.mrb[5].mxu1 }
 0x16a   :  { %v7337_v60 = vadd.f32 %v365_v57, %v7310_v2  ;;  %v5658_v62 = vpop.f32.mrb[6].mxu1 }
 0x16b   :  { %v296_v15 = vpop.f32.mrb[8].mxu0  ;;  %8866 = vst [vmem:[#allocation18_spill] sm:$0xff] %v7334_v55  ;;  %v7340_v4 = vadd.f32 %v5658_v62, %v7310_v2  ;;  %v368_v6 = vpop.f32.mrb[7].mxu1 }
 0x16c   :  { %v7322_v21 = vadd.f32 %v296_v15, %v185_v52  ;;  %v298_v22 = vpop.f32.mrb[9].mxu0  ;;  %v7345_v17 = vadd.f32 %v368_v6, %v7310_v2 }
 0x16d   :  { %v7327_v29 = vadd.f32 %v298_v22, %v189_v54  ;;  %v300_v32 = vpop.f32.mrb[10].mxu0  ;;  %8867 = vst [vmem:[#allocation19_spill] sm:$0xff] %v7340_v4  ;;  %v279_v4 = vadd.f32 %v278_v53, %v189_v54 }
 0x16e   :  { %v7329_v35 = vadd.f32 %v300_v32, %v185_v52  ;;  %v302_v42 = vpop.f32.mrb[11].mxu0  ;;  %8869 = vst [vmem:[#allocation21_spill] sm:$0xff] %v7345_v17 }
 0x16f   :  { %v7331_v46 = vadd.f32 %v302_v42, %v189_v54  ;;  %v412_v42 = vld [vmem:[%s8871_s10] sm:$0x7] }
 0x170   :  { %8864 = vst [vmem:[#allocation16_spill] sm:$0xff] %v7329_v35  ;;  %v7356_v62 = vrot.slane %v412_v42, %v184_v48 }
 0x171   :  { %8865 = vst [vmem:[#allocation17_spill] sm:$0xff] %v7331_v46 }
 0x173   :  { %v306_v1 = vpop.f32.mrb[12].mxu0 }
 0x174   :  { %v7342_v13 = vadd.f32 %v306_v1, %v185_v52  ;;  %v308_v15 = vpop.f32.mrb[13].mxu0  ;;  %v7358_v1 = vrot.slane %v412_v42, %v188_v50 }
 0x175   :  { %v7347_v22 = vadd.f32 %v308_v15, %v189_v54  ;;  %v310_v32 = vpop.f32.mrb[14].mxu0 }
 0x176   :  { %8868 = vst [vmem:[#allocation20_spill] sm:$0xff] %v7342_v13  ;;  %v7352_v49 = vadd.f32 %v310_v32, %v185_v52  ;;  %v312_v57 = vpop.f32.mrb[15].mxu0 }
 0x177   :  { %8870 = vst [vmem:[#allocation22_spill] sm:$0xff] %v7347_v22  ;;  %v7354_v0 = vadd.f32 %v312_v57, %v189_v54 }
 0x178   :  { %8872 = vst [vmem:[#allocation23_spill] sm:$0xff] %v7352_v49 }
 0x179   :  { %8873 = vst [vmem:[#allocation24_spill] sm:$0xff] %v7354_v0 }
 0x17b   :  { %v599_v25 = vpop.f32.mrb[16].mxu0 }
 0x17c   :  { %v600_v6 = vadd.f32 %v599_v25, %v7356_v62  ;;  %v601_v15 = vpop.f32.mrb[17].mxu0  ;;  %v8874_v25 = vsub.s32 2, %v7292_v47 }
 0x17d   :  { %v602_v55 = vadd.f32 %v601_v15, %v7358_v1  ;;  %v603_v22 = vpop.f32.mrb[18].mxu0 }
 0x17e   :  { %v646_v13 = vadd.f32 %v600_v6, %v277_v59  ;;  %v604_v17 = vpop.f32.mrb[19].mxu0  ;;  %v7364_v52 = vrot.slane %v412_v42, %v8874_v25 }
 0x17f   :  { %v653_v32 = vadd.f32 %v602_v55, %v279_v4  ;;  %v350_v4 = vadd.f32 %v349_v12, %v7310_v2  ;;  %v8876_v2 = vmov 0  }
 0x180   :  { %v5237_v49 = vmul.f32 -1.442695, %v646_v13  ;;  %v640_v0 = vpop.f32.mrb[8].mxu1 }
 0x181   :  { %v5238_v57 = vmul.f32 -1.442695, %v653_v32  ;;  %v5677_v48 = vpop.f32.mrb[9].mxu1  ;;  %v641_v59 = vadd.f32 %v640_v0, %v7364_v52  ;;  %v8875_v0 = vmov 0.0  }
 0x182   :  { %6415 = vpow2.f32 %v5237_v49  ;;  %v643_v50 = vpop.f32.mrb[10].mxu1 }
 0x183   :  { %6417 = vpow2.f32 %v5238_v57  ;;  %v5678_v46 = vpop.f32.mrb[11].mxu1 }
 0x18c   :  { %v6416_v35 = vpop.eup %6415 }
 0x18d   :  { %v650_v51 = vadd.f32 1.0, %v6416_v35  ;;  %v6418_v53 = vpop.eup %6417 }
 0x18e   :  { %v657_v54 = vadd.f32 1.0, %v6418_v53 }
 0x18f   :  { %6419 = vrcp.f32 %v650_v51 }
 0x190   :  { %6421 = vrcp.f32 %v657_v54 }
 0x199   :  { %v6420_v55 = vpop.eup %6419 }
 0x19a   :  { %v660_v13 = vmul.f32 %v6420_v55, %v641_v59  ;;  %v6422_v22 = vpop.eup %6421 }
 0x19b   :  { %v663_v46 = vsub.f32 1.0, %v6422_v22  ;;  %v665_v6 = vmul.f32 %v6422_v22, %v7214_v40 }
 0x19c   :  { %v661_v17 = vadd.f32 %v660_v13, %v350_v4 }
 0x19e   :  { %6423 = vtanh.f32 %v661_v17 }
 0x1a8   :  { %v6424_v49 = vpop.eup %6423 }
 0x1a9   :  { %v664_v35 = vmul.f32 %v6424_v49, %v663_v46 }
 0x1ab   :  { %v7369_v47 = vadd.f32 %v665_v6, %v664_v35 }
 0x1ad   :  { %v669_v42 = vpack.c.bf16 %v7369_v47, %v7369_v47 }
 0x1af   :  { %703 = vmatmul.mubr.bf16.vlgmr.msra.gmra.mrb[20].mxu0 %v669_v42  ;;  %5696 = vmatmul.mubr.bf16.vlgmr.msra.gmra.mrb[12].mxu1 %v669_v42 }
 0x1b0   :  { %776 = vmatpush1.bf16.msra.mxu0 %v7067_v9  ;;  %5700 = vmatpush3.bf16.msra.mxu1 %v7136_v24 }
 0x1b1   :  { %777 = vmatprep.subr.bf16.mxu0 %v7073_v10  ;;  %5701 = vmatprep.subr.bf16.mxu1 %v8875_v0 }
 0x1b2   :  { %807 = vmatprep.mubr.bf16.mxu0 %v8876_v2  ;;  %5715 = vmatprep.mubr.msk.bf16.mxu1 %vm6816_vm1, %v8875_v0 }
 0x1b4   :  { %778 = vmatpush1.bf16.msra.mxu0 %v7078_v11  ;;  %5702 = vmatpush3.bf16.msra.mxu1 %v7159_v30 }
 0x1b5   :  { %779 = vmatprep.subr.bf16.mxu0 %v7092_v14  ;;  %5703 = vmatprep.subr.bf16.mxu1 %v8875_v0 }
 0x1b8   :  { %780 = vmatpush1.bf16.msra.mxu0 %v7105_v18  ;;  %5704 = vmatpush3.bf16.msra.mxu1 %v7180_v34 }
 0x1b9   :  { %781 = vmatprep.subr.bf16.mxu0 %v7111_v19  ;;  %5705 = vmatprep.subr.bf16.mxu1 %v8875_v0 }
 0x1bc   :  { %782 = vmatpush1.bf16.msra.mxu0 %v7116_v20  ;;  %5706 = vmatpush3.bf16.msra.mxu1 %v7200_v38 }
 0x1bd   :  { %783 = vmatprep.subr.bf16.mxu0 %v7130_v23  ;;  %5707 = vmatprep.subr.bf16.mxu1 %v8875_v0 }
 0x1c0   :  { %784 = vmatpush1.bf16.msra.mxu0 %v7142_v27  ;;  %5708 = vmatpush3.bf16.msra.mxu1 %v7223_v41 }
 0x1c1   :  { %785 = vmatprep.subr.bf16.mxu0 %v7148_v28  ;;  %5709 = vmatprep.subr.bf16.mxu1 %v8875_v0 }
 0x1c4   :  { %786 = vmatpush1.bf16.msra.mxu0 %v7164_v31  ;;  %5710 = vmatpush3.bf16.msra.mxu1 %v7237_v43 }
 0x1c5   :  { %787 = vmatprep.subr.bf16.mxu0 %v7175_v33  ;;  %5711 = vmatprep.subr.bf16.mxu1 %v8875_v0 }
 0x1c8   :  { %788 = vmatpush1.bf16.msra.mxu0 %v7189_v36  ;;  %5712 = vmatpush3.bf16.msra.mxu1 %v7247_v44 }
 0x1c9   :  { %789 = vmatprep.subr.bf16.mxu0 %v7195_v37  ;;  %5713 = vmatprep.subr.bf16.mxu1 %v8875_v0 }
 0x1cc   :  { %790 = vmatpush1.bf16.msra.mxu0 %v7209_v39  ;;  %5714 = vmatpush3.bf16.msra.mxu1 %v7256_v45 }
 0x1cd   :  { %880 = vmatprep.subr.bf16.mxu0 %v7061_v8  ;;  %5719 = vmatprep.subr.bf16.mxu1 %v8875_v0 }
 0x282   :  { %v704_v40 = vpop.f32.mrb[20].mxu0  ;;  %v745_v12 = vpop.f32.mrb[12].mxu1 }
 0x283   :  { %v705_v15 = vadd.f32 %v704_v40, %v7356_v62  ;;  %v706_v32 = vpop.f32.mrb[21].mxu0  ;;  %v5697_v57 = vpop.f32.mrb[13].mxu1  ;;  %v746_v49 = vadd.f32 %v745_v12, %v7364_v52 }
 0x284   :  { %v707_v48 = vadd.f32 %v706_v32, %v7358_v1  ;;  %v708_v50 = vpop.f32.mrb[22].mxu0  ;;  %v748_v51 = vpop.f32.mrb[14].mxu1 }
 0x285   :  { %v751_v25 = vadd.f32 %v705_v15, %v7299_v56  ;;  %v709_v53 = vpop.f32.mrb[23].mxu0  ;;  %v5698_v54 = vpop.f32.mrb[15].mxu1  ;;  %v5239_v50 = vclamps-f32 %v7369_v47, 5.0 }
 0x286   :  { %v758_v59 = vadd.f32 %v707_v48, %v7301_v58 }
 0x287   :  { %v5240_v55 = vmul.f32 -1.442695, %v751_v25 }
 0x288   :  { %v5241_v4 = vmul.f32 -1.442695, %v758_v59 }
 0x289   :  { %6425 = vpow2.f32 %v5240_v55 }
 0x28a   :  { %6427 = vpow2.f32 %v5241_v4 }
 0x293   :  { %v6426_v13 = vpop.eup %6425 }
 0x294   :  { %v755_v17 = vadd.f32 1.0, %v6426_v13  ;;  %v6428_v22 = vpop.eup %6427 }
 0x295   :  { %v762_v46 = vadd.f32 1.0, %v6428_v22 }
 0x296   :  { %6429 = vrcp.f32 %v755_v17 }
 0x297   :  { %6431 = vrcp.f32 %v762_v46 }
 0x2a0   :  { %v6430_v35 = vpop.eup %6429 }
 0x2a1   :  { %v765_v6 = vmul.f32 %v6430_v35, %v746_v49  ;;  %v6432_v42 = vpop.eup %6431 }
 0x2a2   :  { %v768_v40 = vsub.f32 1.0, %v6432_v42  ;;  %v770_v32 = vmul.f32 %v6432_v42, %v7369_v47  ;;  %v6400_v47 = vld [vmem:[%s8822_s11 + $0x8] sm:$0xff]  }
 0x2a3   :  { %v766_v56 = vadd.f32 %v765_v6, %v7325_v26 }
 0x2a5   :  { %6433 = vtanh.f32 %v766_v56 }
 0x2af   :  { %v6434_v58 = vpop.eup %6433 }
 0x2b0   :  { %v769_v15 = vmul.f32 %v6434_v58, %v768_v40 }
 0x2b2   :  { %v7415_v57 = vadd.f32 %v770_v32, %v769_v15 }
 0x2b4   :  { %v774_v48 = vpack.c.bf16 %v7415_v57, %v7415_v57  ;;  %v5242_v12 = vclamps-f32 %v7415_v57, 5.0 }
 0x2b6   :  { %808 = vmatmul.mubr.bf16.vlgmr.msra.gmra.mrb[24].mxu0 %v774_v48  ;;  %5716 = vmatmul.mubr.bf16.vlgmr.msra.gmra.mrb[16].mxu1 %v774_v48  ;;  %v7425_v26 = vpack.i.bf16 %v5242_v12, %v5239_v50 }
 0x2b7   :  { %881 = vmatpush1.bf16.msra.mxu0 %v7067_v9  ;;  %5720 = vmatpush3.bf16.msra.mxu1 %v7136_v24 }
 0x2b8   :  { %882 = vmatprep.subr.bf16.mxu0 %v7073_v10  ;;  %5721 = vmatprep.subr.bf16.mxu1 %v8875_v0 }
 0x2b9   :  { %912 = vmatprep.mubr.bf16.mxu0 %v8876_v2  ;;  %5735 = vmatprep.mubr.msk.bf16.mxu1 %vm6816_vm1, %v8875_v0 }
 0x2bb   :  { %883 = vmatpush1.bf16.msra.mxu0 %v7078_v11  ;;  %5722 = vmatpush3.bf16.msra.mxu1 %v7159_v30 }
 0x2bc   :  { %884 = vmatprep.subr.bf16.mxu0 %v7092_v14  ;;  %5723 = vmatprep.subr.bf16.mxu1 %v8875_v0 }
 0x2bf   :  { %885 = vmatpush1.bf16.msra.mxu0 %v7105_v18  ;;  %5724 = vmatpush3.bf16.msra.mxu1 %v7180_v34 }
 0x2c0   :  { %886 = vmatprep.subr.bf16.mxu0 %v7111_v19  ;;  %5725 = vmatprep.subr.bf16.mxu1 %v8875_v0 }
 0x2c3   :  { %887 = vmatpush1.bf16.msra.mxu0 %v7116_v20  ;;  %5726 = vmatpush3.bf16.msra.mxu1 %v7200_v38 }
 0x2c4   :  { %888 = vmatprep.subr.bf16.mxu0 %v7130_v23  ;;  %5727 = vmatprep.subr.bf16.mxu1 %v8875_v0 }
 0x2c7   :  { %889 = vmatpush1.bf16.msra.mxu0 %v7142_v27  ;;  %5728 = vmatpush3.bf16.msra.mxu1 %v7223_v41 }
 0x2c8   :  { %890 = vmatprep.subr.bf16.mxu0 %v7148_v28  ;;  %5729 = vmatprep.subr.bf16.mxu1 %v8875_v0 }
 0x2cb   :  { %891 = vmatpush1.bf16.msra.mxu0 %v7164_v31  ;;  %5730 = vmatpush3.bf16.msra.mxu1 %v7237_v43 }
 0x2cc   :  { %892 = vmatprep.subr.bf16.mxu0 %v7175_v33  ;;  %5731 = vmatprep.subr.bf16.mxu1 %v8875_v0 }
 0x2cf   :  { %893 = vmatpush1.bf16.msra.mxu0 %v7189_v36  ;;  %5732 = vmatpush3.bf16.msra.mxu1 %v7247_v44 }
 0x2d0   :  { %894 = vmatprep.subr.bf16.mxu0 %v7195_v37  ;;  %5733 = vmatprep.subr.bf16.mxu1 %v8875_v0 }
 0x2d3   :  { %895 = vmatpush1.bf16.msra.mxu0 %v7209_v39  ;;  %5734 = vmatpush3.bf16.msra.mxu1 %v7256_v45 }
 0x2d4   :  { %985 = vmatprep.subr.bf16.mxu0 %v7061_v8  ;;  %5739 = vmatprep.subr.bf16.mxu1 %v8875_v0 }
 0x389   :  { %v809_v51 = vpop.f32.mrb[24].mxu0  ;;  %v850_v25 = vpop.f32.mrb[16].mxu1 }
 0x38a   :  { %v810_v53 = vadd.f32 %v809_v51, %v7356_v62  ;;  %v811_v54 = vpop.f32.mrb[25].mxu0  ;;  %v5717_v59 = vpop.f32.mrb[17].mxu1  ;;  %v851_v15 = vadd.f32 %v850_v25, %v7364_v52 }
 0x38b   :  { %v812_v55 = vadd.f32 %v811_v54, %v7358_v1  ;;  %v813_v4 = vpop.f32.mrb[26].mxu0  ;;  %v853_v13 = vpop.f32.mrb[18].mxu1 }
 0x38c   :  { %v856_v17 = vadd.f32 %v810_v53, %v7304_v61  ;;  %v814_v22 = vpop.f32.mrb[27].mxu0  ;;  %v5718_v46 = vpop.f32.mrb[19].mxu1 }
 0x38d   :  { %v863_v49 = vadd.f32 %v812_v55, %v7306_v63 }
 0x38e   :  { %v5243_v35 = vmul.f32 -1.442695, %v856_v17 }
 0x38f   :  { %v5244_v6 = vmul.f32 -1.442695, %v863_v49 }
 0x390   :  { %6435 = vpow2.f32 %v5243_v35 }
 0x391   :  { %6437 = vpow2.f32 %v5244_v6 }
 0x39a   :  { %v6436_v56 = vpop.eup %6435 }
 0x39b   :  { %v860_v42 = vadd.f32 1.0, %v6436_v56  ;;  %v6438_v40 = vpop.eup %6437 }
 0x39c   :  { %v867_v58 = vadd.f32 1.0, %v6438_v40 }
 0x39d   :  { %6439 = vrcp.f32 %v860_v42 }
 0x39e   :  { %6441 = vrcp.f32 %v867_v58 }
 0x3a7   :  { %v6440_v32 = vpop.eup %6439 }
 0x3a8   :  { %v870_v48 = vmul.f32 %v6440_v32, %v851_v15  ;;  %v6442_v51 = vpop.eup %6441 }
 0x3a9   :  { %v873_v53 = vsub.f32 1.0, %v6442_v51  ;;  %v875_v59 = vmul.f32 %v6442_v51, %v7415_v57  ;;  %v6399_v57 = vld [vmem:[%s8822_s11] sm:$0xff]  }
 0x3aa   :  { %v871_v61 = vadd.f32 %v870_v48, %v7317_v7 }
 0x3ac   :  { %6443 = vtanh.f32 %v871_v61 }
 0x3b6   :  { %v6444_v63 = vpop.eup %6443 }
 0x3b7   :  { %v874_v54 = vmul.f32 %v6444_v63, %v873_v53 }
 0x3b9   :  { %v7469_v55 = vadd.f32 %v875_v59, %v874_v54 }
 0x3bb   :  { %v879_v4 = vpack.c.bf16 %v7469_v55, %v7469_v55 }
 0x3bd   :  { %913 = vmatmul.mubr.bf16.vlgmr.msra.gmra.mrb[28].mxu0 %v879_v4  ;;  %5736 = vmatmul.mubr.bf16.vlgmr.msra.gmra.mrb[20].mxu1 %v879_v4 }
 0x3be   :  { %986 = vmatpush1.bf16.msra.mxu0 %v7067_v9  ;;  %5740 = vmatpush3.bf16.msra.mxu1 %v7136_v24 }
 0x3bf   :  { %987 = vmatprep.subr.bf16.mxu0 %v7073_v10  ;;  %5741 = vmatprep.subr.bf16.mxu1 %v8875_v0 }
 0x3c0   :  { %1017 = vmatprep.mubr.bf16.mxu0 %v8876_v2  ;;  %5755 = vmatprep.mubr.msk.bf16.mxu1 %vm6816_vm1, %v8875_v0 }
 0x3c2   :  { %988 = vmatpush1.bf16.msra.mxu0 %v7078_v11  ;;  %5742 = vmatpush3.bf16.msra.mxu1 %v7159_v30 }
 0x3c3   :  { %989 = vmatprep.subr.bf16.mxu0 %v7092_v14  ;;  %5743 = vmatprep.subr.bf16.mxu1 %v8875_v0 }
 0x3c6   :  { %990 = vmatpush1.bf16.msra.mxu0 %v7105_v18  ;;  %5744 = vmatpush3.bf16.msra.mxu1 %v7180_v34 }
 0x3c7   :  { %991 = vmatprep.subr.bf16.mxu0 %v7111_v19  ;;  %5745 = vmatprep.subr.bf16.mxu1 %v8875_v0 }
 0x3ca   :  { %992 = vmatpush1.bf16.msra.mxu0 %v7116_v20  ;;  %5746 = vmatpush3.bf16.msra.mxu1 %v7200_v38 }
 0x3cb   :  { %993 = vmatprep.subr.bf16.mxu0 %v7130_v23  ;;  %5747 = vmatprep.subr.bf16.mxu1 %v8875_v0 }
 0x3ce   :  { %994 = vmatpush1.bf16.msra.mxu0 %v7142_v27  ;;  %5748 = vmatpush3.bf16.msra.mxu1 %v7223_v41 }
 0x3cf   :  { %995 = vmatprep.subr.bf16.mxu0 %v7148_v28  ;;  %5749 = vmatprep.subr.bf16.mxu1 %v8875_v0 }
 0x3d2   :  { %996 = vmatpush1.bf16.msra.mxu0 %v7164_v31  ;;  %5750 = vmatpush3.bf16.msra.mxu1 %v7237_v43 }
 0x3d3   :  { %997 = vmatprep.subr.bf16.mxu0 %v7175_v33  ;;  %5751 = vmatprep.subr.bf16.mxu1 %v8875_v0 }
 0x3d6   :  { %998 = vmatpush1.bf16.msra.mxu0 %v7189_v36  ;;  %5752 = vmatpush3.bf16.msra.mxu1 %v7247_v44 }
 0x3d7   :  { %999 = vmatprep.subr.bf16.mxu0 %v7195_v37  ;;  %5753 = vmatprep.subr.bf16.mxu1 %v8875_v0 }
 0x3da   :  { %1000 = vmatpush1.bf16.msra.mxu0 %v7209_v39  ;;  %5754 = vmatpush3.bf16.msra.mxu1 %v7256_v45 }
 0x3db   :  { %1090 = vmatprep.subr.bf16.mxu0 %v7061_v8  ;;  %5759 = vmatprep.subr.bf16.mxu1 %v8875_v0 }
 0x490   :  { %v914_v7 = vpop.f32.mrb[28].mxu0  ;;  %v955_v25 = vpop.f32.mrb[20].mxu1 }
 0x491   :  { %v915_v13 = vadd.f32 %v914_v7, %v7356_v62  ;;  %v916_v17 = vpop.f32.mrb[29].mxu0  ;;  %v5737_v22 = vpop.f32.mrb[21].mxu1  ;;  %v956_v51 = vadd.f32 %v955_v25, %v7364_v52 }
 0x492   :  { %v917_v46 = vadd.f32 %v916_v17, %v7358_v1  ;;  %v918_v49 = vpop.f32.mrb[30].mxu0  ;;  %v958_v35 = vpop.f32.mrb[22].mxu1  ;;  %v5245_v22 = vclamps-f32 %v7469_v55, 5.0 }
 0x493   :  { %v961_v6 = vadd.f32 %v915_v13, %v7312_v3  ;;  %v919_v56 = vpop.f32.mrb[31].mxu0  ;;  %v5738_v42 = vpop.f32.mrb[23].mxu1 }
 0x494   :  { %v968_v40 = vadd.f32 %v917_v46, %v7314_v5 }
 0x495   :  { %v5246_v58 = vmul.f32 -1.442695, %v961_v6 }
 0x496   :  { %v5247_v8 = vmul.f32 -1.442695, %v968_v40 }
 0x497   :  { %6445 = vpow2.f32 %v5246_v58 }
 0x498   :  { %6447 = vpow2.f32 %v5247_v8 }
 0x4a1   :  { %v6446_v15 = vpop.eup %6445 }
 0x4a2   :  { %v965_v32 = vadd.f32 1.0, %v6446_v15  ;;  %v6448_v48 = vpop.eup %6447 }
 0x4a3   :  { %v972_v61 = vadd.f32 1.0, %v6448_v48 }
 0x4a4   :  { %6449 = vrcp.f32 %v965_v32 }
 0x4a5   :  { %6451 = vrcp.f32 %v972_v61 }
 0x4ae   :  { %v6450_v53 = vpop.eup %6449 }
 0x4af   :  { %v975_v63 = vmul.f32 %v6450_v53, %v956_v51  ;;  %v6452_v54 = vpop.eup %6451  ;;  %v7581_v53 = vld [vmem:[%s8861_s1] ss:$12 sps:$4 sm:$0xff]  }
 0x4b0   :  { %v978_v59 = vsub.f32 1.0, %v6452_v54  ;;  %v980_v7 = vmul.f32 %v6452_v54, %v7469_v55  ;;  %v7609_v54 = vld [vmem:[%s8861_s1 + $0x20] ss:$12 sps:$4 sm:$0xff]  }
 0x4b1   :  { %v976_v3 = vadd.f32 %v975_v63, %v7320_v16  ;;  %v7593_v63 = vld [vmem:[%s8861_s1 + $0x1c] ss:$12 sps:$4 sm:$0xff]   ;;  %v5262_v55 = vld [vmem:[%s8888_s22] ss:$0 sm:$0xff] }
 0x4b3   :  { %6453 = vtanh.f32 %v976_v3  ;;  %v7603_v3 = vld [vmem:[%s8861_s1 + $0x18] ss:$12 sps:$4 sm:$0xff]  }
 0x4bd   :  { %v6454_v5 = vpop.eup %6453 }
 0x4be   :  { %v979_v4 = vmul.f32 %v6454_v5, %v978_v59  ;;  %v7615_v59 = vld [vmem:[%s8861_s1 + $0x34] ss:$12 sps:$4 sm:$0xff]   ;;  %v7622_v5 = vld [vmem:[%s8861_s1 + $0x30] ss:$12 sps:$4 sm:$0xff]  }
 0x4c0   :  { %v7515_v13 = vadd.f32 %v980_v7, %v979_v4  ;;  %v7629_v4 = vld [vmem:[%s8861_s1 + $0x4c] ss:$12 sps:$4 sm:$0xff]   ;;  %v7636_v7 = vld [vmem:[%s8861_s1 + $0x48] ss:$12 sps:$4 sm:$0xff]  }
 0x4c2   :  { %v984_v17 = vpack.c.bf16 %v7515_v13, %v7515_v13  ;;  %v5248_v25 = vclamps-f32 %v7515_v13, 5.0 }
 0x4c4   :  { %1018 = vmatmul.mubr.bf16.vlgmr.msra.gmra.mrb[32].mxu0 %v984_v17  ;;  %5756 = vmatmul.mubr.bf16.vlgmr.msra.gmra.mrb[24].mxu1 %v984_v17  ;;  %v7525_v16 = vpack.i.bf16 %v5248_v25, %v5245_v22  ;;  %v7650_v17 = vld [vmem:[%s8861_s1 + $0x60] ss:$12 sps:$4 sm:$0xff]  }
 0x4c5   :  { %1091 = vmatpush1.bf16.msra.mxu0 %v7067_v9  ;;  %5760 = vmatpush3.bf16.msra.mxu1 %v7136_v24  ;;  %v7563_v9 = vld [vmem:[%s8861_s1 + $0x4] ss:$12 sps:$4 sm:$0xff]  }
 0x4c6   :  { %1092 = vmatprep.subr.bf16.mxu0 %v7073_v10  ;;  %5761 = vmatprep.subr.bf16.mxu1 %v8875_v0 }
 0x4c7   :  { %1122 = vmatprep.mubr.bf16.mxu0 %v8876_v2  ;;  %5775 = vmatprep.mubr.msk.bf16.mxu1 %vm6816_vm1, %v8875_v0 }
 0x4c9   :  { %1093 = vmatpush1.bf16.msra.mxu0 %v7078_v11  ;;  %5762 = vmatpush3.bf16.msra.mxu1 %v7159_v30 }
 0x4ca   :  { %1094 = vmatprep.subr.bf16.mxu0 %v7092_v14  ;;  %5763 = vmatprep.subr.bf16.mxu1 %v8875_v0 }
 0x4cd   :  { %1095 = vmatpush1.bf16.msra.mxu0 %v7105_v18  ;;  %5764 = vmatpush3.bf16.msra.mxu1 %v7180_v34 }
 0x4ce   :  { %1096 = vmatprep.subr.bf16.mxu0 %v7111_v19  ;;  %5765 = vmatprep.subr.bf16.mxu1 %v8875_v0 }
 0x4d1   :  { %1097 = vmatpush1.bf16.msra.mxu0 %v7116_v20  ;;  %5766 = vmatpush3.bf16.msra.mxu1 %v7200_v38 }
 0x4d2   :  { %1098 = vmatprep.subr.bf16.mxu0 %v7130_v23  ;;  %5767 = vmatprep.subr.bf16.mxu1 %v8875_v0 }
 0x4d5   :  { %1099 = vmatpush1.bf16.msra.mxu0 %v7142_v27  ;;  %5768 = vmatpush3.bf16.msra.mxu1 %v7223_v41 }
 0x4d6   :  { %1100 = vmatprep.subr.bf16.mxu0 %v7148_v28  ;;  %5769 = vmatprep.subr.bf16.mxu1 %v8875_v0 }
 0x4d9   :  { %1101 = vmatpush1.bf16.msra.mxu0 %v7164_v31  ;;  %5770 = vmatpush3.bf16.msra.mxu1 %v7237_v43 }
 0x4da   :  { %1102 = vmatprep.subr.bf16.mxu0 %v7175_v33  ;;  %5771 = vmatprep.subr.bf16.mxu1 %v8875_v0 }
 0x4dd   :  { %1103 = vmatpush1.bf16.msra.mxu0 %v7189_v36  ;;  %5772 = vmatpush3.bf16.msra.mxu1 %v7247_v44 }
 0x4de   :  { %1104 = vmatprep.subr.bf16.mxu0 %v7195_v37  ;;  %5773 = vmatprep.subr.bf16.mxu1 %v8875_v0 }
 0x4e1   :  { %1105 = vmatpush1.bf16.msra.mxu0 %v7209_v39  ;;  %5774 = vmatpush3.bf16.msra.mxu1 %v7256_v45 }
 0x4e2   :  { %1195 = vmatprep.subr.bf16.mxu0 %v7563_v9  ;;  %5779 = vmatprep.subr.bf16.mxu1 %v8875_v0 }
 0x597   :  { %v1019_v10 = vpop.f32.mrb[32].mxu0  ;;  %v1060_v11 = vpop.f32.mrb[24].mxu1 }
 0x598   :  { %v1020_v14 = vadd.f32 %v1019_v10, %v7356_v62  ;;  %v1021_v18 = vpop.f32.mrb[33].mxu0  ;;  %v5757_v19 = vpop.f32.mrb[25].mxu1  ;;  %v1061_v42 = vadd.f32 %v1060_v11, %v7364_v52  ;;  %v7664_v10 = vld [vmem:[%s8861_s1 + $0x78] ss:$12 sps:$4 sm:$0xff]  }
 0x599   :  { %v1022_v20 = vadd.f32 %v1021_v18, %v7358_v1  ;;  %v1023_v23 = vpop.f32.mrb[34].mxu0  ;;  %v1063_v24 = vpop.f32.mrb[26].mxu1 }
 0x59a   :  { %v1066_v27 = vadd.f32 %v1020_v14, %v7322_v21  ;;  %v1024_v28 = vpop.f32.mrb[35].mxu0  ;;  %v5758_v30 = vpop.f32.mrb[27].mxu1 }
 0x59b   :  { %v1073_v31 = vadd.f32 %v1022_v20, %v7327_v29  ;;  %v8877_v20 = vld [vmem:[#allocation16_spill] sm:$0xff] }
 0x59c   :  { %v5249_v33 = vmul.f32 -1.442695, %v1066_v27  ;;  %v8878_v27 = vld [vmem:[#allocation17_spill] sm:$0xff] }
 0x59d   :  { %v5250_v46 = vmul.f32 -1.442695, %v1073_v31 }
 0x59e   :  { %6455 = vpow2.f32 %v5249_v33 }
 0x59f   :  { %6457 = vpow2.f32 %v5250_v46 }
 0x5a8   :  { %v6456_v49 = vpop.eup %6455 }
 0x5a9   :  { %v1070_v35 = vadd.f32 1.0, %v6456_v49  ;;  %v6458_v6 = vpop.eup %6457 }
 0x5aa   :  { %v1077_v56 = vadd.f32 1.0, %v6458_v6 }
 0x5ab   :  { %6459 = vrcp.f32 %v1070_v35 }
 0x5ac   :  { %6461 = vrcp.f32 %v1077_v56  ;;  %v8879_v56 = vld [vmem:[#allocation21_spill] sm:$0xff] }
 0x5b5   :  { %v6460_v40 = vpop.eup %6459 }
 0x5b6   :  { %v1080_v58 = vmul.f32 %v6460_v40, %v1061_v42  ;;  %v6462_v8 = vpop.eup %6461 }
 0x5b7   :  { %v1083_v15 = vsub.f32 1.0, %v6462_v8  ;;  %v1085_v48 = vmul.f32 %v6462_v8, %v7515_v13 }
 0x5b8   :  { %v1081_v21 = vadd.f32 %v1080_v58, %v7337_v60  ;;  %v7587_v60 = vld [vmem:[%s8861_s1 + $0x8] ss:$12 sps:$4 sm:$0xff]  }
 0x5ba   :  { %6463 = vtanh.f32 %v1081_v21 }
 0x5c4   :  { %v6464_v29 = vpop.eup %6463 }
 0x5c5   :  { %v1084_v32 = vmul.f32 %v6464_v29, %v1083_v15 }
 0x5c7   :  { %v7574_v61 = vadd.f32 %v1085_v48, %v1084_v32 }
 0x5c9   :  { %v1089_v51 = vpack.c.bf16 %v7574_v61, %v7574_v61  ;;  %v5251_v48 = vclamps-f32 %v7574_v61, 5.0 }
 0x5cb   :  { %1123 = vmatmul.mubr.bf16.vlgmr.msra.gmra.mrb[36].mxu0 %v1089_v51  ;;  %5776 = vmatmul.mubr.bf16.vlgmr.msra.gmra.mrb[28].mxu1 %v1089_v51 }
 0x5cc   :  { %1196 = vmatpush1.bf16.msra.mxu0 %v7581_v53  ;;  %5780 = vmatpush3.bf16.msra.mxu1 %v7587_v60 }
 0x5cd   :  { %1197 = vmatprep.subr.bf16.mxu0 %v7593_v63  ;;  %5781 = vmatprep.subr.bf16.mxu1 %v8875_v0 }
 0x5ce   :  { %1227 = vmatprep.mubr.bf16.mxu0 %v8876_v2  ;;  %5795 = vmatprep.mubr.msk.bf16.mxu1 %vm6816_vm1, %v8875_v0 }
 0x5d0   :  { %1198 = vmatpush1.bf16.msra.mxu0 %v7603_v3  ;;  %5782 = vmatpush3.bf16.msra.mxu1 %v7609_v54 }
 0x5d1   :  { %1199 = vmatprep.subr.bf16.mxu0 %v7615_v59  ;;  %5783 = vmatprep.subr.bf16.mxu1 %v8875_v0 }
 0x5d4   :  { %1200 = vmatpush1.bf16.msra.mxu0 %v7622_v5  ;;  %5784 = vmatpush3.bf16.msra.mxu1 %v7180_v34  ;;  %v7643_v34 = vld [vmem:[%s8861_s1 + $0x64] ss:$12 sps:$4 sm:$0xff]  }
 0x5d5   :  { %1201 = vmatprep.subr.bf16.mxu0 %v7629_v4  ;;  %5785 = vmatprep.subr.bf16.mxu1 %v8875_v0 }
 0x5d8   :  { %1202 = vmatpush1.bf16.msra.mxu0 %v7636_v7  ;;  %5786 = vmatpush3.bf16.msra.mxu1 %v7200_v38  ;;  %v7657_v38 = vld [vmem:[%s8861_s1 + $0x7c] ss:$12 sps:$4 sm:$0xff]  }
 0x5d9   :  { %1203 = vmatprep.subr.bf16.mxu0 %v7643_v34  ;;  %5787 = vmatprep.subr.bf16.mxu1 %v8875_v0 }
 0x5dc   :  { %1204 = vmatpush1.bf16.msra.mxu0 %v7650_v17  ;;  %5788 = vmatpush3.bf16.msra.mxu1 %v7223_v41  ;;  %v7671_v41 = vld [vmem:[%s8861_s1 + $0x94] ss:$12 sps:$4 sm:$0xff]  }
 0x5dd   :  { %1205 = vmatprep.subr.bf16.mxu0 %v7657_v38  ;;  %5789 = vmatprep.subr.bf16.mxu1 %v8875_v0 }
 0x5e0   :  { %1206 = vmatpush1.bf16.msra.mxu0 %v7664_v10  ;;  %5790 = vmatpush3.bf16.msra.mxu1 %v7237_v43 }
 0x5e1   :  { %1207 = vmatprep.subr.bf16.mxu0 %v7671_v41  ;;  %5791 = vmatprep.subr.bf16.mxu1 %v8875_v0 }
 0x5e4   :  { %1208 = vmatpush1.bf16.msra.mxu0 %v7189_v36  ;;  %5792 = vmatpush3.bf16.msra.mxu1 %v7247_v44 }
 0x5e5   :  { %1209 = vmatprep.subr.bf16.mxu0 %v7195_v37  ;;  %5793 = vmatprep.subr.bf16.mxu1 %v8875_v0 }
 0x5e8   :  { %1210 = vmatpush1.bf16.msra.mxu0 %v7209_v39  ;;  %5794 = vmatpush3.bf16.msra.mxu1 %v7256_v45 }
 0x5e9   :  { %1300 = vmatprep.subr.bf16.mxu0 %v7563_v9  ;;  %5799 = vmatprep.subr.bf16.mxu1 %v8875_v0 }
 0x69e   :  { %v1124_v43 = vpop.f32.mrb[36].mxu0  ;;  %v1165_v11 = vpop.f32.mrb[28].mxu1 }
 0x69f   :  { %v1125_v14 = vadd.f32 %v1124_v43, %v7356_v62  ;;  %v1126_v18 = vpop.f32.mrb[37].mxu0  ;;  %v5777_v36 = vpop.f32.mrb[29].mxu1  ;;  %v1166_v49 = vadd.f32 %v1165_v11, %v7364_v52 }
 0x6a0   :  { %v1127_v44 = vadd.f32 %v1126_v18, %v7358_v1  ;;  %v1128_v19 = vpop.f32.mrb[38].mxu0  ;;  %v1168_v37 = vpop.f32.mrb[30].mxu1  ;;  %v8880_v18 = vld [vmem:[#allocation20_spill] sm:$0xff] }
 0x6a1   :  { %v1171_v23 = vadd.f32 %v1125_v14, %v8877_v20  ;;  %v1129_v24 = vpop.f32.mrb[39].mxu0  ;;  %v5778_v39 = vpop.f32.mrb[31].mxu1  ;;  %v8881_v37 = vld [vmem:[#allocation22_spill] sm:$0xff] }
 0x6a2   :  { %v1178_v45 = vadd.f32 %v1127_v44, %v8878_v27 }
 0x6a3   :  { %v5252_v28 = vmul.f32 -1.442695, %v1171_v23 }
 0x6a4   :  { %v5253_v9 = vmul.f32 -1.442695, %v1178_v45 }
 0x6a5   :  { %6465 = vpow2.f32 %v5252_v28 }
 0x6a6   :  { %6467 = vpow2.f32 %v5253_v9 }
 0x6af   :  { %v6466_v30 = vpop.eup %6465 }
 0x6b0   :  { %v1175_v31 = vadd.f32 1.0, %v6466_v30  ;;  %v6468_v33 = vpop.eup %6467 }
 0x6b1   :  { %v1182_v46 = vadd.f32 1.0, %v6468_v33  ;;  %v8882_v33 = vld [vmem:[#allocation18_spill] sm:$0xff] }
 0x6b2   :  { %6469 = vrcp.f32 %v1175_v31 }
 0x6b3   :  { %6471 = vrcp.f32 %v1182_v46 }
 0x6bc   :  { %v6470_v35 = vpop.eup %6469 }
 0x6bd   :  { %v1185_v6 = vmul.f32 %v6470_v35, %v1166_v49  ;;  %v6472_v40 = vpop.eup %6471 }
 0x6be   :  { %v1188_v58 = vsub.f32 1.0, %v6472_v40  ;;  %v1190_v15 = vmul.f32 %v6472_v40, %v7574_v61 }
 0x6bf   :  { %v1186_v42 = vadd.f32 %v1185_v6, %v8879_v56 }
 0x6c1   :  { %6473 = vtanh.f32 %v1186_v42 }
 0x6cb   :  { %v6474_v21 = vpop.eup %6473 }
 0x6cc   :  { %v1189_v8 = vmul.f32 %v6474_v21, %v1188_v58  ;;  %v6395_v21 = vld [vmem:[%s8883_s6] sm:$0xff]  }
 0x6ce   :  { %v7690_v29 = vadd.f32 %v1190_v15, %v1189_v8  ;;  %v6396_v8 = vld [vmem:[%s8883_s6 + $0x8] sm:$0xff]   ;;  %v6397_v15 = vld [vmem:[%s8883_s6 + $0x10] sm:$0xff]  }
 0x6d0   :  { %v1194_v32 = vpack.c.bf16 %v7690_v29, %v7690_v29  ;;  %v5254_v51 = vclamps-f32 %v7690_v29, 5.0 }
 0x6d2   :  { %1228 = vmatmul.mubr.bf16.vlgmr.msra.gmra.mrb[40].mxu0 %v1194_v32  ;;  %5796 = vmatmul.mubr.bf16.vlgmr.msra.gmra.mrb[32].mxu1 %v1194_v32  ;;  %v7700_v43 = vpack.i.bf16 %v5254_v51, %v5251_v48 }
 0x6d3   :  { %1301 = vmatpush1.bf16.msra.mxu0 %v7581_v53  ;;  %5800 = vmatpush3.bf16.msra.mxu1 %v7587_v60  ;;  %v6640_v53 = vld [vmem:[%s8861_s1 + $0x38] ss:$12 sps:$4 sm:$0xff]   ;;  %v6642_v60 = vld [vmem:[%s8861_s1 + $0x68] ss:$12 sps:$4 sm:$0xff]  }
 0x6d4   :  { %1302 = vmatprep.subr.bf16.mxu0 %v7593_v63  ;;  %5801 = vmatprep.subr.bf16.mxu1 %v8875_v0  ;;  %v6643_v63 = vld [vmem:[%s8861_s1 + $0x80] ss:$12 sps:$4 sm:$0xff]  }
 0x6d5   :  { %1332 = vmatprep.mubr.bf16.mxu0 %v8876_v2  ;;  %5815 = vmatprep.mubr.msk.bf16.mxu1 %vm6816_vm1, %v8875_v0  ;;  %v6641_v2 = vld [vmem:[%s8861_s1 + $0x50] ss:$12 sps:$4 sm:$0xff]  }
 0x6d7   :  { %1303 = vmatpush1.bf16.msra.mxu0 %v7603_v3  ;;  %5802 = vmatpush3.bf16.msra.mxu1 %v7609_v54  ;;  %v6644_v3 = vld [vmem:[%s8861_s1 + $0x90] ss:$12 sps:$4 sm:$0xff]   ;;  %v6645_v54 = vld [vmem:[%s8861_s1 + $0x98] ss:$12 sps:$4 sm:$0xff]  }
 0x6d8   :  { %1304 = vmatprep.subr.bf16.mxu0 %v7615_v59  ;;  %5803 = vmatprep.subr.bf16.mxu1 %v8875_v0  ;;  %v6646_v59 = vld [vmem:[%s8861_s1 + $0xac] ss:$12 sps:$4 sm:$0xff]  }
 0x6db   :  { %1305 = vmatpush1.bf16.msra.mxu0 %v7622_v5  ;;  %5804 = vmatpush3.bf16.msra.mxu1 %v6640_v53  ;;  %v6647_v5 = vld [vmem:[%s8861_s1 + $0xa8] ss:$12 sps:$4 sm:$0xff]  }
 0x6dc   :  { %1306 = vmatprep.subr.bf16.mxu0 %v7629_v4  ;;  %5805 = vmatprep.subr.bf16.mxu1 %v8875_v0  ;;  %v6648_v4 = vld [vmem:[%s8861_s1 + $0xb0] ss:$12 sps:$4 sm:$0xff]  }
 0x6df   :  { %1307 = vmatpush1.bf16.msra.mxu0 %v7636_v7  ;;  %5806 = vmatpush3.bf16.msra.mxu1 %v6641_v2 }
 0x6e0   :  { %1308 = vmatprep.subr.bf16.mxu0 %v7643_v34  ;;  %5807 = vmatprep.subr.bf16.mxu1 %v8875_v0 }
 0x6e3   :  { %1309 = vmatpush1.bf16.msra.mxu0 %v7650_v17  ;;  %5808 = vmatpush3.bf16.msra.mxu1 %v6642_v60 }
 0x6e4   :  { %1310 = vmatprep.subr.bf16.mxu0 %v7657_v38  ;;  %5809 = vmatprep.subr.bf16.mxu1 %v8875_v0 }
 0x6e7   :  { %1311 = vmatpush1.bf16.msra.mxu0 %v7664_v10  ;;  %5810 = vmatpush3.bf16.msra.mxu1 %v6643_v63 }
 0x6e8   :  { %1312 = vmatprep.subr.bf16.mxu0 %v7671_v41  ;;  %5811 = vmatprep.subr.bf16.mxu1 %v8875_v0 }
 0x6eb   :  { %1313 = vmatpush1.bf16.msra.mxu0 %v6644_v3  ;;  %5812 = vmatpush3.bf16.msra.mxu1 %v6645_v54 }
 0x6ec   :  { %1314 = vmatprep.subr.bf16.mxu0 %v6646_v59  ;;  %5813 = vmatprep.subr.bf16.mxu1 %v8875_v0 }
 0x6ef   :  { %1315 = vmatpush1.bf16.msra.mxu0 %v6647_v5  ;;  %5814 = vmatpush3.bf16.msra.mxu1 %v6648_v4  ;;  %v8884_v5 = vld [vmem:[#allocation23_spill] sm:$0xff] }
 0x6f0   :  { %5819 = vmatprep.subr.bf16.mxu0 %v8875_v0  ;;  %5831 = vmatprep.subr.bf16.mxu1 %v6399_v57 }
 0x7a5   :  { %v1229_v7 = vpop.f32.mrb[40].mxu0  ;;  %v1270_v34 = vpop.f32.mrb[32].mxu1 }
 0x7a6   :  { %v1230_v17 = vadd.f32 %v1229_v7, %v7356_v62  ;;  %v1231_v38 = vpop.f32.mrb[41].mxu0  ;;  %v5797_v10 = vpop.f32.mrb[33].mxu1  ;;  %v1271_v9 = vadd.f32 %v1270_v34, %v7364_v52 }
 0x7a7   :  { %v1232_v41 = vadd.f32 %v1231_v38, %v7358_v1  ;;  %v1233_v11 = vpop.f32.mrb[42].mxu0  ;;  %v1273_v14 = vpop.f32.mrb[34].mxu1 }
 0x7a8   :  { %v1276_v36 = vadd.f32 %v1230_v17, %v8880_v18  ;;  %v1234_v44 = vpop.f32.mrb[43].mxu0  ;;  %v5798_v19 = vpop.f32.mrb[35].mxu1  ;;  %v8885_v17 = vld [vmem:[#allocation24_spill] sm:$0xff] }
 0x7a9   :  { %v1283_v20 = vadd.f32 %v1232_v41, %v8881_v37  ;;  %v8886_v19 = vld [vmem:[#allocation19_spill] sm:$0xff] }
 0x7aa   :  { %v5255_v23 = vmul.f32 -1.442695, %v1276_v36 }
 0x7ab   :  { %v5256_v24 = vmul.f32 -1.442695, %v1283_v20  ;;  %v6398_v20 = vld [vmem:[%s8883_s6 + $0x18] sm:$0xff]  }
 0x7ac   :  { %6475 = vpow2.f32 %v5255_v23 }
 0x7ad   :  { %6477 = vpow2.f32 %v5256_v24 }
 0x7b6   :  { %v6476_v39 = vpop.eup %6475 }
 0x7b7   :  { %v1280_v27 = vadd.f32 1.0, %v6476_v39  ;;  %v6478_v45 = vpop.eup %6477 }
 0x7b8   :  { %v1287_v28 = vadd.f32 1.0, %v6478_v45 }
 0x7b9   :  { %6479 = vrcp.f32 %v1280_v27 }
 0x7ba   :  { %6481 = vrcp.f32 %v1287_v28 }
 0x7c3   :  { %v6480_v30 = vpop.eup %6479 }
 0x7c4   :  { %v1290_v31 = vmul.f32 %v6480_v30, %v1271_v9  ;;  %v6482_v49 = vpop.eup %6481  ;;  %v1498_v30 = vld [vmem:[%s8887_s23] sm:$0xff]  ;;  %s8889_s23 = sld [smem:[#allocation33_spill]] }
 0x7c5   :  { %v1293_v35 = vsub.f32 1.0, %v6482_v49  ;;  %v1295_v42 = vmul.f32 %v6482_v49, %v7690_v29  ;;  %v6340_v49 = vpack.i.bf16 %v5245_v22, %v5248_v25 }
 0x7c6   :  { %v1291_v46 = vadd.f32 %v1290_v31, %v8882_v33 }
 0x7c8   :  { %6483 = vtanh.f32 %v1291_v46  ;;  %v6330_v46 = vpack.i.bf16 %v5251_v48, %v5254_v51 }
 0x7d2   :  { %v6484_v6 = vpop.eup %6483 }
 0x7d3   :  { %v1294_v56 = vmul.f32 %v6484_v6, %v1293_v35  ;;  %v6350_v35 = vpack.i.bf16 %v5239_v50, %v5242_v12  ;;  %v6401_v50 = vld [vmem:[%s8822_s11 + $0x10] sm:$0xff]   ;;  %v6402_v12 = vld [vmem:[%s8822_s11 + $0x18] sm:$0xff]  }
 0x7d5   :  { %v1296_v40 = vadd.f32 %v1295_v42, %v1294_v56 }
 0x7d7   :  { %v1299_v58 = vpack.c.bf16 %v1296_v40, %v1296_v40 }
 0x7d9   :  { %1333 = vmatmul.mubr.bf16.vlgmr.msra.gmra.mrb[44].mxu0 %v1299_v58  ;;  %5816 = vmatmul.mubr.bf16.vlgmr.msra.gmra.mrb[36].mxu1 %v1299_v58 }
 0x7da   :  { %5827 = vmatprep.mubr.msk.bf16.mxu0 %vm6816_vm1, %v8875_v0  ;;  %5820 = vmatpush3.bf16.msra.mxu0 %v6395_v21 }
 0x7db   :  { %5821 = vmatprep.subr.bf16.mxu0 %v8875_v0  ;;  %5832 = vmatpush3.bf16.msra.mxu1 %v6399_v57 }
 0x7dc   :  { %5833 = vmatprep.subr.bf16.mxu1 %v6400_v47 }
 0x7de   :  { %5822 = vmatpush3.bf16.msra.mxu0 %v6396_v8 }
 0x7df   :  { %5823 = vmatprep.subr.bf16.mxu0 %v8875_v0  ;;  %5834 = vmatpush3.bf16.msra.mxu1 %v6400_v47 }
 0x7e0   :  { %5835 = vmatprep.subr.bf16.mxu1 %v6401_v50 }
 0x7e2   :  { %5824 = vmatpush3.bf16.msra.mxu0 %v6397_v15 }
 0x7e3   :  { %5825 = vmatprep.subr.bf16.mxu0 %v8875_v0  ;;  %5836 = vmatpush3.bf16.msra.mxu1 %v6401_v50 }
 0x7e4   :  { %5837 = vmatprep.subr.bf16.mxu1 %v6402_v12 }
 0x7e6   :  { %5826 = vmatpush3.bf16.msra.mxu0 %v6398_v20 }
 0x7e7   :  { %5855 = vmatprep.subr.bf16.mxu0 %v8875_v0  ;;  %5838 = vmatpush3.bf16.msra.mxu1 %v6402_v12 }
 0x7e8   :  { %5847 = vmatprep.subr.bf16.mxu1 %v8875_v0 }
 0x8ac   :  { %v1334_v32 = vpop.f32.mrb[44].mxu0  ;;  %v1375_v53 = vpop.f32.mrb[36].mxu1 }
 0x8ad   :  { %v1335_v2 = vadd.f32 %v1334_v32, %v7356_v62  ;;  %v1336_v60 = vpop.f32.mrb[45].mxu0  ;;  %v5817_v63 = vpop.f32.mrb[37].mxu1  ;;  %v1376_v36 = vadd.f32 %v1375_v53, %v7364_v52  ;;  %v5257_v52 = vclamps-f32 %v1296_v40, 5.0 }
 0x8ae   :  { %v1337_v3 = vadd.f32 %v1336_v60, %v7358_v1  ;;  %v1338_v54 = vpop.f32.mrb[46].mxu0  ;;  %v1378_v59 = vpop.f32.mrb[38].mxu1 }
 0x8af   :  { %v1381_v4 = vadd.f32 %v1335_v2, %v8884_v5  ;;  %v1339_v7 = vpop.f32.mrb[47].mxu0  ;;  %v5818_v34 = vpop.f32.mrb[39].mxu1 }
 0x8b0   :  { %v1388_v38 = vadd.f32 %v1337_v3, %v8885_v17 }
 0x8b1   :  { %v5258_v10 = vmul.f32 -1.442695, %v1381_v4 }
 0x8b2   :  { %v5259_v41 = vmul.f32 -1.442695, %v1388_v38 }
 0x8b3   :  { %6485 = vpow2.f32 %v5258_v10 }
 0x8b4   :  { %6487 = vpow2.f32 %v5259_v41 }
 0x8bd   :  { %v6486_v11 = vpop.eup %6485 }
 0x8be   :  { %v1385_v14 = vadd.f32 1.0, %v6486_v11  ;;  %v6488_v62 = vpop.eup %6487 }
 0x8bf   :  { %v1392_v18 = vadd.f32 1.0, %v6488_v62 }
 0x8c0   :  { %6489 = vrcp.f32 %v1385_v14  ;;  %v7844_v14 = vld [vmem:[#allocation10] sm:$0xff]  }
 0x8c1   :  { %6491 = vrcp.f32 %v1392_v18 }
 0x8ca   :  { %v6490_v1 = vpop.eup %6489 }
 0x8cb   :  { %v1395_v44 = vmul.f32 %v6490_v1, %v1376_v36  ;;  %v6492_v23 = vpop.eup %6491 }
 0x8cc   :  { %v1398_v24 = vsub.f32 1.0, %v6492_v23  ;;  %v1400_v45 = vmul.f32 %v6492_v23, %v1296_v40 }
 0x8cd   :  { %v1396_v37 = vadd.f32 %v1395_v44, %v8886_v19 }
 0x8cf   :  { %6493 = vtanh.f32 %v1396_v37 }
 0x8d9   :  { %v6494_v39 = vpop.eup %6493 }
 0x8da   :  { %v1399_v27 = vmul.f32 %v6494_v39, %v1398_v24  ;;  %v7850_v24 = vld [vmem:[#allocation10 + $0x8] sm:$0xff]  }
 0x8dc   :  { %v1401_v28 = vadd.f32 %v1400_v45, %v1399_v27 }
 0x8de   :  { %1405 = vrot.lane.b32.xlu0 %v1401_v28, %s6817_s4  ;;  %v5260_v9 = vclamps-f32 %v1401_v28, 5.0 }
 0x8e0   :  { %v6345_v31 = vpack.i.bf16 %v5260_v9, %v5257_v52  ;;  %v6320_v33 = vpack.i.bf16 %v5257_v52, %v5260_v9 }
 0x8e2   :  { %1500 = vrot.lane.b32.xlu0 %v1498_v30, %s6818_s2 }
 0x8e6   :  { %6321 = vrot.lane.b32.xlu0 %v6320_v33, %s6809_s3 }
 0x8ea   :  { %6331 = vrot.lane.b32.xlu0 %v6330_v46, %s6809_s3  ;;  %v7864_v46 = vld [vmem:[%s8823_s12] sm:$0xff]  }
 0x8ee   :  { %6341 = vrot.lane.b32.xlu0 %v6340_v49, %s6809_s3  ;;  %v7871_v49 = vld [vmem:[%s8823_s12 + $0x8] sm:$0xff]  }
 0x8f2   :  { %6351 = vrot.lane.b32.xlu0 %v6350_v35, %s6809_s3  ;;  %v5279_v35 = vld [vmem:[%s8889_s23] ss:$0 sm:$0xff] }
 0x950   :  { %v1406_v29 = vpop.permute.xlu0 %1405 }
 0x951   :  { %v1408_v61 = vsel %vm229_vm0, %v1401_v28, %v1406_v29  ;;  %v1795_v29 = vpack.c.bf16 %v5279_v35, %v5279_v35 }
 0x952   :  { %v5261_v48 = vclamps-f32 %v1408_v61, 5.0 }
 0x954   :  { %v1419_v51 = vpack.c.bf16 %v5261_v48, %v5261_v48  ;;  %v1501_v58 = vpop.permute.xlu0 %1500 }
 0x956   :  { %5828 = vmatmul.mubr.msk.bf16.vlgmr.msra.gmra.mrb[48].mxu0 %vm1451_vm2, %v1419_v51 }
 0x957   :  { %5859 = vmatprep.mubr.msk.bf16.mxu0 %vm6816_vm1, %v8875_v0  ;;  %5856 = vmatpush3.bf16.msra.mxu0 %v7864_v46 }
 0x958   :  { %v6322_v8 = vpop.permute.xlu0 %6321  ;;  %5857 = vmatprep.subr.bf16.mxu0 %v8875_v0 }
 0x959   :  { %v6324_v60 = vunpack.i.h.bf16 %v6322_v8  ;;  %v6323_v63 = vunpack.i.l.bf16 %v6322_v8  ;;  %v7905_v8 = vld [vmem:[%s8825_s14] sm:$0xff]  }
 0x95b   :  { %5858 = vmatpush3.bf16.msra.mxu0 %v7871_v49 }
 0x95c   :  { %v6332_v2 = vpop.permute.xlu0 %6331  ;;  %5871 = vmatprep.subr.bf16.mxu0 %v8875_v0 }
 0x95d   :  { %v6334_v34 = vunpack.i.h.bf16 %v6332_v2  ;;  %v6333_v17 = vunpack.i.l.bf16 %v6332_v2 }
 0x95e   :  { %5860 = vmatmul.mubr.msk.bf16.vlgmr.msra.gmra.mrb[52].mxu0 %vm229_vm0, %v1795_v29 }
 0x95f   :  { %5875 = vmatprep.mubr.msk.bf16.mxu0 %vm6816_vm1, %v8875_v0 }
 0x960   :  { %v6342_v5 = vpop.permute.xlu0 %6341 }
 0x961   :  { %v6344_v36 = vunpack.i.h.bf16 %v6342_v5  ;;  %v6343_v1 = vunpack.i.l.bf16 %v6342_v5 }
 0x964   :  { %v6352_v37 = vpop.permute.xlu0 %6351 }
 0x965   :  { %v6354_v45 = vunpack.i.h.bf16 %v6352_v37  ;;  %v6353_v28 = vunpack.i.l.bf16 %v6352_v37 }
 0xa29   :  { %v1489_v13 = vpop.f32.mrb[48].mxu0 }
 0xa2a   :  { %v1490_v22 = vadd.f32 %v5262_v55, %v1489_v13  ;;  %v5829_v25 = vpop.f32.mrb[49].mxu0 }
 0xa2b   :  { %v1492_v6 = vpop.f32.mrb[50].mxu0 }
 0xa2c   :  { %1505 = vrot.lane.b32.xlu1 %v1490_v22, %s6818_s2  ;;  %v5830_v56 = vpop.f32.mrb[51].mxu0  ;;  %v1495_v42 = vmul.f32 0.5, %v1490_v22 }
 0xa2e   :  { %v1496_v40 = vmul.f32 1.442695, %v1495_v42 }
 0xa30   :  { %6316 = vrot.lane.b32.xlu1 %v7425_v26, %s6817_s4  ;;  %6495 = vpow2.f32 %v1496_v40 }
 0xa31   :  { %v1845_v22 = vpop.f32.mrb[52].mxu0 }
 0xa32   :  { %v5861_v25 = vpop.f32.mrb[53].mxu0 }
 0xa33   :  { %v1848_v6 = vpop.f32.mrb[54].mxu0 }
 0xa34   :  { %6326 = vrot.lane.b32.xlu1 %v7525_v16, %s6817_s4  ;;  %v5862_v56 = vpop.f32.mrb[55].mxu0 }
 0xa38   :  { %6336 = vrot.lane.b32.xlu1 %v7700_v43, %s6817_s4 }
 0xa3a   :  { %v6496_v21 = vpop.eup %6495 }
 0xa3b   :  { %v1503_v15 = vmul.f32 %v6496_v21, %v1501_v58 }
 0xa3c   :  { %6346 = vrot.lane.b32.xlu1 %v6345_v31, %s6817_s4 }
 0xa9e   :  { %v1506_v32 = vpop.permute.xlu1 %1505 }
 0xa9f   :  { %v7834_v53 = vadd.f32 %v1506_v32, %v1503_v15  ;;  %v7911_v15 = vld [vmem:[%s8825_s14 + $0x8] sm:$0xff]  }
 0xaa1   :  { %v1724_v26 = vpack.c.bf16 %v7834_v53, %v7834_v53 }
 0xaa2   :  { %v6317_v16 = vpop.permute.xlu1 %6316 }
 0xaa3   :  { %v6319_v43 = vunpack.i.h.bf16 %v6317_v16  ;;  %v6318_v3 = vunpack.i.l.bf16 %v6317_v16  ;;  %1726 = vrot.lane.b32.xlu1 %v1724_v26, %s6817_s4  ;;  %v7919_v26 = vld [vmem:[%s8824_s13] ss:$0 sm:$0xff] }
 0xaa5   :  { %v1526_v54 = vsel %vm229_vm0, %v6319_v43, %v6324_v60  ;;  %v1517_v59 = vsel %vm229_vm0, %v6318_v3, %v6323_v63 }
 0xaa6   :  { %v6327_v4 = vpop.permute.xlu1 %6326  ;;  %v1581_v7 = vpack.c.bf16 %v1526_v54, %v1517_v59 }
 0xaa7   :  { %v6329_v38 = vunpack.i.h.bf16 %v6327_v4  ;;  %v6328_v10 = vunpack.i.l.bf16 %v6327_v4  ;;  %v5288_v4 = vld [vmem:[%s8826_s15] ss:$0 sm:$0xff] }
 0xaa8   :  { %5839 = vmatprep.mubr.msk.bf16.mxu1 %vm1451_vm2, %v1581_v7 }
 0xaa9   :  { %v1544_v41 = vsel %vm229_vm0, %v6329_v38, %v6334_v34  ;;  %v1535_v11 = vsel %vm229_vm0, %v6328_v10, %v6333_v17 }
 0xaaa   :  { %v1582_v62 = vpack.c.bf16 %v1544_v41, %v1535_v11  ;;  %v6337_v18 = vpop.permute.xlu1 %6336 }
 0xaab   :  { %v6339_v44 = vunpack.i.h.bf16 %v6337_v18  ;;  %v6338_v19 = vunpack.i.l.bf16 %v6337_v18  ;;  %v7937_v18 = vld [vmem:[%s8827_s16] sm:$0xff]  }
 0xaac   :  { %5840 = vmatmul.mubr.msk.bf16.vlgmr.msra.gmra.mrb[40].mxu1 %vm1451_vm2, %v1582_v62  ;;  %5872 = vmatpush3.bf16.msra.mxu0 %v7937_v18 }
 0xaad   :  { %v1558_v20 = vsel %vm229_vm0, %v6339_v44, %v6344_v36  ;;  %v1551_v23 = vsel %vm229_vm0, %v6338_v19, %v6343_v1  ;;  %5848 = vmatpush3.bf16.msra.mxu1 %v7844_v14  ;;  %v7943_v36 = vld [vmem:[%s8827_s16 + $0x8] sm:$0xff]   ;;  %5873 = vmatprep.subr.bf16.mxu0 %v8875_v0 }
 0xaae   :  { %v6347_v39 = vpop.permute.xlu1 %6346  ;;  %v1583_v27 = vpack.c.bf16 %v1558_v20, %v1551_v23  ;;  %5849 = vmatprep.subr.bf16.mxu1 %v8875_v0 }
 0xaaf   :  { %v6349_v52 = vunpack.i.h.bf16 %v6347_v39  ;;  %v6348_v9 = vunpack.i.l.bf16 %v6347_v39 }
 0xab0   :  { %5843 = vmatprep.mubr.msk.bf16.mxu1 %vm1451_vm2, %v1583_v27  ;;  %5874 = vmatpush3.bf16.msra.mxu0 %v7943_v36  ;;  %v1716_v27 = vld [vmem:[%s8890_s7] sm:$0xff] }
 0xab1   :  { %v1572_v30 = vsel %vm229_vm0, %v6349_v52, %v6354_v45  ;;  %v1565_v31 = vsel %vm229_vm0, %v6348_v9, %v6353_v28  ;;  %5850 = vmatpush3.bf16.msra.mxu1 %v7850_v24  ;;  %5885 = vmatprep.subr.bf16.mxu0 %v8875_v0  ;;  %v7958_v52 = vld [vmem:[#allocation6] sm:$0xff]  }
 0xab2   :  { %v1584_v33 = vpack.c.bf16 %v1572_v30, %v1565_v31  ;;  %5863 = vmatprep.subr.bf16.mxu1 %v8875_v0  ;;  %v7965_v30 = vld [vmem:[#allocation6 + $0x8] sm:$0xff]   ;;  %v1701_v31 = vld [vmem:[#allocation4] sm:$0x3] }
 0xab4   :  { %5844 = vmatmul.mubr.msk.bf16.gmra.mrb[44].mxu1 %vm1451_vm2, %v1584_v33  ;;  %v7980_v33 = vsel %vm2036_vm3, %v1701_v31, 0 }
 0xab5   :  { %5851 = vmatprep.mubr.msk.bf16.mxu1 %vm6816_vm1, %v8875_v0 }
 0xb15   :  { %v7881_v61 = vpop.permute.xlu1 %1726 }
 0xb16   :  { %5852 = vmatmul.mubr.msk.bf16.vlgmr.msra.gmra.mrb[48].mxu1 %vm229_vm0, %v7881_v61 }
 0xb17   :  { %5867 = vmatprep.mubr.msk.bf16.mxu1 %vm6816_vm1, %v8875_v0  ;;  %5864 = vmatpush3.bf16.msra.mxu1 %v7905_v8 }
 0xb18   :  { %5865 = vmatprep.subr.bf16.mxu1 %v8875_v0 }
 0xb1b   :  { %5866 = vmatpush3.bf16.msra.mxu1 %v7911_v15 }
 0xb1c   :  { %5879 = vmatprep.subr.bf16.mxu1 %v8875_v0 }
 0xb7f   :  { %v7887_v48 = vpop.f32.mrb[40].mxu1 }
 0xb80   :  { %v1655_v51 = vpop.f32.mrb[41].mxu1 }
 0xb81   :  { %v7889_v57 = vpop.f32.mrb[42].mxu1 }
 0xb82   :  { %v7891_v47 = vpop.f32.mrb[43].mxu1 }
 0xb87   :  { %v7893_v50 = vpop.f32.mrb[44].mxu1 }
 0xb88   :  { %v7895_v12 = vpop.f32.mrb[45].mxu1 }
 0xb89   :  { %v7897_v55 = vpop.f32.mrb[46].mxu1 }
 0xb8a   :  { %v7899_v13 = vpop.f32.mrb[47].mxu1 }
 0xbe9   :  { %v1777_v42 = vpop.f32.mrb[48].mxu1 }
 0xbea   :  { %1791 = vrot.lane.b32.xlu0 %v1777_v42, %s6819_s29  ;;  %v5853_v40 = vpop.f32.mrb[49].mxu1 }
 0xbeb   :  { %v1780_v58 = vpop.f32.mrb[50].mxu1 }
 0xbec   :  { %v5854_v21 = vpop.f32.mrb[51].mxu1 }
 0xbee   :  { %1932 = vrot.lane.b32.xlu0 %v5288_v4, %s6809_s3 }
 0xc5c   :  { %v1792_v32 = vpop.permute.xlu0 %1791 }
 0xc5d   :  { %v1794_v2 = vadd.f32 %v1792_v32, %v1655_v51 }
 0xc5f   :  { %v1851_v16 = vadd.f32 %v1845_v22, %v1794_v2 }
 0xc60   :  { %v7931_v41 = vpop.permute.xlu0 %1932 }
 0xc61   :  { %v1858_v60 = vadd.f32 %v7919_v26, %v1851_v16 }
 0xc63   :  { %v5284_v63 = vmul.f32 -1.442695, %v1858_v60 }
 0xc65   :  { %6497 = vpow2.f32 %v5284_v63 }
 0xc6f   :  { %v6498_v43 = vpop.eup %6497 }
 0xc70   :  { %v1862_v3 = vadd.f32 1.0, %v6498_v43 }
 0xc72   :  { %6499 = vrcp.f32 %v1862_v3 }
 0xc7c   :  { %v6500_v54 = vpop.eup %6499 }
 0xc7d   :  { %v1865_v59 = vmul.f32 %v6500_v54, %v5279_v35  ;;  %v1941_v19 = vsub.f32 1.0, %v6500_v54 }
 0xc7f   :  { %v1866_v5 = vpack.c.bf16 %v1865_v59, %v1865_v59  ;;  %v8001_v59 = vld [vmem:[#allocation7 + $0x8] sm:$0xff]  }
 0xc81   :  { %5868 = vmatmul.mubr.msk.bf16.vlgmr.msra.gmra.mrb[52].mxu1 %vm229_vm0, %v1866_v5  ;;  %v8009_v5 = vld [vmem:[%s8831_s20] ss:$0 sm:$0xff] }
 0xc82   :  { %5881 = vmatprep.mubr.msk.bf16.mxu1 %vm6816_vm1, %v8875_v0  ;;  %5880 = vmatpush3.bf16.msra.mxu1 %v7980_v33 }
 0xc83   :  { %5893 = vmatprep.subr.bf16.mxu1 %v8875_v0 }
 0xd54   :  { %v1916_v7 = vpop.f32.mrb[52].mxu1 }
 0xd55   :  { %1923 = vrot.lane.b32.xlu1 %v1916_v7, %s6809_s3  ;;  %v5869_v34 = vpop.f32.mrb[53].mxu1 }
 0xd56   :  { %v1919_v17 = vpop.f32.mrb[54].mxu1 }
 0xd57   :  { %v5870_v38 = vpop.f32.mrb[55].mxu1 }
 0xd59   :  { %1937 = vrot.lane.b32.xlu1 %v5279_v35, %s6818_s2  ;;  %v7984_v35 = vld [vmem:[#allocation2] ss:$0 sm:$0xff] }
 0xdc7   :  { %v1924_v10 = vpop.permute.xlu1 %1923 }
 0xdc8   :  { %v1926_v11 = vadd.f32 %v1924_v10, %v1794_v2 }
 0xdca   :  { %v1935_v62 = vadd.f32 %v7931_v41, %v1926_v11 }
 0xdcb   :  { %v1938_v44 = vpop.permute.xlu1 %1937 }
 0xdcc   :  { %6501 = vtanh.f32 %v1935_v62  ;;  %v1940_v20 = vmul.f32 %v6500_v54, %v1938_v44  ;;  %v7998_v54 = vld [vmem:[#allocation7] sm:$0xff]  }
 0xdd6   :  { %v6502_v1 = vpop.eup %6501 }
 0xdd7   :  { %1943 = vrot.lane.b32.xlu0 %v6502_v1, %s6817_s4 }
 0xddb   :  { %2019 = vrot.lane.b32.xlu0 %v1716_v27, %s6810_s30 }
 0xe49   :  { %v1944_v37 = vpop.permute.xlu0 %1943 }
 0xe4a   :  { %v1946_v23 = vmul.f32 %v1944_v37, %v1941_v19 }
 0xe4c   :  { %v1947_v39 = vadd.f32 %v1946_v23, %v1940_v20  ;;  %v5303_v23 = vld [vmem:[#allocation9] ss:$0 sm:$0xff] }
 0xe4d   :  { %v2020_v2 = vpop.permute.xlu0 %2019 }
 0xe4e   :  { %v7952_v45 = vclamps-f32 %v1947_v39, 5.0 }
 0xe50   :  { %v1950_v28 = vpack.c.bf16 %v7952_v45, %v7952_v45 }
 0xe52   :  { %1958 = vrot.lane.b32.xlu1 %v1950_v28, %s6817_s4 }
 0xec4   :  { %v7960_v9 = vpop.permute.xlu1 %1958 }
 0xec5   :  { %5876 = vmatmul.mubr.msk.bf16.vlgmr.msra.gmra.mrb[56].mxu0 %vm229_vm0, %v7960_v9 }
 0xec6   :  { %5886 = vmatpush3.bf16.msra.mxu0 %v7958_v52  ;;  %5889 = vmatprep.mubr.msk.bf16.mxu0 %vm6816_vm1, %v8875_v0 }
 0xec7   :  { %5887 = vmatprep.subr.bf16.mxu0 %v8875_v0 }
 0xeca   :  { %5888 = vmatpush3.bf16.msra.mxu0 %v7965_v30 }
 0xecb   :  { %5901 = vmatprep.subr.bf16.mxu0 %v8875_v0 }
 0xecd   :  { %5890 = vmatmul.mubr.msk.bf16.vlgmr.msra.gmra.mrb[60].mxu0 %vm229_vm0, %v7881_v61 }
 0xece   :  { %5902 = vmatpush3.bf16.msra.mxu0 %v7844_v14  ;;  %5905 = vmatprep.mubr.msk.bf16.mxu0 %vm6816_vm1, %v8875_v0 }
 0xecf   :  { %5903 = vmatprep.subr.bf16.mxu0 %v8875_v0 }
 0xed2   :  { %5904 = vmatpush3.bf16.msra.mxu0 %v7850_v24 }
 0xed3   :  { %5917 = vmatprep.subr.bf16.mxu0 %v8875_v0 }
 0xf98   :  { %v2009_v29 = vpop.f32.mrb[56].mxu0 }
 0xf99   :  { %v2010_v61 = vadd.f32 %v7984_v35, %v2009_v29  ;;  %v5877_v51 = vpop.f32.mrb[57].mxu0 }
 0xf9a   :  { %v2012_v22 = vpop.f32.mrb[58].mxu0 }
 0xf9b   :  { %2024 = vrot.lane.b32.xlu1 %v2010_v61, %s6810_s30  ;;  %v5878_v25 = vpop.f32.mrb[59].mxu0  ;;  %v2015_v58 = vmul.f32 0.5, %v2010_v61 }
 0xf9d   :  { %v2016_v21 = vmul.f32 1.442695, %v2015_v58 }
 0xf9f   :  { %2147 = vrot.lane.b32.xlu1 %v7834_v53, %s6817_s4  ;;  %6503 = vpow2.f32 %v2016_v21 }
 0xfa0   :  { %v2126_v6 = vpop.f32.mrb[60].mxu0 }
 0xfa1   :  { %v5891_v56 = vpop.f32.mrb[61].mxu0 }
 0xfa2   :  { %v2129_v42 = vpop.f32.mrb[62].mxu0 }
 0xfa3   :  { %v5892_v40 = vpop.f32.mrb[63].mxu0  ;;  %2217 = vrot.lane.b32.xlu1 %v5303_v23, %s6809_s3 }
 0xfa9   :  { %v6504_v32 = vpop.eup %6503 }
 0xfaa   :  { %v2022_v16 = vmul.f32 %v6504_v32, %v2020_v2 }
0x100d   :  { %v2025_v60 = vpop.permute.xlu1 %2024 }
0x100e   :  { %v7990_v63 = vadd.f32 %v2025_v60, %v2022_v16 }
0x1010   :  { %v2028_v43 = vpack.c.bf16 %v7990_v63, %v7990_v63 }
0x1011   :  { %v2148_v19 = vpop.permute.xlu1 %2147 }
0x1012   :  { %2030 = vrot.lane.b32.xlu0 %v2028_v43, %s6820_s28 }
0x1015   :  { %v8029_v25 = vpop.permute.xlu1 %2217 }
0x1084   :  { %v2031_v3 = vpop.permute.xlu0 %2030 }
0x1085   :  { %5882 = vmatmul.mubr.msk.bf16.vlgmr.msra.gmra.mrb[56].mxu1 %vm2032_vm4, %v2031_v3 }
0x1086   :  { %5897 = vmatprep.mubr.msk.bf16.mxu1 %vm6816_vm1, %v8875_v0  ;;  %5894 = vmatpush3.bf16.msra.mxu1 %v7998_v54 }
0x1087   :  { %5895 = vmatprep.subr.bf16.mxu1 %v8875_v0 }
0x108a   :  { %5896 = vmatpush3.bf16.msra.mxu1 %v8001_v59 }
0x108b   :  { %5909 = vmatprep.subr.bf16.mxu1 %v8875_v0 }
0x1158   :  { %v2074_v4 = vpop.f32.mrb[56].mxu1 }
0x1159   :  { %v2132_v7 = vadd.f32 %v2126_v6, %v2074_v4  ;;  %v5883_v34 = vpop.f32.mrb[57].mxu1 }
0x115a   :  { %v2077_v17 = vpop.f32.mrb[58].mxu1 }
0x115b   :  { %v2139_v38 = vadd.f32 %v8009_v5, %v2132_v7  ;;  %v5884_v10 = vpop.f32.mrb[59].mxu1 }
0x115d   :  { %v5299_v11 = vmul.f32 -1.442695, %v2139_v38 }
0x115f   :  { %6505 = vpow2.f32 %v5299_v11 }
0x1169   :  { %v6506_v62 = vpop.eup %6505 }
0x116a   :  { %v2143_v1 = vadd.f32 1.0, %v6506_v62 }
0x116c   :  { %6507 = vrcp.f32 %v2143_v1 }
0x1176   :  { %v6508_v44 = vpop.eup %6507 }
0x1177   :  { %v2150_v37 = vmul.f32 %v6508_v44, %v2148_v19  ;;  %v2223_v40 = vsub.f32 1.0, %v6508_v44  ;;  %v2222_v21 = vmul.f32 %v6508_v44, %v7834_v53 }
0x1179   :  { %v2151_v20 = vpack.c.bf16 %v2150_v37, %v2150_v37 }
0x117b   :  { %5898 = vmatmul.mubr.msk.bf16.vlgmr.msra.gmra.mrb[60].mxu1 %vm229_vm0, %v2151_v20 }
0x117c   :  { %5910 = vmatpush3.bf16.msra.mxu1 %v7864_v46  ;;  %5913 = vmatprep.mubr.msk.bf16.mxu1 %vm6816_vm1, %v8875_v0 }
0x117d   :  { %5911 = vmatprep.subr.bf16.mxu1 %v8875_v0 }
0x1180   :  { %5912 = vmatpush3.bf16.msra.mxu1 %v7871_v49 }
0x1181   :  { %5925 = vmatprep.subr.bf16.mxu1 %v8875_v0 }
0x1183   :  { %5914 = vmatmul.mubr.msk.bf16.vlgmr.msra.gmra.mrb[64].mxu1 %vm229_vm0, %v7960_v9 }
0x1184   :  { %5926 = vmatpush3.bf16.msra.mxu1 %v7937_v18  ;;  %5929 = vmatprep.mubr.msk.bf16.mxu1 %vm6816_vm1, %v8875_v0 }
0x1185   :  { %5927 = vmatprep.subr.bf16.mxu1 %v8875_v0 }
0x1188   :  { %5928 = vmatpush3.bf16.msra.mxu1 %v7943_v36 }
0x1189   :  { %5939 = vmatprep.subr.bf16.mxu1 %v8875_v0 }
0x124e   :  { %v2201_v39 = vpop.f32.mrb[60].mxu1 }
0x124f   :  { %2208 = vrot.lane.b32.xlu0 %v2201_v39, %s6809_s3  ;;  %v5899_v27 = vpop.f32.mrb[61].mxu1 }
0x1250   :  { %v2204_v28 = vpop.f32.mrb[62].mxu1 }
0x1251   :  { %v5900_v9 = vpop.f32.mrb[63].mxu1 }
0x1256   :  { %v2318_v31 = vpop.f32.mrb[64].mxu1 }
0x1257   :  { %v5915_v29 = vpop.f32.mrb[65].mxu1 }
0x1258   :  { %v2321_v61 = vpop.f32.mrb[66].mxu1 }
0x1259   :  { %v5916_v51 = vpop.f32.mrb[67].mxu1 }
0x12c1   :  { %v2209_v22 = vpop.permute.xlu0 %2208 }
0x12c2   :  { %v2211_v6 = vadd.f32 %v2209_v22, %v2074_v4 }
0x12c4   :  { %v2220_v56 = vadd.f32 %v8029_v25, %v2211_v6 }
0x12c6   :  { %6509 = vtanh.f32 %v2220_v56 }
0x12d0   :  { %v6510_v42 = vpop.eup %6509 }
0x12d1   :  { %2225 = vrot.lane.b32.xlu0 %v6510_v42, %s6817_s4  ;;  %v1717_v42 = vld [vmem:[%s8890_s7 + $0x8] sm:$0xff] }
0x1343   :  { %v2226_v58 = vpop.permute.xlu0 %2225 }
0x1344   :  { %v2228_v32 = vmul.f32 %v2226_v58, %v2223_v40 }
0x1346   :  { %v2229_v2 = vadd.f32 %v2228_v32, %v2222_v21 }
0x1348   :  { %v8034_v16 = vclamps-f32 %v2229_v2, 5.0 }
0x134a   :  { %v2232_v60 = vpack.c.bf16 %v8034_v16, %v8034_v16 }
0x134c   :  { %2234 = vrot.lane.b32.xlu1 %v2232_v60, %s6817_s4 }
0x1350   :  { %2333 = vrot.lane.b32.xlu1 %v7952_v45, %s6817_s4 }
0x13be   :  { %v2235_v43 = vpop.permute.xlu1 %2234 }
0x13bf   :  { %5906 = vmatmul.mubr.msk.bf16.vlgmr.msra.gmra.mrb[64].mxu0 %vm229_vm0, %v2235_v43 }
0x13c0   :  { %5918 = vmatpush3.bf16.msra.mxu0 %v7905_v8  ;;  %5921 = vmatprep.mubr.msk.bf16.mxu0 %vm6816_vm1, %v8875_v0 }
0x13c1   :  { %5919 = vmatprep.subr.bf16.mxu0 %v8875_v0 }
0x13c2   :  { %v2334_v19 = vpop.permute.xlu1 %2333 }
0x13c4   :  { %5920 = vmatpush3.bf16.msra.mxu0 %v7911_v15 }
0x13c5   :  { %5933 = vmatprep.subr.bf16.mxu0 %v8875_v0 }
0x1492   :  { %v8048_v53 = vpop.f32.mrb[64].mxu0 }
0x1493   :  { %2280 = vrot.lane.b32.xlu0 %v8048_v53, %s6819_s29  ;;  %v5907_v3 = vpop.f32.mrb[65].mxu0 }
0x1494   :  { %v2276_v4 = vpop.f32.mrb[66].mxu0 }
0x1495   :  { %v5908_v7 = vpop.f32.mrb[67].mxu0 }
0x1505   :  { %v2281_v34 = vpop.permute.xlu0 %2280 }
0x1506   :  { %v2283_v17 = vadd.f32 %v2281_v34, %v7891_v47 }
0x1508   :  { %v2324_v38 = vadd.f32 %v2318_v31, %v2283_v17 }
0x150a   :  { %v2325_v10 = vadd.f32 %v7919_v26, %v2324_v38 }
0x150c   :  { %v5307_v11 = vmul.f32 -1.442695, %v2325_v10 }
0x150e   :  { %6511 = vpow2.f32 %v5307_v11 }
0x1518   :  { %v6512_v62 = vpop.eup %6511 }
0x1519   :  { %v2329_v1 = vadd.f32 1.0, %v6512_v62 }
0x151b   :  { %6513 = vrcp.f32 %v2329_v1 }
0x1525   :  { %v6514_v44 = vpop.eup %6513 }
0x1526   :  { %v2336_v37 = vmul.f32 %v6514_v44, %v2334_v19  ;;  %v2389_v61 = vsub.f32 1.0, %v6514_v44  ;;  %v2388_v22 = vmul.f32 %v6514_v44, %v7952_v45 }
0x1528   :  { %v2337_v20 = vpack.c.bf16 %v2336_v37, %v2336_v37 }
0x152a   :  { %5922 = vmatmul.mubr.msk.bf16.vlgmr.msra.gmra.mrb[68].mxu0 %vm229_vm0, %v2337_v20 }
0x152b   :  { %5934 = vmatpush3.bf16.msra.mxu0 %v7980_v33  ;;  %5935 = vmatprep.mubr.msk.bf16.mxu0 %vm6816_vm1, %v8875_v0 }
0x152c   :  { %5947 = vmatprep.subr.bf16.mxu0 %v8875_v0 }
0x15fd   :  { %v2375_v47 = vpop.f32.mrb[68].mxu0 }
0x15fe   :  { %2382 = vrot.lane.b32.xlu0 %v2375_v47, %s6809_s3  ;;  %v5923_v23 = vpop.f32.mrb[69].mxu0 }
0x15ff   :  { %v2378_v39 = vpop.f32.mrb[70].mxu0 }
0x1600   :  { %v5924_v27 = vpop.f32.mrb[71].mxu0 }
0x1670   :  { %v2383_v28 = vpop.permute.xlu0 %2382 }
0x1671   :  { %v2385_v9 = vadd.f32 %v2383_v28, %v2283_v17 }
0x1673   :  { %v2386_v31 = vadd.f32 %v2385_v9, %v7931_v41 }
0x1675   :  { %6515 = vtanh.f32 %v2386_v31 }
0x167f   :  { %v6516_v29 = vpop.eup %6515 }
0x1680   :  { %2391 = vrot.lane.b32.xlu1 %v6516_v29, %s6817_s4 }
0x1684   :  { %2449 = vrot.lane.b32.xlu1 %v1717_v42, %s6810_s30 }
0x16f2   :  { %v2392_v51 = vpop.permute.xlu1 %2391 }
0x16f3   :  { %v2394_v6 = vmul.f32 %v2392_v51, %v2389_v61 }
0x16f5   :  { %v2395_v56 = vadd.f32 %v2394_v6, %v2388_v22 }
0x16f6   :  { %v2450_v11 = vpop.permute.xlu1 %2449 }
0x16f7   :  { %v8066_v40 = vclamps-f32 %v2395_v56, 5.0 }
0x16f9   :  { %v2398_v58 = vpack.c.bf16 %v8066_v40, %v8066_v40 }
0x16fb   :  { %2400 = vrot.lane.b32.xlu0 %v2398_v58, %s6817_s4 }
0x176d   :  { %v2401_v21 = vpop.permute.xlu0 %2400 }
0x176e   :  { %5930 = vmatmul.mubr.msk.bf16.vlgmr.msra.gmra.mrb[68].mxu1 %vm229_vm0, %v2401_v21 }
0x176f   :  { %5940 = vmatpush3.bf16.msra.mxu1 %v7958_v52  ;;  %5943 = vmatprep.mubr.msk.bf16.mxu1 %vm6816_vm1, %v8875_v0 }
0x1770   :  { %5941 = vmatprep.subr.bf16.mxu1 %v8875_v0 }
0x1773   :  { %5942 = vmatpush3.bf16.msra.mxu1 %v7965_v30 }
0x1774   :  { %5955 = vmatprep.subr.bf16.mxu1 %v8875_v0 }
0x1776   :  { %5944 = vmatmul.mubr.msk.bf16.vlgmr.msra.gmra.mrb[72].mxu1 %vm229_vm0, %v2235_v43 }
0x1777   :  { %5956 = vmatpush3.bf16.msra.mxu1 %v7844_v14  ;;  %5959 = vmatprep.mubr.msk.bf16.mxu1 %vm6816_vm1, %v8875_v0 }
0x1778   :  { %5957 = vmatprep.subr.bf16.mxu1 %v8875_v0 }
0x177b   :  { %5958 = vmatpush3.bf16.msra.mxu1 %v7850_v24 }
0x177c   :  { %5971 = vmatprep.subr.bf16.mxu1 %v8875_v0 }
0x1841   :  { %v2439_v45 = vpop.f32.mrb[68].mxu1 }
0x1842   :  { %v2440_v32 = vadd.f32 %v7984_v35, %v2439_v45  ;;  %v5931_v2 = vpop.f32.mrb[69].mxu1 }
0x1843   :  { %v2442_v60 = vpop.f32.mrb[70].mxu1 }
0x1844   :  { %2454 = vrot.lane.b32.xlu0 %v2440_v32, %s6810_s30  ;;  %v5932_v3 = vpop.f32.mrb[71].mxu1  ;;  %v2445_v17 = vmul.f32 0.5, %v2440_v32 }
0x1846   :  { %v2446_v38 = vmul.f32 1.442695, %v2445_v17 }
0x1848   :  { %2554 = vrot.lane.b32.xlu0 %v8034_v16, %s6817_s4  ;;  %6517 = vpow2.f32 %v2446_v38 }
0x1849   :  { %v2539_v43 = vpop.f32.mrb[72].mxu1 }
0x184a   :  { %v5945_v4 = vpop.f32.mrb[73].mxu1 }
0x184b   :  { %v2542_v7 = vpop.f32.mrb[74].mxu1 }
0x184c   :  { %v5946_v34 = vpop.f32.mrb[75].mxu1 }
0x1852   :  { %v6518_v10 = vpop.eup %6517 }
0x1853   :  { %v2452_v62 = vmul.f32 %v6518_v10, %v2450_v11 }
0x18b6   :  { %v2455_v1 = vpop.permute.xlu0 %2454 }
0x18b7   :  { %v8090_v44 = vadd.f32 %v2455_v1, %v2452_v62 }
0x18b9   :  { %v2458_v19 = vpack.c.bf16 %v8090_v44, %v8090_v44 }
0x18ba   :  { %v2555_v51 = vpop.permute.xlu0 %2554 }
0x18bb   :  { %2460 = vrot.lane.b32.xlu1 %v2458_v19, %s6820_s28 }
0x192d   :  { %v2461_v37 = vpop.permute.xlu1 %2460 }
0x192e   :  { %5936 = vmatmul.mubr.msk.bf16.vlgmr.msra.gmra.mrb[72].mxu0 %vm2032_vm4, %v2461_v37 }
0x192f   :  { %5948 = vmatpush3.bf16.msra.mxu0 %v7998_v54  ;;  %5951 = vmatprep.mubr.msk.bf16.mxu0 %vm6816_vm1, %v8875_v0 }
0x1930   :  { %5949 = vmatprep.subr.bf16.mxu0 %v8875_v0 }
0x1933   :  { %5950 = vmatpush3.bf16.msra.mxu0 %v8001_v59 }
0x1934   :  { %5963 = vmatprep.subr.bf16.mxu0 %v8875_v0 }
0x1a01   :  { %v2499_v20 = vpop.f32.mrb[72].mxu0 }
0x1a02   :  { %v2545_v47 = vadd.f32 %v2539_v43, %v2499_v20  ;;  %v5937_v23 = vpop.f32.mrb[73].mxu0 }
0x1a03   :  { %v2502_v39 = vpop.f32.mrb[74].mxu0 }
0x1a04   :  { %v2546_v27 = vadd.f32 %v8009_v5, %v2545_v47  ;;  %v5938_v28 = vpop.f32.mrb[75].mxu0 }
0x1a06   :  { %v5313_v9 = vmul.f32 -1.442695, %v2546_v27 }
0x1a08   :  { %6519 = vpow2.f32 %v5313_v9 }
0x1a12   :  { %v6520_v31 = vpop.eup %6519 }
0x1a13   :  { %v2550_v29 = vadd.f32 1.0, %v6520_v31 }
0x1a15   :  { %6521 = vrcp.f32 %v2550_v29 }
0x1a1f   :  { %v6522_v61 = vpop.eup %6521 }
0x1a20   :  { %v2557_v22 = vmul.f32 %v6522_v61, %v2555_v51  ;;  %v2610_v34 = vsub.f32 1.0, %v6522_v61  ;;  %v2609_v38 = vmul.f32 %v6522_v61, %v8034_v16 }
0x1a22   :  { %v2558_v6 = vpack.c.bf16 %v2557_v22, %v2557_v22 }
0x1a24   :  { %5952 = vmatmul.mubr.msk.bf16.vlgmr.msra.gmra.mrb[76].mxu0 %vm229_vm0, %v2558_v6 }
0x1a25   :  { %5964 = vmatpush3.bf16.msra.mxu0 %v7864_v46  ;;  %5967 = vmatprep.mubr.msk.bf16.mxu0 %vm6816_vm1, %v8875_v0 }
0x1a26   :  { %5965 = vmatprep.subr.bf16.mxu0 %v8875_v0 }
0x1a29   :  { %5966 = vmatpush3.bf16.msra.mxu0 %v7871_v49 }
0x1a2a   :  { %5979 = vmatprep.subr.bf16.mxu0 %v8875_v0 }
0x1a2c   :  { %5968 = vmatmul.mubr.msk.bf16.vlgmr.msra.gmra.mrb[80].mxu0 %vm229_vm0, %v2401_v21 }
0x1a2d   :  { %5980 = vmatpush3.bf16.msra.mxu0 %v7937_v18  ;;  %5983 = vmatprep.mubr.msk.bf16.mxu0 %vm6816_vm1, %v8875_v0 }
0x1a2e   :  { %5981 = vmatprep.subr.bf16.mxu0 %v8875_v0 }
0x1a31   :  { %5982 = vmatpush3.bf16.msra.mxu0 %v7943_v36 }
0x1a32   :  { %5993 = vmatprep.subr.bf16.mxu0 %v8875_v0 }
0x1af7   :  { %v2596_v56 = vpop.f32.mrb[76].mxu0 }
0x1af8   :  { %2603 = vrot.lane.b32.xlu1 %v2596_v56, %s6809_s3  ;;  %v5953_v42 = vpop.f32.mrb[77].mxu0 }
0x1af9   :  { %v2599_v58 = vpop.f32.mrb[78].mxu0 }
0x1afa   :  { %v5954_v45 = vpop.f32.mrb[79].mxu0 }
0x1aff   :  { %v2705_v32 = vpop.f32.mrb[80].mxu0 }
0x1b00   :  { %v5969_v2 = vpop.f32.mrb[81].mxu0 }
0x1b01   :  { %v2708_v21 = vpop.f32.mrb[82].mxu0 }
0x1b02   :  { %v5970_v60 = vpop.f32.mrb[83].mxu0 }
0x1b6a   :  { %v2604_v3 = vpop.permute.xlu1 %2603 }
0x1b6b   :  { %v2606_v43 = vadd.f32 %v2604_v3, %v2499_v20 }
0x1b6d   :  { %v2607_v4 = vadd.f32 %v2606_v43, %v8029_v25 }
0x1b6f   :  { %6523 = vtanh.f32 %v2607_v4 }
0x1b79   :  { %v6524_v7 = vpop.eup %6523 }
0x1b7a   :  { %2612 = vrot.lane.b32.xlu0 %v6524_v7, %s6817_s4 }
0x1bec   :  { %v2613_v17 = vpop.permute.xlu0 %2612 }
0x1bed   :  { %v2615_v10 = vmul.f32 %v2613_v17, %v2610_v34  ;;  %v1718_v17 = vld [vmem:[%s8890_s7 + $0x10] sm:$0xff] }
0x1bef   :  { %v2616_v11 = vadd.f32 %v2615_v10, %v2609_v38 }
0x1bf1   :  { %v8121_v62 = vclamps-f32 %v2616_v11, 5.0 }
0x1bf3   :  { %v2619_v1 = vpack.c.bf16 %v8121_v62, %v8121_v62 }
0x1bf5   :  { %2621 = vrot.lane.b32.xlu1 %v2619_v1, %s6817_s4 }
0x1bf9   :  { %2720 = vrot.lane.b32.xlu1 %v8066_v40, %s6817_s4 }
0x1c67   :  { %v2622_v19 = vpop.permute.xlu1 %2621 }
0x1c68   :  { %5960 = vmatmul.mubr.msk.bf16.vlgmr.msra.gmra.mrb[76].mxu1 %vm229_vm0, %v2622_v19 }
0x1c69   :  { %5972 = vmatpush3.bf16.msra.mxu1 %v7905_v8  ;;  %5975 = vmatprep.mubr.msk.bf16.mxu1 %vm6816_vm1, %v8875_v0 }
0x1c6a   :  { %5973 = vmatprep.subr.bf16.mxu1 %v8875_v0 }
0x1c6b   :  { %v2721_v22 = vpop.permute.xlu1 %2720 }
0x1c6d   :  { %5974 = vmatpush3.bf16.msra.mxu1 %v7911_v15 }
0x1c6e   :  { %5987 = vmatprep.subr.bf16.mxu1 %v8875_v0 }
0x1d3b   :  { %v8135_v16 = vpop.f32.mrb[76].mxu1 }
0x1d3c   :  { %v4989_v37 = vpack.c.bf16 %v8135_v16, %v8048_v53  ;;  %2667 = vrot.lane.b32.xlu0 %v8135_v16, %s6819_s29  ;;  %v5961_v20 = vpop.f32.mrb[77].mxu1 }
0x1d3d   :  { %v2663_v47 = vpop.f32.mrb[78].mxu1 }
0x1d3e   :  { %v5962_v23 = vpop.f32.mrb[79].mxu1 }
0x1dae   :  { %v2668_v39 = vpop.permute.xlu0 %2667 }
0x1daf   :  { %v2670_v27 = vadd.f32 %v7887_v48, %v2668_v39 }
0x1db1   :  { %v2711_v28 = vadd.f32 %v2705_v32, %v2670_v27 }
0x1db3   :  { %v2712_v9 = vadd.f32 %v7919_v26, %v2711_v28 }
0x1db5   :  { %v5318_v31 = vmul.f32 -1.442695, %v2712_v9 }
0x1db7   :  { %6525 = vpow2.f32 %v5318_v31 }
0x1dc1   :  { %v6526_v29 = vpop.eup %6525 }
0x1dc2   :  { %v2716_v61 = vadd.f32 1.0, %v6526_v29 }
0x1dc4   :  { %6527 = vrcp.f32 %v2716_v61 }
0x1dce   :  { %v6528_v51 = vpop.eup %6527 }
0x1dcf   :  { %v2723_v6 = vmul.f32 %v6528_v51, %v2721_v22  ;;  %v2776_v3 = vsub.f32 1.0, %v6528_v51  ;;  %v2775_v4 = vmul.f32 %v6528_v51, %v8066_v40 }
0x1dd1   :  { %v2724_v56 = vpack.c.bf16 %v2723_v6, %v2723_v6 }
0x1dd3   :  { %5976 = vmatmul.mubr.msk.bf16.vlgmr.msra.gmra.mrb[80].mxu1 %vm229_vm0, %v2724_v56 }
0x1dd4   :  { %5988 = vmatpush3.bf16.msra.mxu1 %v7980_v33  ;;  %5989 = vmatprep.mubr.msk.bf16.mxu1 %vm6816_vm1, %v8875_v0 }
0x1dd5   :  { %6001 = vmatprep.subr.bf16.mxu1 %v8875_v0 }
0x1ea6   :  { %v2762_v48 = vpop.f32.mrb[80].mxu1 }
0x1ea7   :  { %2769 = vrot.lane.b32.xlu0 %v2762_v48, %s6809_s3  ;;  %v5977_v42 = vpop.f32.mrb[81].mxu1 }
0x1ea8   :  { %v2765_v58 = vpop.f32.mrb[82].mxu1 }
0x1ea9   :  { %v5978_v45 = vpop.f32.mrb[83].mxu1 }
0x1f19   :  { %v2770_v32 = vpop.permute.xlu0 %2769 }
0x1f1a   :  { %v2772_v2 = vadd.f32 %v2770_v32, %v2670_v27 }
0x1f1c   :  { %v2773_v21 = vadd.f32 %v2772_v2, %v7931_v41 }
0x1f1e   :  { %6529 = vtanh.f32 %v2773_v21 }
0x1f28   :  { %v6530_v60 = vpop.eup %6529 }
0x1f29   :  { %2778 = vrot.lane.b32.xlu1 %v6530_v60, %s6817_s4 }
0x1f2d   :  { %2836 = vrot.lane.b32.xlu1 %v1718_v17, %s6810_s30 }
0x1f9b   :  { %v2779_v43 = vpop.permute.xlu1 %2778 }
0x1f9c   :  { %v2781_v7 = vmul.f32 %v2779_v43, %v2776_v3 }
0x1f9e   :  { %v2782_v34 = vadd.f32 %v2781_v7, %v2775_v4 }
0x1f9f   :  { %v2837_v31 = vpop.permute.xlu1 %2836 }
0x1fa0   :  { %v8155_v38 = vclamps-f32 %v2782_v34, 5.0 }
0x1fa2   :  { %v2785_v10 = vpack.c.bf16 %v8155_v38, %v8155_v38 }
0x1fa4   :  { %2787 = vrot.lane.b32.xlu0 %v2785_v10, %s6817_s4 }
0x2016   :  { %v2788_v11 = vpop.permute.xlu0 %2787 }
0x2017   :  { %5984 = vmatmul.mubr.msk.bf16.vlgmr.msra.gmra.mrb[84].mxu0 %vm229_vm0, %v2788_v11 }
0x2018   :  { %5994 = vmatpush3.bf16.msra.mxu0 %v7958_v52  ;;  %5997 = vmatprep.mubr.msk.bf16.mxu0 %vm6816_vm1, %v8875_v0 }
0x2019   :  { %5995 = vmatprep.subr.bf16.mxu0 %v8875_v0 }
0x201c   :  { %5996 = vmatpush3.bf16.msra.mxu0 %v7965_v30 }
0x201d   :  { %6009 = vmatprep.subr.bf16.mxu0 %v8875_v0 }
0x201f   :  { %5998 = vmatmul.mubr.msk.bf16.vlgmr.msra.gmra.mrb[88].mxu0 %vm229_vm0, %v2622_v19 }
0x2020   :  { %6010 = vmatpush3.bf16.msra.mxu0 %v7844_v14  ;;  %6013 = vmatprep.mubr.msk.bf16.mxu0 %vm6816_vm1, %v8875_v0 }
0x2021   :  { %6011 = vmatprep.subr.bf16.mxu0 %v8875_v0 }
0x2024   :  { %6012 = vmatpush3.bf16.msra.mxu0 %v7850_v24 }
0x2025   :  { %6025 = vmatprep.subr.bf16.mxu0 %v8875_v0 }
0x20ea   :  { %v2826_v40 = vpop.f32.mrb[84].mxu0 }
0x20eb   :  { %v2827_v1 = vadd.f32 %v7984_v35, %v2826_v40  ;;  %v5985_v20 = vpop.f32.mrb[85].mxu0 }
0x20ec   :  { %v2829_v47 = vpop.f32.mrb[86].mxu0 }
0x20ed   :  { %2841 = vrot.lane.b32.xlu0 %v2827_v1, %s6810_s30  ;;  %v5986_v23 = vpop.f32.mrb[87].mxu0  ;;  %v2832_v28 = vmul.f32 0.5, %v2827_v1 }
0x20ef   :  { %v2833_v9 = vmul.f32 1.442695, %v2832_v28 }
0x20f1   :  { %2941 = vrot.lane.b32.xlu0 %v8121_v62, %s6817_s4  ;;  %6531 = vpow2.f32 %v2833_v9 }
0x20f2   :  { %v2926_v14 = vpop.f32.mrb[88].mxu0 }
0x20f3   :  { %v5999_v19 = vpop.f32.mrb[89].mxu0 }
0x20f4   :  { %v2929_v39 = vpop.f32.mrb[90].mxu0 }
0x20f5   :  { %v6000_v27 = vpop.f32.mrb[91].mxu0 }
0x20fb   :  { %v6532_v24 = vpop.eup %6531 }
0x20fc   :  { %v2839_v29 = vmul.f32 %v6532_v24, %v2837_v31 }
0x215f   :  { %v2842_v61 = vpop.permute.xlu0 %2841 }
0x2160   :  { %v8179_v51 = vadd.f32 %v2842_v61, %v2839_v29 }
0x2162   :  { %v2845_v22 = vpack.c.bf16 %v8179_v51, %v8179_v51 }
0x2163   :  { %v2942_v43 = vpop.permute.xlu0 %2941 }
0x2164   :  { %2847 = vrot.lane.b32.xlu1 %v2845_v22, %s6820_s28 }
0x21d6   :  { %v2848_v6 = vpop.permute.xlu1 %2847 }
0x21d7   :  { %5990 = vmatmul.mubr.msk.bf16.vlgmr.msra.gmra.mrb[84].mxu1 %vm2032_vm4, %v2848_v6 }
0x21d8   :  { %6002 = vmatpush3.bf16.msra.mxu1 %v7998_v54  ;;  %6005 = vmatprep.mubr.msk.bf16.mxu1 %vm6816_vm1, %v8875_v0 }
0x21d9   :  { %6003 = vmatprep.subr.bf16.mxu1 %v8875_v0 }
0x21dc   :  { %6004 = vmatpush3.bf16.msra.mxu1 %v8001_v59 }
0x21dd   :  { %6017 = vmatprep.subr.bf16.mxu1 %v8875_v0 }
0x22aa   :  { %v2886_v56 = vpop.f32.mrb[84].mxu1 }
0x22ab   :  { %v2932_v48 = vadd.f32 %v2926_v14, %v2886_v56  ;;  %v5991_v42 = vpop.f32.mrb[85].mxu1 }
0x22ac   :  { %v2889_v58 = vpop.f32.mrb[86].mxu1 }
0x22ad   :  { %v2933_v45 = vadd.f32 %v8009_v5, %v2932_v48  ;;  %v5992_v32 = vpop.f32.mrb[87].mxu1 }
0x22af   :  { %v5324_v2 = vmul.f32 -1.442695, %v2933_v45 }
0x22b1   :  { %6533 = vpow2.f32 %v5324_v2 }
0x22bb   :  { %v6534_v21 = vpop.eup %6533 }
0x22bc   :  { %v2937_v60 = vadd.f32 1.0, %v6534_v21 }
0x22be   :  { %6535 = vrcp.f32 %v2937_v60 }
0x22c8   :  { %v6536_v3 = vpop.eup %6535 }
0x22c9   :  { %v2944_v4 = vmul.f32 %v6536_v3, %v2942_v43  ;;  %v2996_v19 = vmul.f32 %v6536_v3, %v8121_v62 }
0x22cb   :  { %v2945_v7 = vpack.c.bf16 %v2944_v4, %v2944_v4 }
0x22cd   :  { %6006 = vmatmul.mubr.msk.bf16.vlgmr.msra.gmra.mrb[88].mxu1 %vm229_vm0, %v2945_v7 }
0x22ce   :  { %6018 = vmatpush3.bf16.msra.mxu1 %v7864_v46  ;;  %6021 = vmatprep.mubr.msk.bf16.mxu1 %vm6816_vm1, %v8875_v0 }
0x22cf   :  { %6019 = vmatprep.subr.bf16.mxu1 %v8875_v0 }
0x22d2   :  { %6020 = vmatpush3.bf16.msra.mxu1 %v7871_v49 }
0x22d3   :  { %6033 = vmatprep.subr.bf16.mxu1 %v8875_v0 }
0x22d5   :  { %6022 = vmatmul.mubr.msk.bf16.vlgmr.msra.gmra.mrb[92].mxu1 %vm229_vm0, %v2788_v11 }
0x22d6   :  { %6034 = vmatpush3.bf16.msra.mxu1 %v7937_v18  ;;  %6037 = vmatprep.mubr.msk.bf16.mxu1 %vm6816_vm1, %v8875_v0 }
0x22d7   :  { %6035 = vmatprep.subr.bf16.mxu1 %v8875_v0 }
0x22da   :  { %6036 = vmatpush3.bf16.msra.mxu1 %v7943_v36  ;;  %v2997_v36 = vsub.f32 1.0, %v6536_v3 }
0x22db   :  { %6047 = vmatprep.subr.bf16.mxu1 %v8875_v0 }
0x23a0   :  { %v2983_v46 = vpop.f32.mrb[88].mxu1 }
0x23a1   :  { %2990 = vrot.lane.b32.xlu1 %v2983_v46, %s6809_s3  ;;  %v6007_v34 = vpop.f32.mrb[89].mxu1 }
0x23a2   :  { %v2986_v49 = vpop.f32.mrb[90].mxu1 }
0x23a3   :  { %v6008_v17 = vpop.f32.mrb[91].mxu1 }
0x23a8   :  { %v3092_v10 = vpop.f32.mrb[92].mxu1 }
0x23a9   :  { %v6023_v40 = vpop.f32.mrb[93].mxu1 }
0x23aa   :  { %v3095_v11 = vpop.f32.mrb[94].mxu1  ;;  %v1719_v40 = vld [vmem:[%s8890_s7 + $0x18] sm:$0xff] }
0x23ab   :  { %v6024_v1 = vpop.f32.mrb[95].mxu1 }
0x2413   :  { %v2991_v18 = vpop.permute.xlu1 %2990 }
0x2414   :  { %v2993_v20 = vadd.f32 %v2991_v18, %v2886_v56 }
0x2416   :  { %v2994_v47 = vadd.f32 %v2993_v20, %v8029_v25 }
0x2418   :  { %6537 = vtanh.f32 %v2994_v47 }
0x2422   :  { %v6538_v23 = vpop.eup %6537 }
0x2423   :  { %2999 = vrot.lane.b32.xlu0 %v6538_v23, %s6817_s4 }
0x2495   :  { %v3000_v14 = vpop.permute.xlu0 %2999 }
0x2496   :  { %v3002_v39 = vmul.f32 %v3000_v14, %v2997_v36 }
0x2498   :  { %v3003_v27 = vadd.f32 %v3002_v39, %v2996_v19 }
0x249a   :  { %v8210_v28 = vclamps-f32 %v3003_v27, 5.0 }
0x249c   :  { %v3006_v9 = vpack.c.bf16 %v8210_v28, %v8210_v28 }
0x249e   :  { %3008 = vrot.lane.b32.xlu1 %v3006_v9, %s6817_s4 }
0x24a2   :  { %3107 = vrot.lane.b32.xlu1 %v8155_v38, %s6817_s4 }
0x2510   :  { %v3009_v24 = vpop.permute.xlu1 %3008 }
0x2511   :  { %6014 = vmatmul.mubr.msk.bf16.vlgmr.msra.gmra.mrb[92].mxu0 %vm229_vm0, %v3009_v24 }
0x2512   :  { %6026 = vmatpush3.bf16.msra.mxu0 %v7905_v8  ;;  %6029 = vmatprep.mubr.msk.bf16.mxu0 %vm6816_vm1, %v8875_v0 }
0x2513   :  { %6027 = vmatprep.subr.bf16.mxu0 %v8875_v0 }
0x2514   :  { %v3108_v45 = vpop.permute.xlu1 %3107 }
0x2516   :  { %6028 = vmatpush3.bf16.msra.mxu0 %v7911_v15 }
0x2517   :  { %6041 = vmatprep.subr.bf16.mxu0 %v8875_v0 }
0x25e4   :  { %v8224_v62 = vpop.f32.mrb[92].mxu0 }
0x25e5   :  { %3054 = vrot.lane.b32.xlu0 %v8224_v62, %s6819_s29  ;;  %v6015_v31 = vpop.f32.mrb[93].mxu0 }
0x25e6   :  { %v3050_v29 = vpop.f32.mrb[94].mxu0 }
0x25e7   :  { %v6016_v61 = vpop.f32.mrb[95].mxu0 }
0x2657   :  { %v3055_v22 = vpop.permute.xlu0 %3054 }
0x2658   :  { %v3057_v8 = vadd.f32 %v7889_v57, %v3055_v22 }
0x265a   :  { %v3098_v6 = vadd.f32 %v3092_v10, %v3057_v8 }
0x265c   :  { %v3099_v56 = vadd.f32 %v7919_v26, %v3098_v6 }
0x265e   :  { %v5329_v48 = vmul.f32 -1.442695, %v3099_v56 }
0x2660   :  { %6539 = vpow2.f32 %v5329_v48 }
0x266a   :  { %v6540_v42 = vpop.eup %6539 }
0x266b   :  { %v3103_v15 = vadd.f32 1.0, %v6540_v42 }
0x266d   :  { %6541 = vrcp.f32 %v3103_v15 }
0x2677   :  { %v6542_v58 = vpop.eup %6541 }
0x2678   :  { %v3110_v32 = vmul.f32 %v6542_v58, %v3108_v45  ;;  %v3163_v46 = vsub.f32 1.0, %v6542_v58  ;;  %v3162_v49 = vmul.f32 %v6542_v58, %v8155_v38  ;;  %v8259_v38 = vld [vmem:[#allocation10] sm:$0xff]  }
0x267a   :  { %v3111_v2 = vpack.c.bf16 %v3110_v32, %v3110_v32 }
0x267c   :  { %6030 = vmatmul.mubr.msk.bf16.vlgmr.msra.gmra.mrb[96].mxu0 %vm229_vm0, %v3111_v2 }
0x267d   :  { %6042 = vmatpush3.bf16.msra.mxu0 %v7980_v33  ;;  %6043 = vmatprep.mubr.msk.bf16.mxu0 %vm6816_vm1, %v8875_v0 }
0x267e   :  { %6055 = vmatprep.subr.bf16.mxu0 %v8875_v0 }
0x274f   :  { %v3149_v57 = vpop.f32.mrb[96].mxu0 }
0x2750   :  { %3156 = vrot.lane.b32.xlu0 %v3149_v57, %s6809_s3  ;;  %v6031_v26 = vpop.f32.mrb[97].mxu0 }
0x2751   :  { %v3152_v21 = vpop.f32.mrb[98].mxu0 }
0x2752   :  { %v6032_v60 = vpop.f32.mrb[99].mxu0 }
0x27c2   :  { %v3157_v3 = vpop.permute.xlu0 %3156 }
0x27c3   :  { %v3159_v43 = vadd.f32 %v3157_v3, %v3057_v8  ;;  %v8308_v3 = vld [vmem:[%s8827_s16] sm:$0xff]  }
0x27c5   :  { %v3160_v4 = vadd.f32 %v3159_v43, %v7931_v41  ;;  %v8317_v43 = vld [vmem:[%s8827_s16 + $0x8] sm:$0xff]  }
0x27c7   :  { %6543 = vtanh.f32 %v3160_v4 }
0x27d1   :  { %v6544_v7 = vpop.eup %6543 }
0x27d2   :  { %3165 = vrot.lane.b32.xlu1 %v6544_v7, %s6817_s4 }
0x27d6   :  { %3223 = vrot.lane.b32.xlu1 %v1719_v40, %s6810_s30 }
0x2844   :  { %v3166_v34 = vpop.permute.xlu1 %3165 }
0x2845   :  { %v3168_v17 = vmul.f32 %v3166_v34, %v3163_v46 }
0x2847   :  { %v3169_v10 = vadd.f32 %v3168_v17, %v3162_v49 }
0x2848   :  { %v3224_v29 = vpop.permute.xlu1 %3223 }
0x2849   :  { %v8242_v11 = vclamps-f32 %v3169_v10, 5.0 }
0x284b   :  { %v3172_v1 = vpack.c.bf16 %v8242_v11, %v8242_v11 }
0x284d   :  { %3174 = vrot.lane.b32.xlu0 %v3172_v1, %s6817_s4 }
0x28bf   :  { %v8248_v18 = vpop.permute.xlu0 %3174 }
0x28c0   :  { %6038 = vmatmul.mubr.msk.bf16.vlgmr.msra.gmra.mrb[96].mxu1 %vm229_vm0, %v8248_v18 }
0x28c1   :  { %6048 = vmatpush3.bf16.msra.mxu1 %v7958_v52  ;;  %6051 = vmatprep.mubr.msk.bf16.mxu1 %vm6816_vm1, %v8875_v0  ;;  %v8265_v52 = vld [vmem:[#allocation10 + $0x8] sm:$0xff]  }
0x28c2   :  { %6049 = vmatprep.subr.bf16.mxu1 %v8875_v0 }
0x28c5   :  { %6050 = vmatpush3.bf16.msra.mxu1 %v7965_v30 }
0x28c6   :  { %6063 = vmatprep.subr.bf16.mxu1 %v8875_v0 }
0x28c8   :  { %6052 = vmatmul.mubr.msk.bf16.vlgmr.msra.gmra.mrb[100].mxu1 %vm229_vm0, %v3009_v24 }
0x28c9   :  { %6064 = vmatpush3.bf16.msra.mxu1 %v8259_v38  ;;  %6067 = vmatprep.mubr.msk.bf16.mxu1 %vm6816_vm1, %v8875_v0 }
0x28ca   :  { %6065 = vmatprep.subr.bf16.mxu1 %v8875_v0 }
0x28cd   :  { %6066 = vmatpush3.bf16.msra.mxu1 %v8265_v52 }
0x28ce   :  { %6079 = vmatprep.subr.bf16.mxu1 %v8875_v0 }
0x2993   :  { %v3213_v30 = vpop.f32.mrb[96].mxu1 }
0x2994   :  { %v3214_v20 = vadd.f32 %v7984_v35, %v3213_v30  ;;  %v6039_v47 = vpop.f32.mrb[97].mxu1 }
0x2995   :  { %v3216_v23 = vpop.f32.mrb[98].mxu1 }
0x2996   :  { %3228 = vrot.lane.b32.xlu0 %v3214_v20, %s6810_s30  ;;  %v6040_v36 = vpop.f32.mrb[99].mxu1  ;;  %v3219_v9 = vmul.f32 0.5, %v3214_v20 }
0x2998   :  { %v3220_v24 = vmul.f32 1.442695, %v3219_v9 }
0x299a   :  { %3328 = vrot.lane.b32.xlu0 %v8210_v28, %s6817_s4  ;;  %6545 = vpow2.f32 %v3220_v24  ;;  %v8348_v24 = vld [vmem:[%s8825_s14 + $0x8] sm:$0xff]  }
0x299b   :  { %v3313_v14 = vpop.f32.mrb[100].mxu1 }
0x299c   :  { %v6053_v19 = vpop.f32.mrb[101].mxu1 }
0x299d   :  { %v3316_v39 = vpop.f32.mrb[102].mxu1 }
0x299e   :  { %v6054_v27 = vpop.f32.mrb[103].mxu1 }
0x29a4   :  { %v6546_v31 = vpop.eup %6545 }
0x29a5   :  { %v3226_v61 = vmul.f32 %v6546_v31, %v3224_v29 }
0x2a08   :  { %v3229_v22 = vpop.permute.xlu0 %3228 }
0x2a09   :  { %v8273_v35 = vadd.f32 %v3229_v22, %v3226_v61 }
0x2a0b   :  { %v3232_v8 = vpack.c.bf16 %v8273_v35, %v8273_v35 }
0x2a0c   :  { %v3329_v26 = vpop.permute.xlu0 %3328 }
0x2a0d   :  { %3234 = vrot.lane.b32.xlu1 %v3232_v8, %s6820_s28 }
0x2a7f   :  { %v3235_v6 = vpop.permute.xlu1 %3234 }
0x2a80   :  { %6044 = vmatmul.mubr.msk.bf16.vlgmr.msra.gmra.mrb[100].mxu0 %vm2032_vm4, %v3235_v6 }
0x2a81   :  { %6056 = vmatpush3.bf16.msra.mxu0 %v7998_v54  ;;  %6059 = vmatprep.mubr.msk.bf16.mxu0 %vm6816_vm1, %v8875_v0 }
0x2a82   :  { %6057 = vmatprep.subr.bf16.mxu0 %v8875_v0 }
0x2a85   :  { %6058 = vmatpush3.bf16.msra.mxu0 %v8001_v59  ;;  %v8290_v59 = vld [vmem:[%s8823_s12] sm:$0xff]  }
0x2a86   :  { %6071 = vmatprep.subr.bf16.mxu0 %v8875_v0 }
0x2b53   :  { %v3273_v56 = vpop.f32.mrb[100].mxu0 }
0x2b54   :  { %v3319_v48 = vadd.f32 %v3313_v14, %v3273_v56  ;;  %v6045_v42 = vpop.f32.mrb[101].mxu0 }
0x2b55   :  { %v3276_v15 = vpop.f32.mrb[102].mxu0  ;;  %v8362_v42 = vld [vmem:[%s8824_s13] ss:$0 sm:$0xff] }
0x2b56   :  { %v3320_v58 = vadd.f32 %v8009_v5, %v3319_v48  ;;  %v6046_v45 = vpop.f32.mrb[103].mxu0  ;;  %v8299_v5 = vld [vmem:[%s8823_s12 + $0x8] sm:$0xff]  }
0x2b58   :  { %v5335_v32 = vmul.f32 -1.442695, %v3320_v58 }
0x2b5a   :  { %6547 = vpow2.f32 %v5335_v32 }
0x2b64   :  { %v6548_v2 = vpop.eup %6547 }
0x2b65   :  { %v3324_v54 = vadd.f32 1.0, %v6548_v2 }
0x2b67   :  { %6549 = vrcp.f32 %v3324_v54 }
0x2b71   :  { %v6550_v57 = vpop.eup %6549 }
0x2b72   :  { %v3331_v21 = vmul.f32 %v6550_v57, %v3329_v26  ;;  %v3384_v47 = vsub.f32 1.0, %v6550_v57  ;;  %v3383_v36 = vmul.f32 %v6550_v57, %v8210_v28  ;;  %v8339_v28 = vld [vmem:[%s8825_s14] sm:$0xff]  }
0x2b74   :  { %v3332_v60 = vpack.c.bf16 %v3331_v21, %v3331_v21 }
0x2b76   :  { %6060 = vmatmul.mubr.msk.bf16.vlgmr.msra.gmra.mrb[104].mxu0 %vm229_vm0, %v3332_v60 }
0x2b77   :  { %6072 = vmatpush3.bf16.msra.mxu0 %v8290_v59  ;;  %6075 = vmatprep.mubr.msk.bf16.mxu0 %vm6816_vm1, %v8875_v0 }
0x2b78   :  { %6073 = vmatprep.subr.bf16.mxu0 %v8875_v0 }
0x2b7b   :  { %6074 = vmatpush3.bf16.msra.mxu0 %v8299_v5 }
0x2b7c   :  { %6087 = vmatprep.subr.bf16.mxu0 %v8875_v0 }
0x2b7e   :  { %6076 = vmatmul.mubr.msk.bf16.vlgmr.msra.gmra.mrb[108].mxu0 %vm229_vm0, %v8248_v18 }
0x2b7f   :  { %6088 = vmatpush3.bf16.msra.mxu0 %v8308_v3  ;;  %6091 = vmatprep.mubr.msk.bf16.mxu0 %vm6816_vm1, %v8875_v0 }
0x2b80   :  { %6089 = vmatprep.subr.bf16.mxu0 %v8875_v0 }
0x2b83   :  { %6090 = vmatpush3.bf16.msra.mxu0 %v8317_v43 }
0x2b84   :  { %6101 = vmatprep.subr.bf16.mxu0 %v8875_v0 }
0x2c49   :  { %v3370_v4 = vpop.f32.mrb[104].mxu0 }
0x2c4a   :  { %3377 = vrot.lane.b32.xlu1 %v3370_v4, %s6809_s3  ;;  %v6061_v7 = vpop.f32.mrb[105].mxu0 }
0x2c4b   :  { %v3373_v46 = vpop.f32.mrb[106].mxu0 }
0x2c4c   :  { %v6062_v34 = vpop.f32.mrb[107].mxu0 }
0x2c51   :  { %v3479_v49 = vpop.f32.mrb[108].mxu0 }
0x2c52   :  { %v6077_v17 = vpop.f32.mrb[109].mxu0 }
0x2c53   :  { %v3482_v10 = vpop.f32.mrb[110].mxu0 }
0x2c54   :  { %v6078_v40 = vpop.f32.mrb[111].mxu0 }
0x2cbc   :  { %v3378_v1 = vpop.permute.xlu1 %3377 }
0x2cbd   :  { %v3380_v18 = vadd.f32 %v3378_v1, %v3273_v56 }
0x2cbf   :  { %v3381_v30 = vadd.f32 %v3380_v18, %v8029_v25 }
0x2cc1   :  { %6551 = vtanh.f32 %v3381_v30  ;;  %v1720_v30 = vld [vmem:[%s8890_s7 + $0x20] sm:$0xff] }
0x2ccb   :  { %v6552_v20 = vpop.eup %6551 }
0x2ccc   :  { %3386 = vrot.lane.b32.xlu0 %v6552_v20, %s6817_s4 }
0x2d3e   :  { %v3387_v23 = vpop.permute.xlu0 %3386 }
0x2d3f   :  { %v3389_v14 = vmul.f32 %v3387_v23, %v3384_v47 }
0x2d41   :  { %v3390_v19 = vadd.f32 %v3389_v14, %v3383_v36  ;;  %v8393_v36 = vld [vmem:[#allocation6 + $0x8] sm:$0xff]  }
0x2d43   :  { %v8325_v39 = vclamps-f32 %v3390_v19, 5.0  ;;  %v8405_v19 = vld [vmem:[#allocation2] ss:$0 sm:$0xff] }
0x2d45   :  { %v3393_v27 = vpack.c.bf16 %v8325_v39, %v8325_v39 }
0x2d47   :  { %3395 = vrot.lane.b32.xlu1 %v3393_v27, %s6817_s4 }
0x2d4b   :  { %3494 = vrot.lane.b32.xlu1 %v8242_v11, %s6817_s4 }
0x2db9   :  { %v8332_v9 = vpop.permute.xlu1 %3395 }
0x2dba   :  { %6068 = vmatmul.mubr.msk.bf16.vlgmr.msra.gmra.mrb[104].mxu1 %vm229_vm0, %v8332_v9 }
0x2dbb   :  { %6080 = vmatpush3.bf16.msra.mxu1 %v8339_v28  ;;  %6083 = vmatprep.mubr.msk.bf16.mxu1 %vm6816_vm1, %v8875_v0 }
0x2dbc   :  { %6081 = vmatprep.subr.bf16.mxu1 %v8875_v0 }
0x2dbd   :  { %v3495_v54 = vpop.permute.xlu1 %3494 }
0x2dbf   :  { %6082 = vmatpush3.bf16.msra.mxu1 %v8348_v24 }
0x2dc0   :  { %6095 = vmatprep.subr.bf16.mxu1 %v8875_v0 }
0x2e8d   :  { %v8352_v31 = vpop.f32.mrb[104].mxu1 }
0x2e8e   :  { %v4990_v29 = vpack.c.bf16 %v8352_v31, %v8224_v62  ;;  %3441 = vrot.lane.b32.xlu0 %v8352_v31, %s6819_s29  ;;  %v6069_v61 = vpop.f32.mrb[105].mxu1 }
0x2e8f   :  { %v3437_v22 = vpop.f32.mrb[106].mxu1 }
0x2e90   :  { %v6070_v8 = vpop.f32.mrb[107].mxu1 }
0x2f00   :  { %v3442_v6 = vpop.permute.xlu0 %3441 }
0x2f01   :  { %v3444_v56 = vadd.f32 %v3442_v6, %v7895_v12 }
0x2f03   :  { %v3485_v48 = vadd.f32 %v3479_v49, %v3444_v56 }
0x2f05   :  { %v3486_v15 = vadd.f32 %v8362_v42, %v3485_v48 }
0x2f07   :  { %v5340_v58 = vmul.f32 -1.442695, %v3486_v15 }
0x2f09   :  { %6553 = vpow2.f32 %v5340_v58 }
0x2f13   :  { %v6554_v45 = vpop.eup %6553 }
0x2f14   :  { %v3490_v32 = vadd.f32 1.0, %v6554_v45 }
0x2f16   :  { %6555 = vrcp.f32 %v3490_v32 }
0x2f20   :  { %v6556_v2 = vpop.eup %6555 }
0x2f21   :  { %v3497_v57 = vmul.f32 %v6556_v2, %v3495_v54  ;;  %v3550_v17 = vsub.f32 1.0, %v6556_v2  ;;  %v3549_v40 = vmul.f32 %v6556_v2, %v8242_v11  ;;  %v8387_v11 = vld [vmem:[#allocation6] sm:$0xff]  }
0x2f23   :  { %v3498_v26 = vpack.c.bf16 %v3497_v57, %v3497_v57 }
0x2f25   :  { %6084 = vmatmul.mubr.msk.bf16.vlgmr.msra.gmra.mrb[108].mxu1 %vm229_vm0, %v3498_v26 }
0x2f26   :  { %6096 = vmatpush3.bf16.msra.mxu1 %v7980_v33  ;;  %6097 = vmatprep.mubr.msk.bf16.mxu1 %vm6816_vm1, %v8875_v0 }
0x2f27   :  { %6109 = vmatprep.subr.bf16.mxu1 %v8875_v0 }
0x2ff8   :  { %v3536_v12 = vpop.f32.mrb[108].mxu1 }
0x2ff9   :  { %3543 = vrot.lane.b32.xlu0 %v3536_v12, %s6809_s3  ;;  %v6085_v21 = vpop.f32.mrb[109].mxu1 }
0x2ffa   :  { %v3539_v60 = vpop.f32.mrb[110].mxu1  ;;  %v8417_v21 = vld [vmem:[#allocation7] sm:$0xff]  }
0x2ffb   :  { %v6086_v4 = vpop.f32.mrb[111].mxu1  ;;  %v8423_v60 = vld [vmem:[#allocation7 + $0x8] sm:$0xff]  }
0x306b   :  { %v3544_v7 = vpop.permute.xlu0 %3543 }
0x306c   :  { %v3546_v46 = vadd.f32 %v3544_v7, %v3444_v56 }
0x306e   :  { %v3547_v34 = vadd.f32 %v3546_v46, %v7931_v41 }
0x3070   :  { %6557 = vtanh.f32 %v3547_v34 }
0x307a   :  { %v6558_v49 = vpop.eup %6557 }
0x307b   :  { %3552 = vrot.lane.b32.xlu1 %v6558_v49, %s6817_s4  ;;  %v8430_v49 = vld [vmem:[%s8831_s20] ss:$0 sm:$0xff] }
0x307f   :  { %3610 = vrot.lane.b32.xlu1 %v1720_v30, %s6810_s30 }
0x30ed   :  { %v3553_v10 = vpop.permute.xlu1 %3552 }
0x30ee   :  { %v3555_v1 = vmul.f32 %v3553_v10, %v3550_v17 }
0x30f0   :  { %v3556_v18 = vadd.f32 %v3555_v1, %v3549_v40 }
0x30f1   :  { %v3611_v32 = vpop.permute.xlu1 %3610 }
0x30f2   :  { %v8377_v20 = vclamps-f32 %v3556_v18, 5.0 }
0x30f4   :  { %v3559_v47 = vpack.c.bf16 %v8377_v20, %v8377_v20 }
0x30f6   :  { %3561 = vrot.lane.b32.xlu0 %v3559_v47, %s6817_s4 }
0x3168   :  { %v8383_v23 = vpop.permute.xlu0 %3561 }
0x3169   :  { %6092 = vmatmul.mubr.msk.bf16.vlgmr.msra.gmra.mrb[112].mxu0 %vm229_vm0, %v8383_v23 }
0x316a   :  { %6102 = vmatpush3.bf16.msra.mxu0 %v8387_v11  ;;  %6105 = vmatprep.mubr.msk.bf16.mxu0 %vm6816_vm1, %v8875_v0 }
0x316b   :  { %6103 = vmatprep.subr.bf16.mxu0 %v8875_v0 }
0x316e   :  { %6104 = vmatpush3.bf16.msra.mxu0 %v8393_v36 }
0x316f   :  { %6117 = vmatprep.subr.bf16.mxu0 %v8875_v0 }
0x3171   :  { %6106 = vmatmul.mubr.msk.bf16.vlgmr.msra.gmra.mrb[116].mxu0 %vm229_vm0, %v8332_v9 }
0x3172   :  { %6118 = vmatpush3.bf16.msra.mxu0 %v8259_v38  ;;  %6121 = vmatprep.mubr.msk.bf16.mxu0 %vm6816_vm1, %v8875_v0 }
0x3173   :  { %6119 = vmatprep.subr.bf16.mxu0 %v8875_v0 }
0x3176   :  { %6120 = vmatpush3.bf16.msra.mxu0 %v8265_v52 }
0x3177   :  { %6133 = vmatprep.subr.bf16.mxu0 %v8875_v0 }
0x323c   :  { %v3600_v14 = vpop.f32.mrb[112].mxu0 }
0x323d   :  { %v3601_v27 = vadd.f32 %v8405_v19, %v3600_v14  ;;  %v6093_v61 = vpop.f32.mrb[113].mxu0 }
0x323e   :  { %v3603_v22 = vpop.f32.mrb[114].mxu0 }
0x323f   :  { %3615 = vrot.lane.b32.xlu0 %v3601_v27, %s6810_s30  ;;  %v6094_v9 = vpop.f32.mrb[115].mxu0  ;;  %v3606_v15 = vmul.f32 0.5, %v3601_v27 }
0x3241   :  { %v3607_v58 = vmul.f32 1.442695, %v3606_v15 }
0x3243   :  { %3715 = vrot.lane.b32.xlu0 %v8325_v39, %s6817_s4  ;;  %6559 = vpow2.f32 %v3607_v58 }
0x3244   :  { %v3700_v8 = vpop.f32.mrb[116].mxu0 }
0x3245   :  { %v6107_v6 = vpop.f32.mrb[117].mxu0 }
0x3246   :  { %v3703_v56 = vpop.f32.mrb[118].mxu0 }
0x3247   :  { %v6108_v48 = vpop.f32.mrb[119].mxu0 }
0x324d   :  { %v6560_v45 = vpop.eup %6559 }
0x324e   :  { %v3613_v2 = vmul.f32 %v6560_v45, %v3611_v32 }
0x32b1   :  { %v3616_v54 = vpop.permute.xlu0 %3615 }
0x32b2   :  { %v8411_v57 = vadd.f32 %v3616_v54, %v3613_v2 }
0x32b4   :  { %v3619_v26 = vpack.c.bf16 %v8411_v57, %v8411_v57 }
0x32b5   :  { %v3716_v47 = vpop.permute.xlu0 %3715 }
0x32b6   :  { %3621 = vrot.lane.b32.xlu1 %v3619_v26, %s6820_s28 }
0x3328   :  { %v3622_v12 = vpop.permute.xlu1 %3621 }
0x3329   :  { %6098 = vmatmul.mubr.msk.bf16.vlgmr.msra.gmra.mrb[112].mxu1 %vm2032_vm4, %v3622_v12 }
0x332a   :  { %6110 = vmatpush3.bf16.msra.mxu1 %v8417_v21  ;;  %6113 = vmatprep.mubr.msk.bf16.mxu1 %vm6816_vm1, %v8875_v0 }
0x332b   :  { %6111 = vmatprep.subr.bf16.mxu1 %v8875_v0 }
0x332e   :  { %6112 = vmatpush3.bf16.msra.mxu1 %v8423_v60 }
0x332f   :  { %6125 = vmatprep.subr.bf16.mxu1 %v8875_v0 }
0x33fc   :  { %v3660_v4 = vpop.f32.mrb[112].mxu1 }
0x33fd   :  { %v3706_v7 = vadd.f32 %v3700_v8, %v3660_v4  ;;  %v6099_v46 = vpop.f32.mrb[113].mxu1 }
0x33fe   :  { %v3663_v34 = vpop.f32.mrb[114].mxu1 }
0x33ff   :  { %v3707_v17 = vadd.f32 %v8430_v49, %v3706_v7  ;;  %v6100_v10 = vpop.f32.mrb[115].mxu1 }
0x3401   :  { %v5346_v40 = vmul.f32 -1.442695, %v3707_v17 }
0x3403   :  { %6561 = vpow2.f32 %v5346_v40 }
0x340d   :  { %v6562_v1 = vpop.eup %6561 }
0x340e   :  { %v3711_v18 = vadd.f32 1.0, %v6562_v1 }
0x3410   :  { %6563 = vrcp.f32 %v3711_v18 }
0x341a   :  { %v6564_v30 = vpop.eup %6563 }
0x341b   :  { %v3718_v14 = vmul.f32 %v6564_v30, %v3716_v47  ;;  %v3771_v2 = vsub.f32 1.0, %v6564_v30  ;;  %v3770_v26 = vmul.f32 %v6564_v30, %v8325_v39 }
0x341d   :  { %v3719_v27 = vpack.c.bf16 %v3718_v14, %v3718_v14 }
0x341f   :  { %6114 = vmatmul.mubr.msk.bf16.vlgmr.msra.gmra.mrb[116].mxu1 %vm229_vm0, %v3719_v27 }
0x3420   :  { %6126 = vmatpush3.bf16.msra.mxu1 %v8290_v59  ;;  %6129 = vmatprep.mubr.msk.bf16.mxu1 %vm6816_vm1, %v8875_v0 }
0x3421   :  { %6127 = vmatprep.subr.bf16.mxu1 %v8875_v0 }
0x3424   :  { %6128 = vmatpush3.bf16.msra.mxu1 %v8299_v5 }
0x3425   :  { %6141 = vmatprep.subr.bf16.mxu1 %v8875_v0 }
0x3427   :  { %6130 = vmatmul.mubr.msk.bf16.vlgmr.msra.gmra.mrb[120].mxu1 %vm229_vm0, %v8383_v23 }
0x3428   :  { %6142 = vmatpush3.bf16.msra.mxu1 %v8308_v3  ;;  %6145 = vmatprep.mubr.msk.bf16.mxu1 %vm6816_vm1, %v8875_v0 }
0x3429   :  { %6143 = vmatprep.subr.bf16.mxu1 %v8875_v0 }
0x342c   :  { %6144 = vmatpush3.bf16.msra.mxu1 %v8317_v43 }
0x342d   :  { %6155 = vmatprep.subr.bf16.mxu1 %v8875_v0 }
0x34f2   :  { %v3757_v61 = vpop.f32.mrb[116].mxu1 }
0x34f3   :  { %3764 = vrot.lane.b32.xlu1 %v3757_v61, %s6809_s3  ;;  %v6115_v22 = vpop.f32.mrb[117].mxu1 }
0x34f4   :  { %v3760_v9 = vpop.f32.mrb[118].mxu1 }
0x34f5   :  { %v6116_v8 = vpop.f32.mrb[119].mxu1 }
0x34fa   :  { %v3866_v6 = vpop.f32.mrb[120].mxu1 }
0x34fb   :  { %v6131_v56 = vpop.f32.mrb[121].mxu1 }
0x34fc   :  { %v3869_v23 = vpop.f32.mrb[122].mxu1 }
0x34fd   :  { %v6132_v48 = vpop.f32.mrb[123].mxu1 }
0x3565   :  { %v3765_v15 = vpop.permute.xlu1 %3764 }
0x3566   :  { %v3767_v58 = vadd.f32 %v3765_v15, %v3660_v4 }
0x3568   :  { %v3768_v45 = vadd.f32 %v3767_v58, %v8029_v25 }
0x356a   :  { %6565 = vtanh.f32 %v3768_v45 }
0x3574   :  { %v6566_v32 = vpop.eup %6565 }
0x3575   :  { %3773 = vrot.lane.b32.xlu0 %v6566_v32, %s6817_s4 }
0x35e7   :  { %v3774_v54 = vpop.permute.xlu0 %3773 }
0x35e8   :  { %v3776_v12 = vmul.f32 %v3774_v54, %v3771_v2 }
0x35ea   :  { %v3777_v7 = vadd.f32 %v3776_v12, %v3770_v26 }
0x35ec   :  { %v8452_v46 = vclamps-f32 %v3777_v7, 5.0 }
0x35ee   :  { %v3780_v34 = vpack.c.bf16 %v8452_v46, %v8452_v46 }
0x35f0   :  { %3782 = vrot.lane.b32.xlu1 %v3780_v34, %s6817_s4  ;;  %v1721_v34 = vld [vmem:[%s8890_s7 + $0x28] sm:$0xff] }
0x35f4   :  { %3881 = vrot.lane.b32.xlu1 %v8377_v20, %s6817_s4 }
0x3662   :  { %v3783_v4 = vpop.permute.xlu1 %3782 }
0x3663   :  { %6122 = vmatmul.mubr.msk.bf16.vlgmr.msra.gmra.mrb[120].mxu0 %vm229_vm0, %v3783_v4 }
0x3664   :  { %6134 = vmatpush3.bf16.msra.mxu0 %v8339_v28  ;;  %6137 = vmatprep.mubr.msk.bf16.mxu0 %vm6816_vm1, %v8875_v0 }
0x3665   :  { %6135 = vmatprep.subr.bf16.mxu0 %v8875_v0 }
0x3666   :  { %v3882_v9 = vpop.permute.xlu1 %3881 }
0x3668   :  { %6136 = vmatpush3.bf16.msra.mxu0 %v8348_v24 }
0x3669   :  { %6149 = vmatprep.subr.bf16.mxu0 %v8875_v0 }
0x3736   :  { %v8466_v39 = vpop.f32.mrb[120].mxu0 }
0x3737   :  { %3828 = vrot.lane.b32.xlu0 %v8466_v39, %s6819_s29  ;;  %v6123_v17 = vpop.f32.mrb[121].mxu0 }
0x3738   :  { %v3824_v10 = vpop.f32.mrb[122].mxu0 }
0x3739   :  { %v6124_v40 = vpop.f32.mrb[123].mxu0 }
0x37a9   :  { %v3829_v1 = vpop.permute.xlu0 %3828 }
0x37aa   :  { %v3831_v18 = vadd.f32 %v3829_v1, %v7899_v13 }
0x37ac   :  { %v3872_v30 = vadd.f32 %v3866_v6, %v3831_v18 }
0x37ae   :  { %v3873_v47 = vadd.f32 %v8362_v42, %v3872_v30 }
0x37b0   :  { %v5351_v14 = vmul.f32 -1.442695, %v3873_v47 }
0x37b2   :  { %6567 = vpow2.f32 %v5351_v14 }
0x37bc   :  { %v6568_v27 = vpop.eup %6567 }
0x37bd   :  { %v3877_v61 = vadd.f32 1.0, %v6568_v27 }
0x37bf   :  { %6569 = vrcp.f32 %v3877_v61 }
0x37c9   :  { %v6570_v22 = vpop.eup %6569 }
0x37ca   :  { %v3884_v8 = vmul.f32 %v6570_v22, %v3882_v9  ;;  %v3937_v2 = vsub.f32 1.0, %v6570_v22  ;;  %v3936_v26 = vmul.f32 %v6570_v22, %v8377_v20 }
0x37cc   :  { %v3885_v56 = vpack.c.bf16 %v3884_v8, %v3884_v8 }
0x37ce   :  { %6138 = vmatmul.mubr.msk.bf16.vlgmr.msra.gmra.mrb[124].mxu0 %vm229_vm0, %v3885_v56 }
0x37cf   :  { %6150 = vmatpush3.bf16.msra.mxu0 %v7980_v33  ;;  %6151 = vmatprep.mubr.msk.bf16.mxu0 %vm6816_vm1, %v8875_v0 }
0x37d0   :  { %6163 = vmatprep.subr.bf16.mxu0 %v8875_v0 }
0x38a1   :  { %v3923_v13 = vpop.f32.mrb[124].mxu0 }
0x38a2   :  { %3930 = vrot.lane.b32.xlu0 %v3923_v13, %s6809_s3  ;;  %v6139_v6 = vpop.f32.mrb[125].mxu0 }
0x38a3   :  { %v3926_v23 = vpop.f32.mrb[126].mxu0 }
0x38a4   :  { %v6140_v48 = vpop.f32.mrb[127].mxu0 }
0x3914   :  { %v3931_v15 = vpop.permute.xlu0 %3930 }
0x3915   :  { %v3933_v58 = vadd.f32 %v3931_v15, %v3831_v18 }
0x3917   :  { %v3934_v45 = vadd.f32 %v3933_v58, %v7931_v41 }
0x3919   :  { %6571 = vtanh.f32 %v3934_v45 }
0x3923   :  { %v6572_v32 = vpop.eup %6571 }
0x3924   :  { %3939 = vrot.lane.b32.xlu1 %v6572_v32, %s6817_s4 }
0x3928   :  { %3997 = vrot.lane.b32.xlu1 %v1721_v34, %s6810_s30 }
0x3996   :  { %v3940_v54 = vpop.permute.xlu1 %3939 }
0x3997   :  { %v3942_v12 = vmul.f32 %v3940_v54, %v3937_v2 }
0x3999   :  { %v3943_v7 = vadd.f32 %v3942_v12, %v3936_v26 }
0x399a   :  { %v3998_v56 = vpop.permute.xlu1 %3997 }
0x399b   :  { %v8484_v17 = vclamps-f32 %v3943_v7, 5.0 }
0x399d   :  { %v3946_v10 = vpack.c.bf16 %v8484_v17, %v8484_v17 }
0x399f   :  { %3948 = vrot.lane.b32.xlu0 %v3946_v10, %s6817_s4 }
0x3a11   :  { %v3949_v40 = vpop.permute.xlu0 %3948 }
0x3a12   :  { %6146 = vmatmul.mubr.msk.bf16.vlgmr.msra.gmra.mrb[124].mxu1 %vm229_vm0, %v3949_v40 }
0x3a13   :  { %6156 = vmatpush3.bf16.msra.mxu1 %v8387_v11  ;;  %6159 = vmatprep.mubr.msk.bf16.mxu1 %vm6816_vm1, %v8875_v0 }
0x3a14   :  { %6157 = vmatprep.subr.bf16.mxu1 %v8875_v0 }
0x3a17   :  { %6158 = vmatpush3.bf16.msra.mxu1 %v8393_v36 }
0x3a18   :  { %6171 = vmatprep.subr.bf16.mxu1 %v8875_v0 }
0x3a1a   :  { %6160 = vmatmul.mubr.msk.bf16.vlgmr.msra.gmra.mrb[128].mxu1 %vm229_vm0, %v3783_v4 }
0x3a1b   :  { %6172 = vmatpush3.bf16.msra.mxu1 %v8259_v38  ;;  %6175 = vmatprep.mubr.msk.bf16.mxu1 %vm6816_vm1, %v8875_v0 }
0x3a1c   :  { %6173 = vmatprep.subr.bf16.mxu1 %v8875_v0 }
0x3a1f   :  { %6174 = vmatpush3.bf16.msra.mxu1 %v8265_v52 }
0x3a20   :  { %6187 = vmatprep.subr.bf16.mxu1 %v8875_v0 }
0x3ae5   :  { %v3987_v20 = vpop.f32.mrb[124].mxu1 }
0x3ae6   :  { %v3988_v1 = vadd.f32 %v8405_v19, %v3987_v20  ;;  %v6147_v18 = vpop.f32.mrb[125].mxu1 }
0x3ae7   :  { %v3990_v30 = vpop.f32.mrb[126].mxu1 }
0x3ae8   :  { %4002 = vrot.lane.b32.xlu0 %v3988_v1, %s6810_s30  ;;  %v6148_v47 = vpop.f32.mrb[127].mxu1  ;;  %v3993_v22 = vmul.f32 0.5, %v3988_v1 }
0x3aea   :  { %v3994_v9 = vmul.f32 1.442695, %v3993_v22 }
0x3aec   :  { %4102 = vrot.lane.b32.xlu0 %v8452_v46, %s6817_s4  ;;  %6573 = vpow2.f32 %v3994_v9 }
0x3aed   :  { %v4087_v4 = vpop.f32.mrb[128].mxu1 }
0x3aee   :  { %v6161_v14 = vpop.f32.mrb[129].mxu1 }
0x3aef   :  { %v4090_v27 = vpop.f32.mrb[130].mxu1 }
0x3af0   :  { %v6162_v61 = vpop.f32.mrb[131].mxu1 }
0x3af6   :  { %v6574_v8 = vpop.eup %6573 }
0x3af7   :  { %v4000_v13 = vmul.f32 %v6574_v8, %v3998_v56 }
0x3b5a   :  { %v4003_v6 = vpop.permute.xlu0 %4002 }
0x3b5b   :  { %v8508_v23 = vadd.f32 %v4003_v6, %v4000_v13 }
0x3b5d   :  { %v4006_v48 = vpack.c.bf16 %v8508_v23, %v8508_v23 }
0x3b5e   :  { %v4103_v20 = vpop.permute.xlu0 %4102 }
0x3b5f   :  { %4008 = vrot.lane.b32.xlu1 %v4006_v48, %s6820_s28 }
0x3bd1   :  { %v4009_v15 = vpop.permute.xlu1 %4008 }
0x3bd2   :  { %6152 = vmatmul.mubr.msk.bf16.vlgmr.msra.gmra.mrb[128].mxu0 %vm2032_vm4, %v4009_v15 }
0x3bd3   :  { %6164 = vmatpush3.bf16.msra.mxu0 %v8417_v21  ;;  %6167 = vmatprep.mubr.msk.bf16.mxu0 %vm6816_vm1, %v8875_v0 }
0x3bd4   :  { %6165 = vmatprep.subr.bf16.mxu0 %v8875_v0 }
0x3bd7   :  { %6166 = vmatpush3.bf16.msra.mxu0 %v8423_v60 }
0x3bd8   :  { %6179 = vmatprep.subr.bf16.mxu0 %v8875_v0 }
0x3ca5   :  { %v4047_v58 = vpop.f32.mrb[128].mxu0 }
0x3ca6   :  { %v4093_v45 = vadd.f32 %v4087_v4, %v4047_v58  ;;  %v6153_v32 = vpop.f32.mrb[129].mxu0 }
0x3ca7   :  { %v4050_v2 = vpop.f32.mrb[130].mxu0 }
0x3ca8   :  { %v4094_v54 = vadd.f32 %v8430_v49, %v4093_v45  ;;  %v6154_v26 = vpop.f32.mrb[131].mxu0 }
0x3caa   :  { %v5357_v12 = vmul.f32 -1.442695, %v4094_v54 }
0x3cac   :  { %6575 = vpow2.f32 %v5357_v12 }
0x3cb6   :  { %v6576_v7 = vpop.eup %6575 }
0x3cb7   :  { %v4098_v34 = vadd.f32 1.0, %v6576_v7 }
0x3cb9   :  { %6577 = vrcp.f32 %v4098_v34 }
0x3cc3   :  { %v6578_v10 = vpop.eup %6577 }
0x3cc4   :  { %v4105_v1 = vmul.f32 %v6578_v10, %v4103_v20  ;;  %v4158_v6 = vsub.f32 1.0, %v6578_v10  ;;  %v4157_v15 = vmul.f32 %v6578_v10, %v8452_v46 }
0x3cc6   :  { %v4106_v18 = vpack.c.bf16 %v4105_v1, %v4105_v1 }
0x3cc8   :  { %6168 = vmatmul.mubr.msk.bf16.vlgmr.msra.gmra.mrb[132].mxu0 %vm229_vm0, %v4106_v18 }
0x3cc9   :  { %6180 = vmatpush3.bf16.msra.mxu0 %v8290_v59  ;;  %6183 = vmatprep.mubr.msk.bf16.mxu0 %vm6816_vm1, %v8875_v0 }
0x3cca   :  { %6181 = vmatprep.subr.bf16.mxu0 %v8875_v0 }
0x3ccd   :  { %6182 = vmatpush3.bf16.msra.mxu0 %v8299_v5 }
0x3cce   :  { %6195 = vmatprep.subr.bf16.mxu0 %v8875_v0 }
0x3cd0   :  { %6184 = vmatmul.mubr.msk.bf16.vlgmr.msra.gmra.mrb[136].mxu0 %vm229_vm0, %v3949_v40 }
0x3cd1   :  { %6196 = vmatpush3.bf16.msra.mxu0 %v8308_v3  ;;  %6199 = vmatprep.mubr.msk.bf16.mxu0 %vm6816_vm1, %v8875_v0 }
0x3cd2   :  { %6197 = vmatprep.subr.bf16.mxu0 %v8875_v0 }
0x3cd5   :  { %6198 = vmatpush3.bf16.msra.mxu0 %v8317_v43 }
0x3cd6   :  { %6209 = vmatprep.subr.bf16.mxu0 %v8875_v0 }
0x3d9b   :  { %v4144_v30 = vpop.f32.mrb[132].mxu0 }
0x3d9c   :  { %4151 = vrot.lane.b32.xlu1 %v4144_v30, %s6809_s3  ;;  %v6169_v47 = vpop.f32.mrb[133].mxu0 }
0x3d9d   :  { %v4147_v4 = vpop.f32.mrb[134].mxu0 }
0x3d9e   :  { %v6170_v14 = vpop.f32.mrb[135].mxu0 }
0x3da3   :  { %v4253_v27 = vpop.f32.mrb[136].mxu0 }
0x3da4   :  { %v6185_v61 = vpop.f32.mrb[137].mxu0 }
0x3da5   :  { %v4256_v40 = vpop.f32.mrb[138].mxu0 }
0x3da6   :  { %v6186_v22 = vpop.f32.mrb[139].mxu0 }
0x3e0e   :  { %v4152_v9 = vpop.permute.xlu1 %4151 }
0x3e0f   :  { %v4154_v8 = vadd.f32 %v4152_v9, %v4047_v58 }
0x3e11   :  { %v4155_v56 = vadd.f32 %v4154_v8, %v8029_v25 }
0x3e13   :  { %6579 = vtanh.f32 %v4155_v56 }
0x3e1d   :  { %v6580_v13 = vpop.eup %6579 }
0x3e1e   :  { %4160 = vrot.lane.b32.xlu0 %v6580_v13, %s6817_s4 }
0x3e90   :  { %v4161_v48 = vpop.permute.xlu0 %4160 }
0x3e91   :  { %v4163_v45 = vmul.f32 %v4161_v48, %v4158_v6 }
0x3e93   :  { %v4164_v32 = vadd.f32 %v4163_v45, %v4157_v15 }
0x3e95   :  { %v8539_v2 = vclamps-f32 %v4164_v32, 5.0 }
0x3e97   :  { %v4167_v54 = vpack.c.bf16 %v8539_v2, %v8539_v2 }
0x3e99   :  { %4169 = vrot.lane.b32.xlu1 %v4167_v54, %s6817_s4 }
0x3e9d   :  { %4268 = vrot.lane.b32.xlu1 %v8484_v17, %s6817_s4 }
0x3f0b   :  { %v4170_v58 = vpop.permute.xlu1 %4169 }
0x3f0c   :  { %6176 = vmatmul.mubr.msk.bf16.vlgmr.msra.gmra.mrb[132].mxu1 %vm229_vm0, %v4170_v58 }
0x3f0d   :  { %6188 = vmatpush3.bf16.msra.mxu1 %v8339_v28  ;;  %6191 = vmatprep.mubr.msk.bf16.mxu1 %vm6816_vm1, %v8875_v0 }
0x3f0e   :  { %6189 = vmatprep.subr.bf16.mxu1 %v8875_v0 }
0x3f0f   :  { %v4269_v61 = vpop.permute.xlu1 %4268 }
0x3f11   :  { %6190 = vmatpush3.bf16.msra.mxu1 %v8348_v24 }
0x3f12   :  { %6203 = vmatprep.subr.bf16.mxu1 %v8875_v0 }
0x3fdf   :  { %v8553_v46 = vpop.f32.mrb[132].mxu1 }
0x3fe0   :  { %v4991_v26 = vpack.c.bf16 %v8553_v46, %v8466_v39  ;;  %4215 = vrot.lane.b32.xlu0 %v8553_v46, %s6819_s29  ;;  %v6177_v12 = vpop.f32.mrb[133].mxu1 }
0x3fe1   :  { %v4211_v7 = vpop.f32.mrb[134].mxu1 }
0x3fe2   :  { %v6178_v34 = vpop.f32.mrb[135].mxu1  ;;  %v1722_v7 = vld [vmem:[%s8890_s7 + $0x30] sm:$0xff] }
0x4052   :  { %v4216_v10 = vpop.permute.xlu0 %4215 }
0x4053   :  { %v4218_v20 = vadd.f32 %v7893_v50, %v4216_v10 }
0x4055   :  { %v4259_v1 = vadd.f32 %v4253_v27, %v4218_v20 }
0x4057   :  { %v4260_v18 = vadd.f32 %v8362_v42, %v4259_v1 }
0x4059   :  { %v5362_v30 = vmul.f32 -1.442695, %v4260_v18 }
0x405b   :  { %6581 = vpow2.f32 %v5362_v30 }
0x4065   :  { %v6582_v47 = vpop.eup %6581 }
0x4066   :  { %v4264_v4 = vadd.f32 1.0, %v6582_v47 }
0x4068   :  { %6583 = vrcp.f32 %v4264_v4 }
0x4072   :  { %v6584_v14 = vpop.eup %6583 }
0x4073   :  { %v4271_v40 = vmul.f32 %v6584_v14, %v4269_v61  ;;  %v4324_v15 = vsub.f32 1.0, %v6584_v14  ;;  %v4323_v32 = vmul.f32 %v6584_v14, %v8484_v17 }
0x4075   :  { %v4272_v22 = vpack.c.bf16 %v4271_v40, %v4271_v40 }
0x4077   :  { %6192 = vmatmul.mubr.msk.bf16.vlgmr.msra.gmra.mrb[136].mxu1 %vm229_vm0, %v4272_v22 }
0x4078   :  { %6204 = vmatpush3.bf16.msra.mxu1 %v7980_v33  ;;  %6205 = vmatprep.mubr.msk.bf16.mxu1 %vm6816_vm1, %v8875_v0 }
0x4079   :  { %6217 = vmatprep.subr.bf16.mxu1 %v8875_v0 }
0x414a   :  { %v4310_v50 = vpop.f32.mrb[136].mxu1 }
0x414b   :  { %4317 = vrot.lane.b32.xlu0 %v4310_v50, %s6809_s3  ;;  %v6193_v27 = vpop.f32.mrb[137].mxu1 }
0x414c   :  { %v4313_v9 = vpop.f32.mrb[138].mxu1 }
0x414d   :  { %v6194_v8 = vpop.f32.mrb[139].mxu1 }
0x41bd   :  { %v4318_v56 = vpop.permute.xlu0 %4317 }
0x41be   :  { %v4320_v13 = vadd.f32 %v4318_v56, %v4218_v20 }
0x41c0   :  { %v4321_v6 = vadd.f32 %v4320_v13, %v7931_v41 }
0x41c2   :  { %6585 = vtanh.f32 %v4321_v6 }
0x41cc   :  { %v6586_v48 = vpop.eup %6585 }
0x41cd   :  { %4326 = vrot.lane.b32.xlu1 %v6586_v48, %s6817_s4 }
0x41d1   :  { %4384 = vrot.lane.b32.xlu1 %v1722_v7, %s6810_s30 }
0x423f   :  { %v4327_v45 = vpop.permute.xlu1 %4326 }
0x4240   :  { %v4329_v54 = vmul.f32 %v4327_v45, %v4324_v15 }
0x4242   :  { %v4330_v12 = vadd.f32 %v4329_v54, %v4323_v32 }
0x4243   :  { %v4385_v22 = vpop.permute.xlu1 %4384 }
0x4244   :  { %v8573_v34 = vclamps-f32 %v4330_v12, 5.0 }
0x4246   :  { %v4333_v10 = vpack.c.bf16 %v8573_v34, %v8573_v34 }
0x4248   :  { %4335 = vrot.lane.b32.xlu0 %v4333_v10, %s6817_s4 }
0x42ba   :  { %v4336_v20 = vpop.permute.xlu0 %4335 }
0x42bb   :  { %6200 = vmatmul.mubr.msk.bf16.vlgmr.msra.gmra.mrb[140].mxu0 %vm229_vm0, %v4336_v20 }
0x42bc   :  { %6210 = vmatpush3.bf16.msra.mxu0 %v8387_v11  ;;  %6213 = vmatprep.mubr.msk.bf16.mxu0 %vm6816_vm1, %v8875_v0 }
0x42bd   :  { %6211 = vmatprep.subr.bf16.mxu0 %v8875_v0 }
0x42c0   :  { %6212 = vmatpush3.bf16.msra.mxu0 %v8393_v36 }
0x42c1   :  { %6225 = vmatprep.subr.bf16.mxu0 %v8875_v0 }
0x42c3   :  { %6214 = vmatmul.mubr.msk.bf16.vlgmr.msra.gmra.mrb[144].mxu0 %vm229_vm0, %v4170_v58 }
0x42c4   :  { %6226 = vmatpush3.bf16.msra.mxu0 %v8259_v38  ;;  %6229 = vmatprep.mubr.msk.bf16.mxu0 %vm6816_vm1, %v8875_v0 }
0x42c5   :  { %6227 = vmatprep.subr.bf16.mxu0 %v8875_v0 }
0x42c8   :  { %6228 = vmatpush3.bf16.msra.mxu0 %v8265_v52 }
0x42c9   :  { %6241 = vmatprep.subr.bf16.mxu0 %v8875_v0 }
0x438e   :  { %v4374_v17 = vpop.f32.mrb[140].mxu0 }
0x438f   :  { %v4375_v1 = vadd.f32 %v8405_v19, %v4374_v17  ;;  %v6201_v18 = vpop.f32.mrb[141].mxu0 }
0x4390   :  { %v4377_v30 = vpop.f32.mrb[142].mxu0 }
0x4391   :  { %4389 = vrot.lane.b32.xlu0 %v4375_v1, %s6810_s30  ;;  %v6202_v47 = vpop.f32.mrb[143].mxu0  ;;  %v4380_v61 = vmul.f32 0.5, %v4375_v1 }
0x4393   :  { %v4381_v40 = vmul.f32 1.442695, %v4380_v61 }
0x4395   :  { %4489 = vrot.lane.b32.xlu0 %v8539_v2, %s6817_s4  ;;  %6587 = vpow2.f32 %v4381_v40 }
0x4396   :  { %v4474_v38 = vpop.f32.mrb[144].mxu0 }
0x4397   :  { %v6215_v58 = vpop.f32.mrb[145].mxu0 }
0x4398   :  { %v4477_v4 = vpop.f32.mrb[146].mxu0 }
0x4399   :  { %v6216_v14 = vpop.f32.mrb[147].mxu0 }
0x439f   :  { %v6588_v52 = vpop.eup %6587 }
0x43a0   :  { %v4387_v50 = vmul.f32 %v6588_v52, %v4385_v22 }
0x4403   :  { %v4390_v27 = vpop.permute.xlu0 %4389 }
0x4404   :  { %v8597_v9 = vadd.f32 %v4390_v27, %v4387_v50 }
0x4406   :  { %v4393_v8 = vpack.c.bf16 %v8597_v9, %v8597_v9 }
0x4407   :  { %v4490_v17 = vpop.permute.xlu0 %4489 }
0x4408   :  { %4395 = vrot.lane.b32.xlu1 %v4393_v8, %s6820_s28 }
0x447a   :  { %v4396_v56 = vpop.permute.xlu1 %4395 }
0x447b   :  { %6206 = vmatmul.mubr.msk.bf16.vlgmr.msra.gmra.mrb[140].mxu1 %vm2032_vm4, %v4396_v56 }
0x447c   :  { %6218 = vmatpush3.bf16.msra.mxu1 %v8417_v21  ;;  %6221 = vmatprep.mubr.msk.bf16.mxu1 %vm6816_vm1, %v8875_v0 }
0x447d   :  { %6219 = vmatprep.subr.bf16.mxu1 %v8875_v0 }
0x4480   :  { %6220 = vmatpush3.bf16.msra.mxu1 %v8423_v60 }
0x4481   :  { %6233 = vmatprep.subr.bf16.mxu1 %v8875_v0 }
0x454e   :  { %v4434_v13 = vpop.f32.mrb[140].mxu1 }
0x454f   :  { %v4480_v6 = vadd.f32 %v4474_v38, %v4434_v13  ;;  %v6207_v48 = vpop.f32.mrb[141].mxu1 }
0x4550   :  { %v4437_v15 = vpop.f32.mrb[142].mxu1 }
0x4551   :  { %v4481_v45 = vadd.f32 %v8430_v49, %v4480_v6  ;;  %v6208_v32 = vpop.f32.mrb[143].mxu1 }
0x4553   :  { %v5368_v54 = vmul.f32 -1.442695, %v4481_v45 }
0x4555   :  { %6589 = vpow2.f32 %v5368_v54 }
0x455f   :  { %v6590_v12 = vpop.eup %6589 }
0x4560   :  { %v4485_v7 = vadd.f32 1.0, %v6590_v12 }
0x4562   :  { %6591 = vrcp.f32 %v4485_v7 }
0x456c   :  { %v6592_v10 = vpop.eup %6591 }
0x456d   :  { %v4492_v1 = vmul.f32 %v6592_v10, %v4490_v17  ;;  %v4544_v22 = vmul.f32 %v6592_v10, %v8539_v2 }
0x456f   :  { %v4493_v18 = vpack.c.bf16 %v4492_v1, %v4492_v1 }
0x4571   :  { %6222 = vmatmul.mubr.msk.bf16.vlgmr.msra.gmra.mrb[144].mxu1 %vm229_vm0, %v4493_v18 }
0x4572   :  { %6234 = vmatpush3.bf16.msra.mxu1 %v8290_v59  ;;  %6237 = vmatprep.mubr.msk.bf16.mxu1 %vm6816_vm1, %v8875_v0 }
0x4573   :  { %6235 = vmatprep.subr.bf16.mxu1 %v8875_v0 }
0x4576   :  { %6236 = vmatpush3.bf16.msra.mxu1 %v8299_v5 }
0x4577   :  { %6249 = vmatprep.subr.bf16.mxu1 %v8875_v0 }
0x4579   :  { %6238 = vmatmul.mubr.msk.bf16.vlgmr.msra.gmra.mrb[148].mxu1 %vm229_vm0, %v4336_v20 }
0x457a   :  { %6250 = vmatpush3.bf16.msra.mxu1 %v8308_v3  ;;  %6253 = vmatprep.mubr.msk.bf16.mxu1 %vm6816_vm1, %v8875_v0 }
0x457b   :  { %6251 = vmatprep.subr.bf16.mxu1 %v8875_v0 }
0x457e   :  { %6252 = vmatpush3.bf16.msra.mxu1 %v8317_v43  ;;  %v4545_v43 = vsub.f32 1.0, %v6592_v10 }
0x457f   :  { %6263 = vmatprep.subr.bf16.mxu1 %v8875_v0 }
0x4644   :  { %v4531_v59 = vpop.f32.mrb[144].mxu1 }
0x4645   :  { %4538 = vrot.lane.b32.xlu1 %v4531_v59, %s6809_s3  ;;  %v6223_v30 = vpop.f32.mrb[145].mxu1 }
0x4646   :  { %v4534_v5 = vpop.f32.mrb[146].mxu1 }
0x4647   :  { %v6224_v47 = vpop.f32.mrb[147].mxu1 }
0x464c   :  { %v4640_v38 = vpop.f32.mrb[148].mxu1 }
0x464d   :  { %v6239_v58 = vpop.f32.mrb[149].mxu1 }
0x464e   :  { %v4643_v20 = vpop.f32.mrb[150].mxu1 }
0x464f   :  { %v6240_v4 = vpop.f32.mrb[151].mxu1 }
0x46b7   :  { %v4539_v3 = vpop.permute.xlu1 %4538 }
0x46b8   :  { %v4541_v14 = vadd.f32 %v4539_v3, %v4434_v13 }
0x46ba   :  { %v4542_v61 = vadd.f32 %v4541_v14, %v8029_v25 }
0x46bc   :  { %6593 = vtanh.f32 %v4542_v61  ;;  %v1723_v61 = vld [vmem:[%s8890_s7 + $0x38] sm:$0xff] }
0x46c6   :  { %v6594_v40 = vpop.eup %6593 }
0x46c7   :  { %4547 = vrot.lane.b32.xlu0 %v6594_v40, %s6817_s4 }
0x4739   :  { %v4548_v52 = vpop.permute.xlu0 %4547 }
0x473a   :  { %v4550_v50 = vmul.f32 %v4548_v52, %v4545_v43  ;;  %v6665_v52 = vld [vmem:[#allocation10 + $0x8] sm:$0xff]  }
0x473c   :  { %v4551_v27 = vadd.f32 %v4550_v50, %v4544_v22 }
0x473e   :  { %v8628_v8 = vclamps-f32 %v4551_v27, 5.0 }
0x4740   :  { %v4554_v56 = vpack.c.bf16 %v8628_v8, %v8628_v8 }
0x4742   :  { %4556 = vrot.lane.b32.xlu1 %v4554_v56, %s6817_s4 }
0x4746   :  { %4655 = vrot.lane.b32.xlu1 %v8573_v34, %s6817_s4 }
0x47b4   :  { %v4557_v13 = vpop.permute.xlu1 %4556 }
0x47b5   :  { %6230 = vmatmul.mubr.msk.bf16.vlgmr.msra.gmra.mrb[148].mxu0 %vm229_vm0, %v4557_v13 }
0x47b6   :  { %6242 = vmatpush3.bf16.msra.mxu0 %v8339_v28  ;;  %6245 = vmatprep.mubr.msk.bf16.mxu0 %vm6816_vm1, %v8875_v0 }
0x47b7   :  { %6243 = vmatprep.subr.bf16.mxu0 %v8875_v0 }
0x47b8   :  { %v4656_v17 = vpop.permute.xlu1 %4655 }
0x47ba   :  { %6244 = vmatpush3.bf16.msra.mxu0 %v8348_v24 }
0x47bb   :  { %6257 = vmatprep.subr.bf16.mxu0 %v8875_v0 }
0x4888   :  { %v8642_v2 = vpop.f32.mrb[148].mxu0 }
0x4889   :  { %4602 = vrot.lane.b32.xlu0 %v8642_v2, %s6819_s29  ;;  %v6231_v6 = vpop.f32.mrb[149].mxu0 }
0x488a   :  { %v4598_v48 = vpop.f32.mrb[150].mxu0 }
0x488b   :  { %v6232_v15 = vpop.f32.mrb[151].mxu0 }
0x48fb   :  { %v4603_v45 = vpop.permute.xlu0 %4602 }
0x48fc   :  { %v4605_v28 = vadd.f32 %v7897_v55, %v4603_v45 }
0x48fe   :  { %v4646_v32 = vadd.f32 %v4640_v38, %v4605_v28 }
0x4900   :  { %v4647_v54 = vadd.f32 %v8362_v42, %v4646_v32 }
0x4902   :  { %v5373_v12 = vmul.f32 -1.442695, %v4647_v54 }
0x4904   :  { %6595 = vpow2.f32 %v5373_v12 }
0x490e   :  { %v6596_v7 = vpop.eup %6595 }
0x490f   :  { %v4651_v24 = vadd.f32 1.0, %v6596_v7 }
0x4911   :  { %6597 = vrcp.f32 %v4651_v24 }
0x491b   :  { %v6598_v10 = vpop.eup %6597 }
0x491c   :  { %v4658_v1 = vmul.f32 %v6598_v10, %v4656_v17  ;;  %v4710_v4 = vmul.f32 %v6598_v10, %v8573_v34  ;;  %v6664_v34 = vld [vmem:[#allocation10] sm:$0xff]  }
0x491e   :  { %v4659_v18 = vpack.c.bf16 %v4658_v1, %v4658_v1 }
0x4920   :  { %6246 = vmatmul.mubr.msk.bf16.vlgmr.msra.gmra.mrb[152].mxu0 %vm229_vm0, %v4659_v18 }
0x4921   :  { %6258 = vmatpush3.bf16.msra.mxu0 %v7980_v33  ;;  %6259 = vmatprep.mubr.msk.bf16.mxu0 %vm6816_vm1, %v8875_v0  ;;  %v4711_v33 = vsub.f32 1.0, %v6598_v10  ;;  %v4988_v10 = vld [vmem:[%s8835_s24] sm:$0xf]  ;;  %s6821_s24 = smov 16  }
0x4922   :  { %6271 = vmatprep.subr.bf16.mxu0 %v8875_v0  ;;  %v5015_v17 = vsel %vm5013_vm5, %v4988_v10, 0 }
0x49f3   :  { %v4697_v55 = vpop.f32.mrb[152].mxu0 }
0x49f4   :  { %4704 = vrot.lane.b32.xlu0 %v4697_v55, %s6809_s3  ;;  %v6247_v42 = vpop.f32.mrb[153].mxu0 }
0x49f5   :  { %v4700_v59 = vpop.f32.mrb[154].mxu0 }
0x49f6   :  { %v6248_v30 = vpop.f32.mrb[155].mxu0 }
0x4a66   :  { %v4705_v5 = vpop.permute.xlu0 %4704 }
0x4a67   :  { %v4707_v47 = vadd.f32 %v4705_v5, %v4605_v28 }
0x4a69   :  { %v4708_v38 = vadd.f32 %v4707_v47, %v7931_v41 }
0x4a6b   :  { %6599 = vtanh.f32 %v4708_v38 }
0x4a75   :  { %v6600_v58 = vpop.eup %6599 }
0x4a76   :  { %4713 = vrot.lane.b32.xlu1 %v6600_v58, %s6817_s4 }
0x4a7a   :  { %4771 = vrot.lane.b32.xlu1 %v1723_v61, %s6810_s30 }
0x4ae8   :  { %v4714_v20 = vpop.permute.xlu1 %4713 }
0x4ae9   :  { %v4716_v3 = vmul.f32 %v4714_v20, %v4711_v33 }
0x4aeb   :  { %v4717_v14 = vadd.f32 %v4716_v3, %v4710_v4 }
0x4aec   :  { %v4772_v32 = vpop.permute.xlu1 %4771 }
0x4aed   :  { %v5375_v40 = vclamps-f32 %v4717_v14, 5.0 }
0x4aef   :  { %v4720_v43 = vpack.c.bf16 %v5375_v40, %v5375_v40 }
0x4af1   :  { %4722 = vrot.lane.b32.xlu0 %v4720_v43, %s6817_s4 }
0x4b63   :  { %v4723_v41 = vpop.permute.xlu0 %4722 }
0x4b64   :  { %6254 = vmatmul.mubr.msk.bf16.vlgmr.msra.gmra.mrb[152].mxu1 %vm229_vm0, %v4723_v41 }
0x4b65   :  { %6264 = vmatpush3.bf16.msra.mxu1 %v8387_v11  ;;  %6267 = vmatprep.mubr.msk.bf16.mxu1 %vm6816_vm1, %v8875_v0 }
0x4b66   :  { %6265 = vmatprep.subr.bf16.mxu1 %v8875_v0 }
0x4b69   :  { %6266 = vmatpush3.bf16.msra.mxu1 %v8393_v36 }
0x4b6a   :  { %6279 = vmatprep.subr.bf16.mxu1 %v8875_v0 }
0x4b6c   :  { %6268 = vmatmul.mubr.msk.bf16.vlgmr.msra.gmra.mrb[156].mxu1 %vm229_vm0, %v4557_v13 }
0x4b6d   :  { %6280 = vmatpush3.bf16.msra.mxu1 %v6664_v34  ;;  %6283 = vmatprep.mubr.msk.bf16.mxu1 %vm6816_vm1, %v8875_v0 }
0x4b6e   :  { %6281 = vmatprep.subr.bf16.mxu1 %v8875_v0 }
0x4b71   :  { %6282 = vmatpush3.bf16.msra.mxu1 %v6665_v52 }
0x4c37   :  { %v4761_v11 = vpop.f32.mrb[152].mxu1 }
0x4c38   :  { %v4762_v22 = vadd.f32 %v8405_v19, %v4761_v11  ;;  %v6255_v50 = vpop.f32.mrb[153].mxu1 }
0x4c39   :  { %v4764_v27 = vpop.f32.mrb[154].mxu1 }
0x4c3a   :  { %4776 = vrot.lane.b32.xlu0 %v4762_v22, %s6810_s30  ;;  %v6256_v36 = vpop.f32.mrb[155].mxu1  ;;  %v4767_v15 = vmul.f32 0.5, %v4762_v22 }
0x4c3c   :  { %v4768_v45 = vmul.f32 1.442695, %v4767_v15 }
0x4c3e   :  { %4876 = vrot.lane.b32.xlu0 %v8628_v8, %s6817_s4  ;;  %6601 = vpow2.f32 %v4768_v45 }
0x4c3f   :  { %v4861_v56 = vpop.f32.mrb[156].mxu1 }
0x4c40   :  { %v6269_v13 = vpop.f32.mrb[157].mxu1 }
0x4c41   :  { %v4864_v6 = vpop.f32.mrb[158].mxu1 }
0x4c42   :  { %v6270_v48 = vpop.f32.mrb[159].mxu1 }
0x4c48   :  { %v6602_v28 = vpop.eup %6601 }
0x4c49   :  { %v4774_v54 = vmul.f32 %v6602_v28, %v4772_v32 }
0x4cac   :  { %v4777_v12 = vpop.permute.xlu0 %4776 }
0x4cad   :  { %v8677_v19 = vadd.f32 %v4777_v12, %v4774_v54 }
0x4caf   :  { %v4780_v7 = vpack.c.bf16 %v8677_v19, %v8677_v19 }
0x4cb0   :  { %v4877_v47 = vpop.permute.xlu0 %4876 }
0x4cb1   :  { %4782 = vrot.lane.b32.xlu1 %v4780_v7, %s6820_s28 }
0x4d23   :  { %v4783_v24 = vpop.permute.xlu1 %4782 }
0x4d24   :  { %6260 = vmatmul.mubr.msk.bf16.vlgmr.msra.gmra.mrb[156].mxu0 %vm2032_vm4, %v4783_v24 }
0x4d25   :  { %6272 = vmatpush3.bf16.msra.mxu0 %v8417_v21  ;;  %6275 = vmatprep.mubr.msk.bf16.mxu0 %vm6816_vm1, %v8875_v0 }
0x4d26   :  { %6273 = vmatprep.subr.bf16.mxu0 %v8875_v0 }
0x4d29   :  { %6274 = vmatpush3.bf16.msra.mxu0 %v8423_v60 }
0x4d2a   :  { %6297 = vmatprep.subr.msk.bf16.mxu0 %vm5013_vm5, %v4988_v10 }
0x4df7   :  { %v4821_v1 = vpop.f32.mrb[156].mxu0 }
0x4df8   :  { %v4867_v18 = vadd.f32 %v4861_v56, %v4821_v1  ;;  %v6261_v55 = vpop.f32.mrb[157].mxu0 }
0x4df9   :  { %v4824_v42 = vpop.f32.mrb[158].mxu0 }
0x4dfa   :  { %v4868_v21 = vadd.f32 %v8430_v49, %v4867_v18  ;;  %v6262_v59 = vpop.f32.mrb[159].mxu0 }
0x4dfc   :  { %v5379_v30 = vmul.f32 -1.442695, %v4868_v21 }
0x4dfe   :  { %6603 = vpow2.f32 %v5379_v30 }
0x4e08   :  { %v6604_v5 = vpop.eup %6603 }
0x4e09   :  { %v4872_v0 = vadd.f32 1.0, %v6604_v5 }
0x4e0b   :  { %6605 = vrcp.f32 %v4872_v0 }
0x4e15   :  { %v6606_v60 = vpop.eup %6605 }
0x4e16   :  { %v4879_v38 = vmul.f32 %v6606_v60, %v4877_v47 }
0x4e18   :  { %v4880_v58 = vpack.c.bf16 %v4879_v38, %v4879_v38 }
0x4e1a   :  { %6276 = vmatmul.mubr.msk.bf16.vlgmr.msra.gmra.mrb[160].mxu0 %vm229_vm0, %v4880_v58 }
0x4e1b   :  { %6289 = vmatprep.mubr.msk.bf16.mxu0 %vm5000_vm6, %v4989_v37  ;;  %6288 = vmatpush3.bf16.msra.mxu0 %v5015_v17 }
0x4e22   :  { %6290 = vmatmul.mubr.msk.bf16.vlgmr.msra.gmra.mrb[164].mxu0 %vm5000_vm6, %v4990_v29 }
0x4e23   :  { %6293 = vmatprep.mubr.msk.bf16.mxu0 %vm5000_vm6, %v4991_v26 }
0x4eed   :  { %v4918_v49 = vpop.f32.mrb[160].mxu0 }
0x4eee   :  { %4925 = vrot.lane.b32.xlu1 %v4918_v49, %s6809_s3  ;;  %v6277_v33 = vpop.f32.mrb[161].mxu0  ;;  %s6822_s3 = smov 20  }
0x4eef   :  { %v4921_v20 = vpop.f32.mrb[162].mxu0 }
0x4ef0   :  { %v6278_v4 = vpop.f32.mrb[163].mxu0 }
0x4ef5   :  { %v6291_v3 = vpop.f32.mrb[164].mxu0 }
0x4ef6   :  { %v5051_v14 = vpop.f32.mrb[165].mxu0 }
0x4ef7   :  { %v6292_v37 = vpop.f32.mrb[166].mxu0 }
0x4ef8   :  { %v5054_v61 = vpop.f32.mrb[167].mxu0 }
0x4f60   :  { %v4926_v40 = vpop.permute.xlu1 %4925 }
0x4f61   :  { %v4928_v43 = vadd.f32 %v4926_v40, %v4821_v1 }
0x4f63   :  { %v4929_v41 = vadd.f32 %v4928_v43, %v8029_v25  ;;  %v8727_v25 = vld [vmem:[%s8836_s25] ss:$0 sm:$0xff] }
0x4f64   :  { %v5060_v52 = vadd.f32 %v6291_v3, %v8727_v25  ;;  %v5063_v54 = vadd.f32 %v6292_v37, %v8727_v25 }
0x4f65   :  { %6607 = vtanh.f32 %v4929_v41 }
0x4f66   :  { %v5086_v50 = vmul.f32 1.442695, %v5060_v52  ;;  %v5088_v7 = vmul.f32 1.442695, %v5063_v54 }
0x4f6f   :  { %v6608_v29 = vpop.eup %6607 }
0x4f70   :  { %4934 = vrot.lane.b32.xlu0 %v6608_v29, %s6817_s4 }
0x4f74   :  { %5099 = vrot.lane.b32.xlu0 %v8048_v53, %s6821_s24  ;;  %v4932_v53 = vsub.f32 1.0, %v6606_v60 }
0x4f78   :  { %5103 = vrot.lane.b32.xlu0 %v8224_v62, %s6821_s24 }
0x4f7c   :  { %5107 = vrot.lane.b32.xlu0 %v8466_v39, %s6821_s24  ;;  %v5052_v39 = vadd.f32 %v8727_v25, %v5051_v14 }
0x4f80   :  { %5111 = vrot.lane.b32.xlu0 %v8642_v2, %s6821_s24 }
0x4f84   :  { %5131 = vrot.lane.b32.xlu0 %v7990_v63, %s6822_s3  ;;  %v4931_v63 = vmul.f32 %v6606_v60, %v8628_v8 }
0x4f88   :  { %5135 = vrot.lane.b32.xlu0 %v8179_v51, %s6822_s3 }
0x4f8c   :  { %5139 = vrot.lane.b32.xlu0 %v8411_v57, %s6822_s3  ;;  %v5082_v57 = vmul.f32 1.442695, %v5052_v39 }
0x4f8e   :  { %6609 = vpow2.f32 %v5082_v57 }
0x4f8f   :  { %6611 = vpow2.f32 %v5086_v50 }
0x4f90   :  { %5143 = vrot.lane.b32.xlu0 %v8597_v9, %s6822_s3 }
0x4f98   :  { %v6610_v36 = vpop.eup %6609 }
0x4fe2   :  { %v4935_v62 = vpop.permute.xlu0 %4934 }
0x4fe3   :  { %v4937_v26 = vmul.f32 %v4935_v62, %v4932_v53 }
0x4fe5   :  { %v4938_v34 = vadd.f32 %v4937_v26, %v4931_v63 }
0x4fe6   :  { %v5100_v51 = vpop.permute.xlu0 %5099 }
0x4fe7   :  { %v5381_v11 = vclamps-f32 %v4938_v34, 5.0  ;;  %v5156_v56 = vsel %vm5155_vm7, %v6610_v36, %v5100_v51 }
0x4fe9   :  { %v4941_v22 = vpack.c.bf16 %v5381_v11, %v5381_v11 }
0x4fea   :  { %v5104_v9 = vpop.permute.xlu0 %5103 }
0x4feb   :  { %4943 = vrot.lane.b32.xlu1 %v4941_v22, %s6817_s4 }
0x4fee   :  { %v8733_v27 = vpop.permute.xlu0 %5107 }
0x4fef   :  { %5101 = vrot.lane.b32.xlu1 %v8135_v16, %s6821_s24  ;;  %v6612_v16 = vpop.eup %6611 }
0x4ff2   :  { %v8737_v8 = vpop.permute.xlu0 %5111 }
0x4ff3   :  { %5105 = vrot.lane.b32.xlu1 %v8352_v31, %s6821_s24  ;;  %v5158_v31 = vsel %vm5155_vm7, %v6612_v16, %v5104_v9 }
0x4ff6   :  { %v5132_v13 = vpop.permute.xlu0 %5131 }
0x4ff7   :  { %v5165_v6 = vsel %vm5164_vm8, %v5156_v56, %v5132_v13  ;;  %5109 = vrot.lane.b32.xlu1 %v8553_v46, %s6821_s24  ;;  %v5055_v46 = vadd.f32 %v8727_v25, %v5054_v61 }
0x4ff8   :  { %v5174_v48 = vsel %vm5173_vm9, %v5165_v6, 0.0 }
0x4ff9   :  { %5182 = vst [vmem:[%s8837_s26] sm:$0xff] %v5174_v48  ;;  %v5084_v12 = vmul.f32 1.442695, %v5055_v46 }
0x4ffa   :  { %v5136_v15 = vpop.permute.xlu0 %5135 }
0x4ffb   :  { %v5167_v45 = vsel %vm5164_vm8, %v5158_v31, %v5136_v15  ;;  %5133 = vrot.lane.b32.xlu1 %v8090_v44, %s6822_s3  ;;  %6613 = vpow2.f32 %v5084_v12 }
0x4ffc   :  { %v5176_v28 = vsel %vm5173_vm9, %v5167_v45, 0.0  ;;  %6615 = vpow2.f32 %v5088_v7 }
0x4ffd   :  { %5184 = vst [vmem:[%s8837_s26 + $0x10] sm:$0xff] %v5176_v28 }
0x4ffe   :  { %v5140_v41 = vpop.permute.xlu0 %5139 }
0x4fff   :  { %5137 = vrot.lane.b32.xlu1 %v8273_v35, %s6822_s3 }
0x5002   :  { %v5144_v39 = vpop.permute.xlu0 %5143 }
0x5003   :  { %5141 = vrot.lane.b32.xlu1 %v8508_v23, %s6822_s3 }
0x5005   :  { %v6614_v17 = vpop.eup %6613 }
0x5006   :  { %v6616_v55 = vpop.eup %6615 }
0x505d   :  { %v4944_v32 = vpop.permute.xlu1 %4943 }
0x505e   :  { %6284 = vmatmul.mubr.msk.bf16.vlgmr.msra.gmra.mrb[160].mxu1 %vm229_vm0, %v4944_v32 }
0x5061   :  { %v5102_v44 = vpop.permute.xlu1 %5101 }
0x5062   :  { %v5157_v35 = vsel %vm5155_vm7, %v6614_v17, %v5102_v44 }
0x5065   :  { %v5106_v24 = vpop.permute.xlu1 %5105 }
0x5066   :  { %v5159_v42 = vsel %vm5155_vm7, %v6616_v55, %v5106_v24 }
0x5069   :  { %v5110_v10 = vpop.permute.xlu1 %5109 }
0x506d   :  { %v5134_v1 = vpop.permute.xlu1 %5133 }
0x506e   :  { %v5166_v23 = vsel %vm5164_vm8, %v5157_v35, %v5134_v1 }
0x506f   :  { %v5175_v18 = vsel %vm5173_vm9, %v5166_v23, 0.0 }
0x5070   :  { %5183 = vst [vmem:[%s8837_s26 + $0x8] sm:$0xff] %v5175_v18 }
0x5071   :  { %v5138_v21 = vpop.permute.xlu1 %5137 }
0x5072   :  { %v5168_v59 = vsel %vm5164_vm8, %v5159_v42, %v5138_v21 }
0x5073   :  { %v5177_v30 = vsel %vm5173_vm9, %v5168_v59, 0.0 }
0x5074   :  { %5185 = vst [vmem:[%s8837_s26 + $0x18] sm:$0xff] %v5177_v30 }
0x5131   :  { %v4982_v5 = vpop.f32.mrb[160].mxu1 }
0x5132   :  { %v4992_v0 = vpack.c.bf16 %v4982_v5, %v8642_v2  ;;  %5113 = vrot.lane.b32.xlu1 %v4982_v5, %s6821_s24  ;;  %v6285_v60 = vpop.f32.mrb[161].mxu1 }
0x5133   :  { %v4985_v47 = vpop.f32.mrb[162].mxu1 }
0x5134   :  { %v6286_v38 = vpop.f32.mrb[163].mxu1  ;;  %6294 = vmatmul.mubr.msk.bf16.gmra.mrb[168].mxu0 %vm5000_vm6, %v4992_v0 }
0x5136   :  { %5145 = vrot.lane.b32.xlu1 %v8677_v19, %s6822_s3  ;;  %v5142_v19 = vpop.permute.xlu1 %5141 }
0x51a4   :  { %v5114_v29 = vpop.permute.xlu1 %5113 }
0x51a8   :  { %v5146_v52 = vpop.permute.xlu1 %5145 }
0x5207   :  { %v6295_v58 = vpop.f32.mrb[168].mxu0 }
0x5208   :  { %v5076_v49 = vadd.f32 %v6295_v58, %v8727_v25  ;;  %v5067_v33 = vpop.f32.mrb[169].mxu0 }
0x5209   :  { %v5068_v20 = vadd.f32 %v8727_v25, %v5067_v33  ;;  %v6296_v4 = vpop.f32.mrb[170].mxu0 }
0x520a   :  { %v5094_v3 = vmul.f32 1.442695, %v5076_v49  ;;  %v5079_v2 = vadd.f32 %v6296_v4, %v8727_v25  ;;  %v5070_v14 = vpop.f32.mrb[171].mxu0 }
0x520b   :  { %v5090_v37 = vmul.f32 1.442695, %v5068_v20  ;;  %v5071_v61 = vadd.f32 %v8727_v25, %v5070_v14 }
0x520c   :  { %6617 = vpow2.f32 %v5094_v3  ;;  %v5096_v40 = vmul.f32 1.442695, %v5079_v2 }
0x520d   :  { %6619 = vpow2.f32 %v5090_v37  ;;  %v5092_v43 = vmul.f32 1.442695, %v5071_v61 }
0x520e   :  { %6621 = vpow2.f32 %v5096_v40 }
0x520f   :  { %6623 = vpow2.f32 %v5092_v43 }
0x5216   :  { %v6618_v53 = vpop.eup %6617 }
0x5217   :  { %v6620_v62 = vpop.eup %6619  ;;  %v5162_v63 = vsel %vm5155_vm7, %v6618_v53, %v8737_v8 }
0x5218   :  { %v6622_v26 = vpop.eup %6621  ;;  %v5171_v34 = vsel %vm5164_vm8, %v5162_v63, %v5144_v39  ;;  %v5160_v25 = vsel %vm5155_vm7, %v6620_v62, %v8733_v27 }
0x5219   :  { %v6624_v51 = vpop.eup %6623  ;;  %v5180_v57 = vsel %vm5173_vm9, %v5171_v34, 0.0  ;;  %v5169_v11 = vsel %vm5164_vm8, %v5160_v25, %v5140_v41  ;;  %v5163_v22 = vsel %vm5155_vm7, %v6622_v26, %v5114_v29 }
0x521a   :  { %5188 = vst [vmem:[%s8837_s26 + $0x30] sm:$0xff] %v5180_v57  ;;  %v5178_v9 = vsel %vm5173_vm9, %v5169_v11, 0.0  ;;  %v5172_v50 = vsel %vm5164_vm8, %v5163_v22, %v5146_v52  ;;  %v5161_v8 = vsel %vm5155_vm7, %v6624_v51, %v5110_v10 }
0x521b   :  { %5186 = vst [vmem:[%s8837_s26 + $0x20] sm:$0xff] %v5178_v9  ;;  %v5181_v27 = vsel %vm5173_vm9, %v5172_v50, 0.0  ;;  %v5170_v36 = vsel %vm5164_vm8, %v5161_v8, %v5142_v19 }
0x521c   :  { %5189 = vst [vmem:[%s8837_s26 + $0x38] sm:$0xff] %v5181_v27  ;;  %v5179_v56 = vsel %vm5173_vm9, %v5170_v36, 0.0 }
0x521d   :  { %5187 = vst [vmem:[%s8837_s26 + $0x28] sm:$0xff] %v5179_v56 }
0x521e   :  { %5194 = vsyncpa [#allocation3], 1 }
0x521f   :  { %5195 = vsyncpa [#allocation5], 1 }
0x5220   :  { %5196 = vsyncpa [#allocation8], 1 }
0x5221   :  { %5197 = vsyncpa [#allocation11], 1 }

</bundles_post_ra>
